<compile_context>
chip_gen: v6e
topology: v6e:2x2x1
jax: 0.10.0
libtpu: 0.0.40
codegen_flags: <defaults>
</compile_context>

<pallas_src>
import functools

import jax
import jax.numpy as jnp
from jax.experimental import pallas as pl
from jax.experimental.pallas import tpu as pltpu

EPS = 1e-5


# ----------------------------------------------------------------------------
# Conv1d(k=3, pad=1) as three per-tap MXU matmuls (no im2col)
# ----------------------------------------------------------------------------
def _conv3(x, w_ref):
    """Channels-last Conv1d(k=3, pad=1) over L.

    x:     (bt, L, Cin)   bf16 activations (channels on the 128-lane axis)
    w_ref: (3, Cin, Cout) bf16 weight ref, tap-major, BN scale pre-folded
    returns (bt*L, Cout)  f32 accumulator
    """
    bt, L, cin = x.shape
    n = bt * L
    zero = jnp.zeros((bt, 1, cin), x.dtype)
    # center tap
    acc = jnp.dot(x.reshape(n, cin), w_ref[1], preferred_element_type=jnp.float32)
    # left tap: x[l-1] (row 0 of each sequence is the zero pad)
    x_prev = jnp.concatenate([zero, x[:, :L - 1, :]], axis=1)
    acc = acc + jnp.dot(x_prev.reshape(n, cin), w_ref[0],
                        preferred_element_type=jnp.float32)
    # right tap: x[l+1] (row L-1 of each sequence is the zero pad)
    x_next = jnp.concatenate([x[:, 1:, :], zero], axis=1)
    acc = acc + jnp.dot(x_next.reshape(n, cin), w_ref[2],
                        preferred_element_type=jnp.float32)
    return acc


# ----------------------------------------------------------------------------
# Fused UNet-block kernel
# ----------------------------------------------------------------------------
def _block_kernel(*refs, n_in, pool):
    """[pool-on-load] -> Conv3+shift+ReLU -> Conv3+shift+ReLU -> [1x1 matmul].

    Eval-mode BatchNorm is pre-folded: its scale lives in the bf16 weights, its
    shift in s1/s2, so each conv's epilogue is just `acc + shift` (+ ReLU).
    The optional trailing matmul is either the next ConvTranspose1d(k=2, s=2)
    (both taps pre-concatenated into one (Cmid, 2*Cup) weight) or the final
    Conv1d(k=1) output head.
    """
    x_refs = refs[:n_in]
    w1_refs = refs[n_in:2 * n_in]
    s1_ref, w2_ref, s2_ref = refs[2 * n_in:2 * n_in + 3]
    ep_refs = refs[2 * n_in + 3:-1]
    out_ref = refs[-1]

    if pool:
        # Input block is (bt, L, 2*C): adjacent length-pairs packed along lanes
        # (free HBM view); MaxPool1d(2) is a max of the two lane halves.
        v = x_refs[0][...]
        c = v.shape[-1] // 2
        xs = [jnp.maximum(v[:, :, :c], v[:, :, c:])]
    else:
        # Multiple inputs == channel concat fused via Cin-split conv-1 weights.
        xs = [r[...] for r in x_refs]
    bt, L = xs[0].shape[0], xs[0].shape[1]

    # ---- conv1 (+ folded BN shift) + ReLU ----------------------------------
    acc = _conv3(xs[0], w1_refs[0])
    for xv, wr in zip(xs[1:], w1_refs[1:]):
        acc = acc + _conv3(xv, wr)
    cmid = acc.shape[-1]
    h = jnp.maximum(acc + s1_ref[...], 0.0)              # f32 epilogue
    h = h.astype(jnp.bfloat16).reshape(bt, L, cmid)      # stays in VMEM

    # ---- conv2 (+ folded BN shift) + ReLU ----------------------------------
    y = jnp.maximum(_conv3(h, w2_ref) + s2_ref[...], 0.0)

    # ---- optional fused epilogue: ConvTranspose(k=2,s=2) or 1x1 head -------
    if ep_refs:
        w_ep, b_ep = ep_refs
        y = jnp.dot(y.astype(jnp.bfloat16), w_ep[...],
                    preferred_element_type=jnp.float32) + b_ep[...]
    out_ref[...] = y.astype(out_ref.dtype).reshape(out_ref.shape)


# ----------------------------------------------------------------------------
# pallas_call wrapper for one fused block
# ----------------------------------------------------------------------------
def unet_block(inputs, params, *, pool=False, ep_params=(), bt=1,
               out_dtype=jnp.bfloat16):
    """One fused UNet block as a single batch-tiled, pipelined pallas_call.

    inputs    : list of (B, L, C_i) bf16 arrays. pool=True expects a single
                (B, L, 2*C) array with adjacent length-pairs packed along lanes.
    params    : (w1_pieces, shift1, w2, shift2); BN pre-folded; conv weights
                tap-major (3, Cin_piece, Cout).
    ep_params : () | (weight (Cmid, Cout'), bias (1, Cout')) trailing matmul
                (pre-concatenated ConvTranspose taps, or the 1x1 output head).
    """
    w1_pieces, s1, w2, s2 = params
    n_in = len(inputs)
    B, L = inputs[0].shape[0], inputs[0].shape[1]
    assert B % bt == 0, (B, bt)

    cmid = w2.shape[-1]
    cout = ep_params[0].shape[-1] if ep_params else cmid
    cin_eff = (inputs[0].shape[-1] // 2 if pool
               else sum(x.shape[-1] for x in inputs))

    in_specs, args = [], []
    for x in inputs:                      # batch-tiled, pipelined activations
        in_specs.append(pl.BlockSpec((bt, L, x.shape[-1]), lambda i: (i, 0, 0)))
        args.append(x)
    weights = list(w1_pieces) + [s1, w2, s2] + list(ep_params)
    for w in weights:                     # grid-resident weights
        # TODO(synk): pipeline_mode=pl.Buffered(1) would drop the second buffer
        # of each resident weight (a few hundred KiB of v7x VMEM headroom).
        in_specs.append(pl.BlockSpec(w.shape, lambda i, nd=w.ndim: (0,) * nd))
        args.append(w)

    # --- advisory cost estimate (helps XLA schedule the five calls) ---------
    flops = 2 * B * L * 3 * (cin_eff + cmid) * cmid
    if ep_params:
        flops += 2 * B * L * cmid * cout
    bytes_accessed = (sum(int(x.size) * x.dtype.itemsize for x in inputs)
                      + B * L * cout * jnp.dtype(out_dtype).itemsize
                      + sum(int(w.size) * w.dtype.itemsize for w in weights))
    cost = pl.CostEstimate(flops=int(flops), transcendentals=0,
                           bytes_accessed=int(bytes_accessed))

    # --- explicit VMEM budget: double-buffered tiles + weights + temporaries -
    tile_in = sum(bt * L * x.shape[-1] * x.dtype.itemsize for x in inputs)
    tile_out = bt * L * cout * jnp.dtype(out_dtype).itemsize
    w_bytes = sum(int(w.size) * w.dtype.itemsize for w in weights)
    # in-kernel temporaries: f32 acc + f32 epilogue, bf16 h, one shifted copy
    tmp = bt * L * (4 * cmid + 4 * cout + 2 * cmid + 2 * max(cin_eff, cmid))
    need = 2 * (tile_in + tile_out + w_bytes) + tmp
    # Floor above v5e's 16 MiB scoped default; cap below v7x's 64 MiB physical.
    vmem_limit = int(min(max(2 * need, 32 << 20), 60 << 20))

    kernel = functools.partial(_block_kernel, n_in=n_in, pool=pool)
    return pl.pallas_call(
        kernel,
        grid=(B // bt,),
        in_specs=in_specs,
        out_specs=pl.BlockSpec((bt, L, cout), lambda i: (i, 0, 0)),
        out_shape=jax.ShapeDtypeStruct((B, L, cout), out_dtype),
        compiler_params=pltpu.CompilerParams(
            dimension_semantics=("parallel",),   # independent batch tiles
            vmem_limit_bytes=vmem_limit),
        cost_estimate=cost,
    )(*args)


def _choose_bt(B, L, base, budget_bytes=24 << 20):
    """Pick the batch-tile size: (a) keep a conservative per-sample VMEM
    estimate under `budget_bytes` (well inside v7x's 64 MiB physical VMEM),
    (b) keep >= 4 grid steps so the BlockSpec pipeline overlaps DMA with
    compute and both v7x TensorCores get >= 2 steps, and (c) within that, grow
    bt until bt*L >= 256 rows so the matmul M dimension fills the MXU."""
    per_sample = 24 * L * base + (1 << 16)
    bt = 1
    for d in range(2, B + 1):
        if B % d or B // d < 4 or d * per_sample > budget_bytes:
            continue
        if bt * L < 256:
            bt = d
    return bt


# ----------------------------------------------------------------------------
# Parameter initialization (deterministic, synthetic — no checkpoint loading)
# ----------------------------------------------------------------------------
def _init_conv_bn_folded(key, cin_splits, cout, K=3):
    """Conv1d(K=3) + eval-mode BatchNorm1d folded; weight split along Cin per
    input piece, stored tap-major as (K, Cin_piece, Cout) bf16."""
    cin = sum(cin_splits)
    k1, k2, k3, k4, k5, k6 = jax.random.split(key, 6)
    w = 0.1 * jax.random.normal(k1, (cout, cin, K), jnp.float32)   # torch (out,in,K)
    b = 0.1 * jax.random.normal(k2, (cout,), jnp.float32)
    gamma = 1.0 + 0.1 * jax.random.normal(k3, (cout,), jnp.float32)
    beta = 0.1 * jax.random.normal(k4, (cout,), jnp.float32)
    mean = 0.1 * jax.random.normal(k5, (cout,), jnp.float32)
    var = jnp.abs(jax.random.normal(k6, (cout,), jnp.float32)) + 0.5
    g = gamma / jnp.sqrt(var + EPS)
    w_f = w * g[:, None, None]                     # fold BN scale into weights
    shift = ((b - mean) * g + beta).reshape(1, cout).astype(jnp.float32)
    pieces, off = [], 0
    for c in cin_splits:
        wk = jnp.transpose(w_f[:, off:off + c, :], (2, 1, 0))      # (K, c, cout)
        pieces.append(wk.astype(jnp.bfloat16))
        off += c
    return pieces, shift


def _init_block(key, cin_splits, cout):
    k1, k2 = jax.random.split(key, 2)
    w1_pieces, s1 = _init_conv_bn_folded(k1, cin_splits, cout)
    (w2,), s2 = _init_conv_bn_folded(k2, [cout], cout)
    return (w1_pieces, s1, w2, s2)


def _init_convtr(key, cin, cout):
    """ConvTranspose1d(cin, cout, kernel_size=2, stride=2): the two taps are
    pre-concatenated into ONE (cin, 2*cout) matrix so the fused epilogue is a
    single MXU matmul; the (B, L, 2*cout) output interleaves to length 2L via
    a free HBM reshape in the wrapper."""
    k1, k2 = jax.random.split(key, 2)
    w = 0.1 * jax.random.normal(k1, (cin, cout, 2), jnp.float32)   # torch (in,out,K)
    b = 0.1 * jax.random.normal(k2, (cout,), jnp.float32)
    wt = jnp.concatenate([w[:, :, 0], w[:, :, 1]], axis=1)         # [tap0 | tap1]
    bias2 = jnp.concatenate([b, b]).reshape(1, 2 * cout)
    return (wt.astype(jnp.bfloat16), bias2.astype(jnp.float32))


def _init_head(key, cin, cout):
    """Plain Conv1d(cin, cout, kernel_size=1)."""
    k1, k2 = jax.random.split(key, 2)
    w = 0.1 * jax.random.normal(k1, (cout, cin, 1), jnp.float32)
    b = 0.1 * jax.random.normal(k2, (cout,), jnp.float32)
    return (jnp.transpose(w[:, :, 0]).astype(jnp.bfloat16),
            b.reshape(1, cout).astype(jnp.float32))


def init_unet_params(key, in_ch=3, cond_ch=3, base=64):
    keys = jax.random.split(key, 8)
    return {
        "input_conv": _init_block(keys[0], [in_ch, cond_ch], base),
        "down1": _init_block(keys[1], [base], base * 2),
        "down2": _init_block(keys[2], [base * 2], base * 4),
        "up1_tr": _init_convtr(keys[3], base * 4, base * 2),
        "up1_block": _init_block(keys[4], [base * 2, base * 2], base * 2),
        "up2_tr": _init_convtr(keys[5], base * 2, base),
        "up2_block": _init_block(keys[6], [base, base], base),
        "output_conv": _init_head(keys[7], base, in_ch),
    }


# ----------------------------------------------------------------------------
# Full forward pass
# ----------------------------------------------------------------------------
def conditional_unet1d(params, noise_ncl, cond_ncl, *, bt=None):
    """noise_ncl, cond_ncl: (B, C, L) like PyTorch; returns (B, in_channels, L) f32."""
    B, _, L = noise_ncl.shape
    assert L % 4 == 0, "two MaxPool1d(2) stages require L % 4 == 0"
    p = params
    base = p["input_conv"][2].shape[-1]          # Cout of the input block
    if bt is None:
        bt = _choose_bt(B, L, base)

    # NCL -> NLC (channels on lanes); bf16 activations, f32 accumulation in-kernel.
    noise = jnp.transpose(noise_ncl, (0, 2, 1)).astype(jnp.bfloat16)
    cond = jnp.transpose(cond_ncl, (0, 2, 1)).astype(jnp.bfloat16)

    # input block; torch.cat([noise, condition], dim=1) fused via split weights
    x1 = unet_block([noise, cond], p["input_conv"], bt=bt)             # (B, L,   b)

    # down1: MaxPool(2) fused into the block's load (free HBM-level re-view)
    x1p = x1.reshape(B, L // 2, 2 * x1.shape[-1])
    x2 = unet_block([x1p], p["down1"], pool=True, bt=bt)               # (B, L/2, 2b)

    # down2 + fused ConvTranspose (up1's upsample): x3 never round-trips HBM
    x2p = x2.reshape(B, L // 4, 2 * x2.shape[-1])
    u1 = unet_block([x2p], p["down2"], pool=True,
                    ep_params=p["up1_tr"], bt=bt)                      # (B, L/4, 2*2b)
    u1 = u1.reshape(B, L // 2, u1.shape[-1] // 2)                      # tap interleave (free)

    # up1 block: skip concat fused via split weights; next upsample fused as epilogue
    y1 = unet_block([u1, x2], p["up1_block"],
                    ep_params=p["up2_tr"], bt=bt)                      # (B, L/2, 2*b)
    u2 = y1.reshape(B, L, y1.shape[-1] // 2)                           # (B, L,   b)

    # up2 block + fused 1x1 output head (tiny (B, L, in_ch) f32 write)
    out = unet_block([u2, x1], p["up2_block"], ep_params=p["output_conv"],
                     bt=bt, out_dtype=jnp.float32)                     # (B, L, in_ch)
    return jnp.transpose(out, (0, 2, 1))                               # -> (B, in_ch, L)


# ----------------------------------------------------------------------------
if __name__ == "__main__":
    key = jax.random.PRNGKey(0)
    k_noise, k_cond, k_params = jax.random.split(key, 3)

    B, IN_CH, COND_CH, L, BASE = 8, 3, 3, 64, 32   # small demo shapes; L % 4 == 0
    noise = jax.random.normal(k_noise, (B, IN_CH, L), jnp.float32)
    cond = jax.random.normal(k_cond, (B, COND_CH, L), jnp.float32)
    params = init_unet_params(k_params, IN_CH, COND_CH, BASE)

    fwd = jax.jit(conditional_unet1d, static_argnames=("bt",))
    out = fwd(params, noise, cond)     # bt=None -> auto (here bt=2: 4 grid steps)
    jax.block_until_ready(out)

    assert out.shape == (B, IN_CH, L), out.shape
    assert out.dtype == jnp.float32
    assert bool(jnp.all(jnp.isfinite(out)))
    print("KERNEL_OK")
</pallas_src>

<mosaic_0001>
module attributes {stable_mosaic.version = 11 : i64} {
  func.func @_block_kernel(%arg0: i32, %arg1: memref<2x64x3xbf16, #tpu.memory_space<vmem>>, %arg2: memref<2x64x3xbf16, #tpu.memory_space<vmem>>, %arg3: memref<3x3x32xbf16, #tpu.memory_space<vmem>>, %arg4: memref<3x3x32xbf16, #tpu.memory_space<vmem>>, %arg5: memref<1x32xf32, #tpu.memory_space<vmem>>, %arg6: memref<3x32x32xbf16, #tpu.memory_space<vmem>>, %arg7: memref<1x32xf32, #tpu.memory_space<vmem>>, %arg8: memref<2x64x32xbf16, #tpu.memory_space<vmem>>) attributes {dimension_semantics = [#tpu.dimension_semantics<parallel>], iteration_bounds = array<i64: 4>, scalar_prefetch = 0 : i64, scratch_operands = 0 : i64, tpu.core_type = #tpu.core_type<tc>, window_params = [{transform_indices = @transform_0, window_bounds = array<i64: 2, 64, 3>}, {transform_indices = @transform_1, window_bounds = array<i64: 2, 64, 3>}, {pipeline_mode = #tpu.pipeline_mode<synchronous>, transform_indices = @transform_2, window_bounds = array<i64: 3, 3, 32>}, {pipeline_mode = #tpu.pipeline_mode<synchronous>, transform_indices = @transform_3, window_bounds = array<i64: 3, 3, 32>}, {pipeline_mode = #tpu.pipeline_mode<synchronous>, transform_indices = @transform_4, window_bounds = array<i64: 1, 32>}, {pipeline_mode = #tpu.pipeline_mode<synchronous>, transform_indices = @transform_5, window_bounds = array<i64: 3, 32, 32>}, {pipeline_mode = #tpu.pipeline_mode<synchronous>, transform_indices = @transform_6, window_bounds = array<i64: 1, 32>}, {transform_indices = @transform_7, window_bounds = array<i64: 2, 64, 32>}]} {
    %c0 = arith.constant 0 : index
    %c0_0 = arith.constant 0 : index
    %c0_1 = arith.constant 0 : index
    %0 = vector.load %arg1[%c0, %c0_0, %c0_1] : memref<2x64x3xbf16, #tpu.memory_space<vmem>>, vector<2x64x3xbf16>
    %c0_2 = arith.constant 0 : index
    %c0_3 = arith.constant 0 : index
    %c0_4 = arith.constant 0 : index
    %1 = vector.load %arg2[%c0_2, %c0_3, %c0_4] : memref<2x64x3xbf16, #tpu.memory_space<vmem>>, vector<2x64x3xbf16>
    %cst = arith.constant 0.000000e+00 : bf16
    %2 = vector.broadcast %cst : bf16 to vector<2x1x3xbf16>
    %3 = vector.shape_cast %0 : vector<2x64x3xbf16> to vector<128x3xbf16>
    %c1 = arith.constant 1 : index
    %c0_5 = arith.constant 0 : index
    %c0_6 = arith.constant 0 : index
    %4 = vector.load %arg3[%c1, %c0_5, %c0_6] : memref<3x3x32xbf16, #tpu.memory_space<vmem>>, vector<1x3x32xbf16>
    %5 = vector.shape_cast %4 : vector<1x3x32xbf16> to vector<3x32xbf16>
    %cst_7 = arith.constant dense<0.000000e+00> : vector<128x32xf32>
    %6 = tpu.matmul %3, %5, %cst_7 {dimension_numbers = #tpu.dot_dimension_numbers<[1], [0], [0], [1], [0, 0, 1, 1], [], []>} : vector<128x3xbf16>, vector<3x32xbf16>, vector<128x32xf32> -> vector<128x32xf32>
    %7 = vector.extract_strided_slice %0 {offsets = [0, 0, 0], sizes = [2, 63, 3], strides = [1, 1, 1]} : vector<2x64x3xbf16> to vector<2x63x3xbf16>
    %8 = tpu.concatenate %2, %7 in 1 : vector<2x1x3xbf16>, vector<2x63x3xbf16> -> vector<2x64x3xbf16>
    %9 = vector.shape_cast %8 : vector<2x64x3xbf16> to vector<128x3xbf16>
    %c0_8 = arith.constant 0 : index
    %c0_9 = arith.constant 0 : index
    %c0_10 = arith.constant 0 : index
    %10 = vector.load %arg3[%c0_8, %c0_9, %c0_10] : memref<3x3x32xbf16, #tpu.memory_space<vmem>>, vector<1x3x32xbf16>
    %11 = vector.shape_cast %10 : vector<1x3x32xbf16> to vector<3x32xbf16>
    %cst_11 = arith.constant dense<0.000000e+00> : vector<128x32xf32>
    %12 = tpu.matmul %9, %11, %cst_11 {dimension_numbers = #tpu.dot_dimension_numbers<[1], [0], [0], [1], [0, 0, 1, 1], [], []>} : vector<128x3xbf16>, vector<3x32xbf16>, vector<128x32xf32> -> vector<128x32xf32>
    %13 = arith.addf %6, %12 : vector<128x32xf32>
    %14 = vector.extract_strided_slice %0 {offsets = [0, 1, 0], sizes = [2, 63, 3], strides = [1, 1, 1]} : vector<2x64x3xbf16> to vector<2x63x3xbf16>
    %15 = tpu.concatenate %14, %2 in 1 : vector<2x63x3xbf16>, vector<2x1x3xbf16> -> vector<2x64x3xbf16>
    %16 = vector.shape_cast %15 : vector<2x64x3xbf16> to vector<128x3xbf16>
    %c2 = arith.constant 2 : index
    %c0_12 = arith.constant 0 : index
    %c0_13 = arith.constant 0 : index
    %17 = vector.load %arg3[%c2, %c0_12, %c0_13] : memref<3x3x32xbf16, #tpu.memory_space<vmem>>, vector<1x3x32xbf16>
    %18 = vector.shape_cast %17 : vector<1x3x32xbf16> to vector<3x32xbf16>
    %cst_14 = arith.constant dense<0.000000e+00> : vector<128x32xf32>
    %19 = tpu.matmul %16, %18, %cst_14 {dimension_numbers = #tpu.dot_dimension_numbers<[1], [0], [0], [1], [0, 0, 1, 1], [], []>} : vector<128x3xbf16>, vector<3x32xbf16>, vector<128x32xf32> -> vector<128x32xf32>
    %20 = arith.addf %13, %19 : vector<128x32xf32>
    %cst_15 = arith.constant 0.000000e+00 : bf16
    %21 = vector.broadcast %cst_15 : bf16 to vector<2x1x3xbf16>
    %22 = vector.shape_cast %1 : vector<2x64x3xbf16> to vector<128x3xbf16>
    %c1_16 = arith.constant 1 : index
    %c0_17 = arith.constant 0 : index
    %c0_18 = arith.constant 0 : index
    %23 = vector.load %arg4[%c1_16, %c0_17, %c0_18] : memref<3x3x32xbf16, #tpu.memory_space<vmem>>, vector<1x3x32xbf16>
    %24 = vector.shape_cast %23 : vector<1x3x32xbf16> to vector<3x32xbf16>
    %cst_19 = arith.constant dense<0.000000e+00> : vector<128x32xf32>
    %25 = tpu.matmul %22, %24, %cst_19 {dimension_numbers = #tpu.dot_dimension_numbers<[1], [0], [0], [1], [0, 0, 1, 1], [], []>} : vector<128x3xbf16>, vector<3x32xbf16>, vector<128x32xf32> -> vector<128x32xf32>
    %26 = vector.extract_strided_slice %1 {offsets = [0, 0, 0], sizes = [2, 63, 3], strides = [1, 1, 1]} : vector<2x64x3xbf16> to vector<2x63x3xbf16>
    %27 = tpu.concatenate %21, %26 in 1 : vector<2x1x3xbf16>, vector<2x63x3xbf16> -> vector<2x64x3xbf16>
    %28 = vector.shape_cast %27 : vector<2x64x3xbf16> to vector<128x3xbf16>
    %c0_20 = arith.constant 0 : index
    %c0_21 = arith.constant 0 : index
    %c0_22 = arith.constant 0 : index
    %29 = vector.load %arg4[%c0_20, %c0_21, %c0_22] : memref<3x3x32xbf16, #tpu.memory_space<vmem>>, vector<1x3x32xbf16>
    %30 = vector.shape_cast %29 : vector<1x3x32xbf16> to vector<3x32xbf16>
    %cst_23 = arith.constant dense<0.000000e+00> : vector<128x32xf32>
    %31 = tpu.matmul %28, %30, %cst_23 {dimension_numbers = #tpu.dot_dimension_numbers<[1], [0], [0], [1], [0, 0, 1, 1], [], []>} : vector<128x3xbf16>, vector<3x32xbf16>, vector<128x32xf32> -> vector<128x32xf32>
    %32 = arith.addf %25, %31 : vector<128x32xf32>
    %33 = vector.extract_strided_slice %1 {offsets = [0, 1, 0], sizes = [2, 63, 3], strides = [1, 1, 1]} : vector<2x64x3xbf16> to vector<2x63x3xbf16>
    %34 = tpu.concatenate %33, %21 in 1 : vector<2x63x3xbf16>, vector<2x1x3xbf16> -> vector<2x64x3xbf16>
    %35 = vector.shape_cast %34 : vector<2x64x3xbf16> to vector<128x3xbf16>
    %c2_24 = arith.constant 2 : index
    %c0_25 = arith.constant 0 : index
    %c0_26 = arith.constant 0 : index
    %36 = vector.load %arg4[%c2_24, %c0_25, %c0_26] : memref<3x3x32xbf16, #tpu.memory_space<vmem>>, vector<1x3x32xbf16>
    %37 = vector.shape_cast %36 : vector<1x3x32xbf16> to vector<3x32xbf16>
    %cst_27 = arith.constant dense<0.000000e+00> : vector<128x32xf32>
    %38 = tpu.matmul %35, %37, %cst_27 {dimension_numbers = #tpu.dot_dimension_numbers<[1], [0], [0], [1], [0, 0, 1, 1], [], []>} : vector<128x3xbf16>, vector<3x32xbf16>, vector<128x32xf32> -> vector<128x32xf32>
    %39 = arith.addf %32, %38 : vector<128x32xf32>
    %40 = arith.addf %20, %39 : vector<128x32xf32>
    %c0_28 = arith.constant 0 : index
    %c0_29 = arith.constant 0 : index
    %41 = vector.load %arg5[%c0_28, %c0_29] : memref<1x32xf32, #tpu.memory_space<vmem>>, vector<1x32xf32>
    %42 = vector.broadcast %41 : vector<1x32xf32> to vector<128x32xf32>
    %43 = arith.addf %40, %42 : vector<128x32xf32>
    %cst_30 = arith.constant 0.000000e+00 : f32
    %44 = vector.broadcast %cst_30 : f32 to vector<128x32xf32>
    %45 = arith.maximumf %43, %44 : vector<128x32xf32>
    %46 = arith.truncf %45 : vector<128x32xf32> to vector<128x32xbf16>
    %47 = vector.shape_cast %46 : vector<128x32xbf16> to vector<2x64x32xbf16>
    %cst_31 = arith.constant 0.000000e+00 : bf16
    %48 = vector.broadcast %cst_31 : bf16 to vector<2x1x32xbf16>
    %49 = vector.shape_cast %47 : vector<2x64x32xbf16> to vector<128x32xbf16>
    %c1_32 = arith.constant 1 : index
    %c0_33 = arith.constant 0 : index
    %c0_34 = arith.constant 0 : index
    %50 = vector.load %arg6[%c1_32, %c0_33, %c0_34] : memref<3x32x32xbf16, #tpu.memory_space<vmem>>, vector<1x32x32xbf16>
    %51 = vector.shape_cast %50 : vector<1x32x32xbf16> to vector<32x32xbf16>
    %cst_35 = arith.constant dense<0.000000e+00> : vector<128x32xf32>
    %52 = tpu.matmul %49, %51, %cst_35 {dimension_numbers = #tpu.dot_dimension_numbers<[1], [0], [0], [1], [0, 0, 1, 1], [], []>} : vector<128x32xbf16>, vector<32x32xbf16>, vector<128x32xf32> -> vector<128x32xf32>
    %53 = vector.extract_strided_slice %47 {offsets = [0, 0, 0], sizes = [2, 63, 32], strides = [1, 1, 1]} : vector<2x64x32xbf16> to vector<2x63x32xbf16>
    %54 = tpu.concatenate %48, %53 in 1 : vector<2x1x32xbf16>, vector<2x63x32xbf16> -> vector<2x64x32xbf16>
    %55 = vector.shape_cast %54 : vector<2x64x32xbf16> to vector<128x32xbf16>
    %c0_36 = arith.constant 0 : index
    %c0_37 = arith.constant 0 : index
    %c0_38 = arith.constant 0 : index
    %56 = vector.load %arg6[%c0_36, %c0_37, %c0_38] : memref<3x32x32xbf16, #tpu.memory_space<vmem>>, vector<1x32x32xbf16>
    %57 = vector.shape_cast %56 : vector<1x32x32xbf16> to vector<32x32xbf16>
    %cst_39 = arith.constant dense<0.000000e+00> : vector<128x32xf32>
    %58 = tpu.matmul %55, %57, %cst_39 {dimension_numbers = #tpu.dot_dimension_numbers<[1], [0], [0], [1], [0, 0, 1, 1], [], []>} : vector<128x32xbf16>, vector<32x32xbf16>, vector<128x32xf32> -> vector<128x32xf32>
    %59 = arith.addf %52, %58 : vector<128x32xf32>
    %60 = vector.extract_strided_slice %47 {offsets = [0, 1, 0], sizes = [2, 63, 32], strides = [1, 1, 1]} : vector<2x64x32xbf16> to vector<2x63x32xbf16>
    %61 = tpu.concatenate %60, %48 in 1 : vector<2x63x32xbf16>, vector<2x1x32xbf16> -> vector<2x64x32xbf16>
    %62 = vector.shape_cast %61 : vector<2x64x32xbf16> to vector<128x32xbf16>
    %c2_40 = arith.constant 2 : index
    %c0_41 = arith.constant 0 : index
    %c0_42 = arith.constant 0 : index
    %63 = vector.load %arg6[%c2_40, %c0_41, %c0_42] : memref<3x32x32xbf16, #tpu.memory_space<vmem>>, vector<1x32x32xbf16>
    %64 = vector.shape_cast %63 : vector<1x32x32xbf16> to vector<32x32xbf16>
    %cst_43 = arith.constant dense<0.000000e+00> : vector<128x32xf32>
    %65 = tpu.matmul %62, %64, %cst_43 {dimension_numbers = #tpu.dot_dimension_numbers<[1], [0], [0], [1], [0, 0, 1, 1], [], []>} : vector<128x32xbf16>, vector<32x32xbf16>, vector<128x32xf32> -> vector<128x32xf32>
    %66 = arith.addf %59, %65 : vector<128x32xf32>
    %c0_44 = arith.constant 0 : index
    %c0_45 = arith.constant 0 : index
    %67 = vector.load %arg7[%c0_44, %c0_45] : memref<1x32xf32, #tpu.memory_space<vmem>>, vector<1x32xf32>
    %68 = vector.broadcast %67 : vector<1x32xf32> to vector<128x32xf32>
    %69 = arith.addf %66, %68 : vector<128x32xf32>
    %cst_46 = arith.constant 0.000000e+00 : f32
    %70 = vector.broadcast %cst_46 : f32 to vector<128x32xf32>
    %71 = arith.maximumf %69, %70 : vector<128x32xf32>
    %72 = arith.truncf %71 : vector<128x32xf32> to vector<128x32xbf16>
    %73 = vector.shape_cast %72 : vector<128x32xbf16> to vector<2x64x32xbf16>
    %c0_47 = arith.constant 0 : index
    %c0_48 = arith.constant 0 : index
    %c0_49 = arith.constant 0 : index
    %74 = vector.load %arg8[%c0_47, %c0_48, %c0_49] : memref<2x64x32xbf16, #tpu.memory_space<vmem>>, vector<2x64x32xbf16>
    tpu.vector_store %arg8[%c0_47, %c0_48, %c0_49], %73 {strides = array<i32>} : memref<2x64x32xbf16, #tpu.memory_space<vmem>>, vector<2x64x32xbf16>,
    return
  }
  func.func @transform_0(%arg0: i32) -> (i32, i32, i32) {
    %c0_i32 = arith.constant 0 : i32
    %c0_i32_0 = arith.constant 0 : i32
    %c0_i32_1 = arith.constant 0 : i32
    return %arg0, %c0_i32, %c0_i32_0 : i32, i32, i32
  }
  func.func @transform_1(%arg0: i32) -> (i32, i32, i32) {
    %c0_i32 = arith.constant 0 : i32
    %c0_i32_0 = arith.constant 0 : i32
    %c0_i32_1 = arith.constant 0 : i32
    return %arg0, %c0_i32, %c0_i32_0 : i32, i32, i32
  }
  func.func @transform_2(%arg0: i32) -> (i32, i32, i32) {
    %c0_i32 = arith.constant 0 : i32
    %c0_i32_0 = arith.constant 0 : i32
    %c0_i32_1 = arith.constant 0 : i32
    %c0_i32_2 = arith.constant 0 : i32
    return %c0_i32, %c0_i32_0, %c0_i32_1 : i32, i32, i32
  }
  func.func @transform_3(%arg0: i32) -> (i32, i32, i32) {
    %c0_i32 = arith.constant 0 : i32
    %c0_i32_0 = arith.constant 0 : i32
    %c0_i32_1 = arith.constant 0 : i32
    %c0_i32_2 = arith.constant 0 : i32
    return %c0_i32, %c0_i32_0, %c0_i32_1 : i32, i32, i32
  }
  func.func @transform_4(%arg0: i32) -> (i32, i32) {
    %c0_i32 = arith.constant 0 : i32
    %c0_i32_0 = arith.constant 0 : i32
    %c0_i32_1 = arith.constant 0 : i32
    return %c0_i32, %c0_i32_0 : i32, i32
  }
  func.func @transform_5(%arg0: i32) -> (i32, i32, i32) {
    %c0_i32 = arith.constant 0 : i32
    %c0_i32_0 = arith.constant 0 : i32
    %c0_i32_1 = arith.constant 0 : i32
    %c0_i32_2 = arith.constant 0 : i32
    return %c0_i32, %c0_i32_0, %c0_i32_1 : i32, i32, i32
  }
  func.func @transform_6(%arg0: i32) -> (i32, i32) {
    %c0_i32 = arith.constant 0 : i32
    %c0_i32_0 = arith.constant 0 : i32
    %c0_i32_1 = arith.constant 0 : i32
    return %c0_i32, %c0_i32_0 : i32, i32
  }
  func.func @transform_7(%arg0: i32) -> (i32, i32, i32) {
    %c0_i32 = arith.constant 0 : i32
    %c0_i32_0 = arith.constant 0 : i32
    %c0_i32_1 = arith.constant 0 : i32
    return %arg0, %c0_i32, %c0_i32_0 : i32, i32, i32
  }
}

module attributes {stable_mosaic.version = 11 : i64} {
  func.func @_block_kernel(%arg0: i32, %arg1: memref<2x32x64xbf16, #tpu.memory_space<vmem>>, %arg2: memref<3x32x64xbf16, #tpu.memory_space<vmem>>, %arg3: memref<1x64xf32, #tpu.memory_space<vmem>>, %arg4: memref<3x64x64xbf16, #tpu.memory_space<vmem>>, %arg5: memref<1x64xf32, #tpu.memory_space<vmem>>, %arg6: memref<2x32x64xbf16, #tpu.memory_space<vmem>>) attributes {dimension_semantics = [#tpu.dimension_semantics<parallel>], iteration_bounds = array<i64: 4>, scalar_prefetch = 0 : i64, scratch_operands = 0 : i64, tpu.core_type = #tpu.core_type<tc>, window_params = [{transform_indices = @transform_0, window_bounds = array<i64: 2, 32, 64>}, {pipeline_mode = #tpu.pipeline_mode<synchronous>, transform_indices = @transform_1, window_bounds = array<i64: 3, 32, 64>}, {pipeline_mode = #tpu.pipeline_mode<synchronous>, transform_indices = @transform_2, window_bounds = array<i64: 1, 64>}, {pipeline_mode = #tpu.pipeline_mode<synchronous>, transform_indices = @transform_3, window_bounds = array<i64: 3, 64, 64>}, {pipeline_mode = #tpu.pipeline_mode<synchronous>, transform_indices = @transform_4, window_bounds = array<i64: 1, 64>}, {transform_indices = @transform_5, window_bounds = array<i64: 2, 32, 64>}]} {
    %c0 = arith.constant 0 : index
    %c0_0 = arith.constant 0 : index
    %c0_1 = arith.constant 0 : index
    %0 = vector.load %arg1[%c0, %c0_0, %c0_1] : memref<2x32x64xbf16, #tpu.memory_space<vmem>>, vector<2x32x64xbf16>
    %1 = vector.extract_strided_slice %0 {offsets = [0, 0, 0], sizes = [2, 32, 32], strides = [1, 1, 1]} : vector<2x32x64xbf16> to vector<2x32x32xbf16>
    %2 = vector.extract_strided_slice %0 {offsets = [0, 0, 32], sizes = [2, 32, 32], strides = [1, 1, 1]} : vector<2x32x64xbf16> to vector<2x32x32xbf16>
    %3 = arith.maximumf %1, %2 : vector<2x32x32xbf16>
    %cst = arith.constant 0.000000e+00 : bf16
    %4 = vector.broadcast %cst : bf16 to vector<2x1x32xbf16>
    %5 = vector.shape_cast %3 : vector<2x32x32xbf16> to vector<64x32xbf16>
    %c1 = arith.constant 1 : index
    %c0_2 = arith.constant 0 : index
    %c0_3 = arith.constant 0 : index
    %6 = vector.load %arg2[%c1, %c0_2, %c0_3] : memref<3x32x64xbf16, #tpu.memory_space<vmem>>, vector<1x32x64xbf16>
    %7 = vector.shape_cast %6 : vector<1x32x64xbf16> to vector<32x64xbf16>
    %cst_4 = arith.constant dense<0.000000e+00> : vector<64x64xf32>
    %8 = tpu.matmul %5, %7, %cst_4 {dimension_numbers = #tpu.dot_dimension_numbers<[1], [0], [0], [1], [0, 0, 1, 1], [], []>} : vector<64x32xbf16>, vector<32x64xbf16>, vector<64x64xf32> -> vector<64x64xf32>
    %9 = vector.extract_strided_slice %3 {offsets = [0, 0, 0], sizes = [2, 31, 32], strides = [1, 1, 1]} : vector<2x32x32xbf16> to vector<2x31x32xbf16>
    %10 = tpu.concatenate %4, %9 in 1 : vector<2x1x32xbf16>, vector<2x31x32xbf16> -> vector<2x32x32xbf16>
    %11 = vector.shape_cast %10 : vector<2x32x32xbf16> to vector<64x32xbf16>
    %c0_5 = arith.constant 0 : index
    %c0_6 = arith.constant 0 : index
    %c0_7 = arith.constant 0 : index
    %12 = vector.load %arg2[%c0_5, %c0_6, %c0_7] : memref<3x32x64xbf16, #tpu.memory_space<vmem>>, vector<1x32x64xbf16>
    %13 = vector.shape_cast %12 : vector<1x32x64xbf16> to vector<32x64xbf16>
    %cst_8 = arith.constant dense<0.000000e+00> : vector<64x64xf32>
    %14 = tpu.matmul %11, %13, %cst_8 {dimension_numbers = #tpu.dot_dimension_numbers<[1], [0], [0], [1], [0, 0, 1, 1], [], []>} : vector<64x32xbf16>, vector<32x64xbf16>, vector<64x64xf32> -> vector<64x64xf32>
    %15 = arith.addf %8, %14 : vector<64x64xf32>
    %16 = vector.extract_strided_slice %3 {offsets = [0, 1, 0], sizes = [2, 31, 32], strides = [1, 1, 1]} : vector<2x32x32xbf16> to vector<2x31x32xbf16>
    %17 = tpu.concatenate %16, %4 in 1 : vector<2x31x32xbf16>, vector<2x1x32xbf16> -> vector<2x32x32xbf16>
    %18 = vector.shape_cast %17 : vector<2x32x32xbf16> to vector<64x32xbf16>
    %c2 = arith.constant 2 : index
    %c0_9 = arith.constant 0 : index
    %c0_10 = arith.constant 0 : index
    %19 = vector.load %arg2[%c2, %c0_9, %c0_10] : memref<3x32x64xbf16, #tpu.memory_space<vmem>>, vector<1x32x64xbf16>
    %20 = vector.shape_cast %19 : vector<1x32x64xbf16> to vector<32x64xbf16>
    %cst_11 = arith.constant dense<0.000000e+00> : vector<64x64xf32>
    %21 = tpu.matmul %18, %20, %cst_11 {dimension_numbers = #tpu.dot_dimension_numbers<[1], [0], [0], [1], [0, 0, 1, 1], [], []>} : vector<64x32xbf16>, vector<32x64xbf16>, vector<64x64xf32> -> vector<64x64xf32>
    %22 = arith.addf %15, %21 : vector<64x64xf32>
    %c0_12 = arith.constant 0 : index
    %c0_13 = arith.constant 0 : index
    %23 = vector.load %arg3[%c0_12, %c0_13] : memref<1x64xf32, #tpu.memory_space<vmem>>, vector<1x64xf32>
    %24 = vector.broadcast %23 : vector<1x64xf32> to vector<64x64xf32>
    %25 = arith.addf %22, %24 : vector<64x64xf32>
    %cst_14 = arith.constant 0.000000e+00 : f32
    %26 = vector.broadcast %cst_14 : f32 to vector<64x64xf32>
    %27 = arith.maximumf %25, %26 : vector<64x64xf32>
    %28 = arith.truncf %27 : vector<64x64xf32> to vector<64x64xbf16>
    %29 = vector.shape_cast %28 : vector<64x64xbf16> to vector<2x32x64xbf16>
    %cst_15 = arith.constant 0.000000e+00 : bf16
    %30 = vector.broadcast %cst_15 : bf16 to vector<2x1x64xbf16>
    %31 = vector.shape_cast %29 : vector<2x32x64xbf16> to vector<64x64xbf16>
    %c1_16 = arith.constant 1 : index
    %c0_17 = arith.constant 0 : index
    %c0_18 = arith.constant 0 : index
    %32 = vector.load %arg4[%c1_16, %c0_17, %c0_18] : memref<3x64x64xbf16, #tpu.memory_space<vmem>>, vector<1x64x64xbf16>
    %33 = vector.shape_cast %32 : vector<1x64x64xbf16> to vector<64x64xbf16>
    %cst_19 = arith.constant dense<0.000000e+00> : vector<64x64xf32>
    %34 = tpu.matmul %31, %33, %cst_19 {dimension_numbers = #tpu.dot_dimension_numbers<[1], [0], [0], [1], [0, 0, 1, 1], [], []>} : vector<64x64xbf16>, vector<64x64xbf16>, vector<64x64xf32> -> vector<64x64xf32>
    %35 = vector.extract_strided_slice %29 {offsets = [0, 0, 0], sizes = [2, 31, 64], strides = [1, 1, 1]} : vector<2x32x64xbf16> to vector<2x31x64xbf16>
    %36 = tpu.concatenate %30, %35 in 1 : vector<2x1x64xbf16>, vector<2x31x64xbf16> -> vector<2x32x64xbf16>
    %37 = vector.shape_cast %36 : vector<2x32x64xbf16> to vector<64x64xbf16>
    %c0_20 = arith.constant 0 : index
    %c0_21 = arith.constant 0 : index
    %c0_22 = arith.constant 0 : index
    %38 = vector.load %arg4[%c0_20, %c0_21, %c0_22] : memref<3x64x64xbf16, #tpu.memory_space<vmem>>, vector<1x64x64xbf16>
    %39 = vector.shape_cast %38 : vector<1x64x64xbf16> to vector<64x64xbf16>
    %cst_23 = arith.constant dense<0.000000e+00> : vector<64x64xf32>
    %40 = tpu.matmul %37, %39, %cst_23 {dimension_numbers = #tpu.dot_dimension_numbers<[1], [0], [0], [1], [0, 0, 1, 1], [], []>} : vector<64x64xbf16>, vector<64x64xbf16>, vector<64x64xf32> -> vector<64x64xf32>
    %41 = arith.addf %34, %40 : vector<64x64xf32>
    %42 = vector.extract_strided_slice %29 {offsets = [0, 1, 0], sizes = [2, 31, 64], strides = [1, 1, 1]} : vector<2x32x64xbf16> to vector<2x31x64xbf16>
    %43 = tpu.concatenate %42, %30 in 1 : vector<2x31x64xbf16>, vector<2x1x64xbf16> -> vector<2x32x64xbf16>
    %44 = vector.shape_cast %43 : vector<2x32x64xbf16> to vector<64x64xbf16>
    %c2_24 = arith.constant 2 : index
    %c0_25 = arith.constant 0 : index
    %c0_26 = arith.constant 0 : index
    %45 = vector.load %arg4[%c2_24, %c0_25, %c0_26] : memref<3x64x64xbf16, #tpu.memory_space<vmem>>, vector<1x64x64xbf16>
    %46 = vector.shape_cast %45 : vector<1x64x64xbf16> to vector<64x64xbf16>
    %cst_27 = arith.constant dense<0.000000e+00> : vector<64x64xf32>
    %47 = tpu.matmul %44, %46, %cst_27 {dimension_numbers = #tpu.dot_dimension_numbers<[1], [0], [0], [1], [0, 0, 1, 1], [], []>} : vector<64x64xbf16>, vector<64x64xbf16>, vector<64x64xf32> -> vector<64x64xf32>
    %48 = arith.addf %41, %47 : vector<64x64xf32>
    %c0_28 = arith.constant 0 : index
    %c0_29 = arith.constant 0 : index
    %49 = vector.load %arg5[%c0_28, %c0_29] : memref<1x64xf32, #tpu.memory_space<vmem>>, vector<1x64xf32>
    %50 = vector.broadcast %49 : vector<1x64xf32> to vector<64x64xf32>
    %51 = arith.addf %48, %50 : vector<64x64xf32>
    %cst_30 = arith.constant 0.000000e+00 : f32
    %52 = vector.broadcast %cst_30 : f32 to vector<64x64xf32>
    %53 = arith.maximumf %51, %52 : vector<64x64xf32>
    %54 = arith.truncf %53 : vector<64x64xf32> to vector<64x64xbf16>
    %55 = vector.shape_cast %54 : vector<64x64xbf16> to vector<2x32x64xbf16>
    %c0_31 = arith.constant 0 : index
    %c0_32 = arith.constant 0 : index
    %c0_33 = arith.constant 0 : index
    %56 = vector.load %arg6[%c0_31, %c0_32, %c0_33] : memref<2x32x64xbf16, #tpu.memory_space<vmem>>, vector<2x32x64xbf16>
    tpu.vector_store %arg6[%c0_31, %c0_32, %c0_33], %55 {strides = array<i32>} : memref<2x32x64xbf16, #tpu.memory_space<vmem>>, vector<2x32x64xbf16>,
    return
  }
  func.func @transform_0(%arg0: i32) -> (i32, i32, i32) {
    %c0_i32 = arith.constant 0 : i32
    %c0_i32_0 = arith.constant 0 : i32
    %c0_i32_1 = arith.constant 0 : i32
    return %arg0, %c0_i32, %c0_i32_0 : i32, i32, i32
  }
  func.func @transform_1(%arg0: i32) -> (i32, i32, i32) {
    %c0_i32 = arith.constant 0 : i32
    %c0_i32_0 = arith.constant 0 : i32
    %c0_i32_1 = arith.constant 0 : i32
    %c0_i32_2 = arith.constant 0 : i32
    return %c0_i32, %c0_i32_0, %c0_i32_1 : i32, i32, i32
  }
  func.func @transform_2(%arg0: i32) -> (i32, i32) {
    %c0_i32 = arith.constant 0 : i32
    %c0_i32_0 = arith.constant 0 : i32
    %c0_i32_1 = arith.constant 0 : i32
    return %c0_i32, %c0_i32_0 : i32, i32
  }
  func.func @transform_3(%arg0: i32) -> (i32, i32, i32) {
    %c0_i32 = arith.constant 0 : i32
    %c0_i32_0 = arith.constant 0 : i32
    %c0_i32_1 = arith.constant 0 : i32
    %c0_i32_2 = arith.constant 0 : i32
    return %c0_i32, %c0_i32_0, %c0_i32_1 : i32, i32, i32
  }
  func.func @transform_4(%arg0: i32) -> (i32, i32) {
    %c0_i32 = arith.constant 0 : i32
    %c0_i32_0 = arith.constant 0 : i32
    %c0_i32_1 = arith.constant 0 : i32
    return %c0_i32, %c0_i32_0 : i32, i32
  }
  func.func @transform_5(%arg0: i32) -> (i32, i32, i32) {
    %c0_i32 = arith.constant 0 : i32
    %c0_i32_0 = arith.constant 0 : i32
    %c0_i32_1 = arith.constant 0 : i32
    return %arg0, %c0_i32, %c0_i32_0 : i32, i32, i32
  }
}

module attributes {stable_mosaic.version = 11 : i64} {
  func.func @_block_kernel(%arg0: i32, %arg1: memref<2x16x128xbf16, #tpu.memory_space<vmem>>, %arg2: memref<3x64x128xbf16, #tpu.memory_space<vmem>>, %arg3: memref<1x128xf32, #tpu.memory_space<vmem>>, %arg4: memref<3x128x128xbf16, #tpu.memory_space<vmem>>, %arg5: memref<1x128xf32, #tpu.memory_space<vmem>>, %arg6: memref<128x128xbf16, #tpu.memory_space<vmem>>, %arg7: memref<1x128xf32, #tpu.memory_space<vmem>>, %arg8: memref<2x16x128xbf16, #tpu.memory_space<vmem>>) attributes {dimension_semantics = [#tpu.dimension_semantics<parallel>], iteration_bounds = array<i64: 4>, scalar_prefetch = 0 : i64, scratch_operands = 0 : i64, tpu.core_type = #tpu.core_type<tc>, window_params = [{transform_indices = @transform_0, window_bounds = array<i64: 2, 16, 128>}, {pipeline_mode = #tpu.pipeline_mode<synchronous>, transform_indices = @transform_1, window_bounds = array<i64: 3, 64, 128>}, {pipeline_mode = #tpu.pipeline_mode<synchronous>, transform_indices = @transform_2, window_bounds = array<i64: 1, 128>}, {pipeline_mode = #tpu.pipeline_mode<synchronous>, transform_indices = @transform_3, window_bounds = array<i64: 3, 128, 128>}, {pipeline_mode = #tpu.pipeline_mode<synchronous>, transform_indices = @transform_4, window_bounds = array<i64: 1, 128>}, {pipeline_mode = #tpu.pipeline_mode<synchronous>, transform_indices = @transform_5, window_bounds = array<i64: 128, 128>}, {pipeline_mode = #tpu.pipeline_mode<synchronous>, transform_indices = @transform_6, window_bounds = array<i64: 1, 128>}, {transform_indices = @transform_7, window_bounds = array<i64: 2, 16, 128>}]} {
    %c0 = arith.constant 0 : index
    %c0_0 = arith.constant 0 : index
    %c0_1 = arith.constant 0 : index
    %0 = vector.load %arg1[%c0, %c0_0, %c0_1] : memref<2x16x128xbf16, #tpu.memory_space<vmem>>, vector<2x16x128xbf16>
    %1 = vector.extract_strided_slice %0 {offsets = [0, 0, 0], sizes = [2, 16, 64], strides = [1, 1, 1]} : vector<2x16x128xbf16> to vector<2x16x64xbf16>
    %2 = vector.extract_strided_slice %0 {offsets = [0, 0, 64], sizes = [2, 16, 64], strides = [1, 1, 1]} : vector<2x16x128xbf16> to vector<2x16x64xbf16>
    %3 = arith.maximumf %1, %2 : vector<2x16x64xbf16>
    %cst = arith.constant 0.000000e+00 : bf16
    %4 = vector.broadcast %cst : bf16 to vector<2x1x64xbf16>
    %5 = vector.shape_cast %3 : vector<2x16x64xbf16> to vector<32x64xbf16>
    %c1 = arith.constant 1 : index
    %c0_2 = arith.constant 0 : index
    %c0_3 = arith.constant 0 : index
    %6 = vector.load %arg2[%c1, %c0_2, %c0_3] : memref<3x64x128xbf16, #tpu.memory_space<vmem>>, vector<1x64x128xbf16>
    %7 = vector.shape_cast %6 : vector<1x64x128xbf16> to vector<64x128xbf16>
    %cst_4 = arith.constant dense<0.000000e+00> : vector<32x128xf32>
    %8 = tpu.matmul %5, %7, %cst_4 {dimension_numbers = #tpu.dot_dimension_numbers<[1], [0], [0], [1], [0, 0, 1, 1], [], []>} : vector<32x64xbf16>, vector<64x128xbf16>, vector<32x128xf32> -> vector<32x128xf32>
    %9 = vector.extract_strided_slice %3 {offsets = [0, 0, 0], sizes = [2, 15, 64], strides = [1, 1, 1]} : vector<2x16x64xbf16> to vector<2x15x64xbf16>
    %10 = tpu.concatenate %4, %9 in 1 : vector<2x1x64xbf16>, vector<2x15x64xbf16> -> vector<2x16x64xbf16>
    %11 = vector.shape_cast %10 : vector<2x16x64xbf16> to vector<32x64xbf16>
    %c0_5 = arith.constant 0 : index
    %c0_6 = arith.constant 0 : index
    %c0_7 = arith.constant 0 : index
    %12 = vector.load %arg2[%c0_5, %c0_6, %c0_7] : memref<3x64x128xbf16, #tpu.memory_space<vmem>>, vector<1x64x128xbf16>
    %13 = vector.shape_cast %12 : vector<1x64x128xbf16> to vector<64x128xbf16>
    %cst_8 = arith.constant dense<0.000000e+00> : vector<32x128xf32>
    %14 = tpu.matmul %11, %13, %cst_8 {dimension_numbers = #tpu.dot_dimension_numbers<[1], [0], [0], [1], [0, 0, 1, 1], [], []>} : vector<32x64xbf16>, vector<64x128xbf16>, vector<32x128xf32> -> vector<32x128xf32>
    %15 = arith.addf %8, %14 : vector<32x128xf32>
    %16 = vector.extract_strided_slice %3 {offsets = [0, 1, 0], sizes = [2, 15, 64], strides = [1, 1, 1]} : vector<2x16x64xbf16> to vector<2x15x64xbf16>
    %17 = tpu.concatenate %16, %4 in 1 : vector<2x15x64xbf16>, vector<2x1x64xbf16> -> vector<2x16x64xbf16>
    %18 = vector.shape_cast %17 : vector<2x16x64xbf16> to vector<32x64xbf16>
    %c2 = arith.constant 2 : index
    %c0_9 = arith.constant 0 : index
    %c0_10 = arith.constant 0 : index
    %19 = vector.load %arg2[%c2, %c0_9, %c0_10] : memref<3x64x128xbf16, #tpu.memory_space<vmem>>, vector<1x64x128xbf16>
    %20 = vector.shape_cast %19 : vector<1x64x128xbf16> to vector<64x128xbf16>
    %cst_11 = arith.constant dense<0.000000e+00> : vector<32x128xf32>
    %21 = tpu.matmul %18, %20, %cst_11 {dimension_numbers = #tpu.dot_dimension_numbers<[1], [0], [0], [1], [0, 0, 1, 1], [], []>} : vector<32x64xbf16>, vector<64x128xbf16>, vector<32x128xf32> -> vector<32x128xf32>
    %22 = arith.addf %15, %21 : vector<32x128xf32>
    %c0_12 = arith.constant 0 : index
    %c0_13 = arith.constant 0 : index
    %23 = vector.load %arg3[%c0_12, %c0_13] : memref<1x128xf32, #tpu.memory_space<vmem>>, vector<1x128xf32>
    %24 = vector.broadcast %23 : vector<1x128xf32> to vector<32x128xf32>
    %25 = arith.addf %22, %24 : vector<32x128xf32>
    %cst_14 = arith.constant 0.000000e+00 : f32
    %26 = vector.broadcast %cst_14 : f32 to vector<32x128xf32>
    %27 = arith.maximumf %25, %26 : vector<32x128xf32>
    %28 = arith.truncf %27 : vector<32x128xf32> to vector<32x128xbf16>
    %29 = vector.shape_cast %28 : vector<32x128xbf16> to vector<2x16x128xbf16>
    %cst_15 = arith.constant 0.000000e+00 : bf16
    %30 = vector.broadcast %cst_15 : bf16 to vector<2x1x128xbf16>
    %31 = vector.shape_cast %29 : vector<2x16x128xbf16> to vector<32x128xbf16>
    %c1_16 = arith.constant 1 : index
    %c0_17 = arith.constant 0 : index
    %c0_18 = arith.constant 0 : index
    %32 = vector.load %arg4[%c1_16, %c0_17, %c0_18] : memref<3x128x128xbf16, #tpu.memory_space<vmem>>, vector<1x128x128xbf16>
    %33 = vector.shape_cast %32 : vector<1x128x128xbf16> to vector<128x128xbf16>
    %cst_19 = arith.constant dense<0.000000e+00> : vector<32x128xf32>
    %34 = tpu.matmul %31, %33, %cst_19 {dimension_numbers = #tpu.dot_dimension_numbers<[1], [0], [0], [1], [0, 0, 1, 1], [], []>} : vector<32x128xbf16>, vector<128x128xbf16>, vector<32x128xf32> -> vector<32x128xf32>
    %35 = vector.extract_strided_slice %29 {offsets = [0, 0, 0], sizes = [2, 15, 128], strides = [1, 1, 1]} : vector<2x16x128xbf16> to vector<2x15x128xbf16>
    %36 = tpu.concatenate %30, %35 in 1 : vector<2x1x128xbf16>, vector<2x15x128xbf16> -> vector<2x16x128xbf16>
    %37 = vector.shape_cast %36 : vector<2x16x128xbf16> to vector<32x128xbf16>
    %c0_20 = arith.constant 0 : index
    %c0_21 = arith.constant 0 : index
    %c0_22 = arith.constant 0 : index
    %38 = vector.load %arg4[%c0_20, %c0_21, %c0_22] : memref<3x128x128xbf16, #tpu.memory_space<vmem>>, vector<1x128x128xbf16>
    %39 = vector.shape_cast %38 : vector<1x128x128xbf16> to vector<128x128xbf16>
    %cst_23 = arith.constant dense<0.000000e+00> : vector<32x128xf32>
    %40 = tpu.matmul %37, %39, %cst_23 {dimension_numbers = #tpu.dot_dimension_numbers<[1], [0], [0], [1], [0, 0, 1, 1], [], []>} : vector<32x128xbf16>, vector<128x128xbf16>, vector<32x128xf32> -> vector<32x128xf32>
    %41 = arith.addf %34, %40 : vector<32x128xf32>
    %42 = vector.extract_strided_slice %29 {offsets = [0, 1, 0], sizes = [2, 15, 128], strides = [1, 1, 1]} : vector<2x16x128xbf16> to vector<2x15x128xbf16>
    %43 = tpu.concatenate %42, %30 in 1 : vector<2x15x128xbf16>, vector<2x1x128xbf16> -> vector<2x16x128xbf16>
    %44 = vector.shape_cast %43 : vector<2x16x128xbf16> to vector<32x128xbf16>
    %c2_24 = arith.constant 2 : index
    %c0_25 = arith.constant 0 : index
    %c0_26 = arith.constant 0 : index
    %45 = vector.load %arg4[%c2_24, %c0_25, %c0_26] : memref<3x128x128xbf16, #tpu.memory_space<vmem>>, vector<1x128x128xbf16>
    %46 = vector.shape_cast %45 : vector<1x128x128xbf16> to vector<128x128xbf16>
    %cst_27 = arith.constant dense<0.000000e+00> : vector<32x128xf32>
    %47 = tpu.matmul %44, %46, %cst_27 {dimension_numbers = #tpu.dot_dimension_numbers<[1], [0], [0], [1], [0, 0, 1, 1], [], []>} : vector<32x128xbf16>, vector<128x128xbf16>, vector<32x128xf32> -> vector<32x128xf32>
    %48 = arith.addf %41, %47 : vector<32x128xf32>
    %c0_28 = arith.constant 0 : index
    %c0_29 = arith.constant 0 : index
    %49 = vector.load %arg5[%c0_28, %c0_29] : memref<1x128xf32, #tpu.memory_space<vmem>>, vector<1x128xf32>
    %50 = vector.broadcast %49 : vector<1x128xf32> to vector<32x128xf32>
    %51 = arith.addf %48, %50 : vector<32x128xf32>
    %cst_30 = arith.constant 0.000000e+00 : f32
    %52 = vector.broadcast %cst_30 : f32 to vector<32x128xf32>
    %53 = arith.maximumf %51, %52 : vector<32x128xf32>
    %54 = arith.truncf %53 : vector<32x128xf32> to vector<32x128xbf16>
    %c0_31 = arith.constant 0 : index
    %c0_32 = arith.constant 0 : index
    %55 = vector.load %arg6[%c0_31, %c0_32] : memref<128x128xbf16, #tpu.memory_space<vmem>>, vector<128x128xbf16>
    %cst_33 = arith.constant dense<0.000000e+00> : vector<32x128xf32>
    %56 = tpu.matmul %54, %55, %cst_33 {dimension_numbers = #tpu.dot_dimension_numbers<[1], [0], [0], [1], [0, 0, 1, 1], [], []>} : vector<32x128xbf16>, vector<128x128xbf16>, vector<32x128xf32> -> vector<32x128xf32>
    %c0_34 = arith.constant 0 : index
    %c0_35 = arith.constant 0 : index
    %57 = vector.load %arg7[%c0_34, %c0_35] : memref<1x128xf32, #tpu.memory_space<vmem>>, vector<1x128xf32>
    %58 = vector.broadcast %57 : vector<1x128xf32> to vector<32x128xf32>
    %59 = arith.addf %56, %58 : vector<32x128xf32>
    %60 = arith.truncf %59 : vector<32x128xf32> to vector<32x128xbf16>
    %61 = vector.shape_cast %60 : vector<32x128xbf16> to vector<2x16x128xbf16>
    %c0_36 = arith.constant 0 : index
    %c0_37 = arith.constant 0 : index
    %c0_38 = arith.constant 0 : index
    %62 = vector.load %arg8[%c0_36, %c0_37, %c0_38] : memref<2x16x128xbf16, #tpu.memory_space<vmem>>, vector<2x16x128xbf16>
    tpu.vector_store %arg8[%c0_36, %c0_37, %c0_38], %61 {strides = array<i32>} : memref<2x16x128xbf16, #tpu.memory_space<vmem>>, vector<2x16x128xbf16>,
    return
  }
  func.func @transform_0(%arg0: i32) -> (i32, i32, i32) {
    %c0_i32 = arith.constant 0 : i32
    %c0_i32_0 = arith.constant 0 : i32
    %c0_i32_1 = arith.constant 0 : i32
    return %arg0, %c0_i32, %c0_i32_0 : i32, i32, i32
  }
  func.func @transform_1(%arg0: i32) -> (i32, i32, i32) {
    %c0_i32 = arith.constant 0 : i32
    %c0_i32_0 = arith.constant 0 : i32
    %c0_i32_1 = arith.constant 0 : i32
    %c0_i32_2 = arith.constant 0 : i32
    return %c0_i32, %c0_i32_0, %c0_i32_1 : i32, i32, i32
  }
  func.func @transform_2(%arg0: i32) -> (i32, i32) {
    %c0_i32 = arith.constant 0 : i32
    %c0_i32_0 = arith.constant 0 : i32
    %c0_i32_1 = arith.constant 0 : i32
    return %c0_i32, %c0_i32_0 : i32, i32
  }
  func.func @transform_3(%arg0: i32) -> (i32, i32, i32) {
    %c0_i32 = arith.constant 0 : i32
    %c0_i32_0 = arith.constant 0 : i32
    %c0_i32_1 = arith.constant 0 : i32
    %c0_i32_2 = arith.constant 0 : i32
    return %c0_i32, %c0_i32_0, %c0_i32_1 : i32, i32, i32
  }
  func.func @transform_4(%arg0: i32) -> (i32, i32) {
    %c0_i32 = arith.constant 0 : i32
    %c0_i32_0 = arith.constant 0 : i32
    %c0_i32_1 = arith.constant 0 : i32
    return %c0_i32, %c0_i32_0 : i32, i32
  }
  func.func @transform_5(%arg0: i32) -> (i32, i32) {
    %c0_i32 = arith.constant 0 : i32
    %c0_i32_0 = arith.constant 0 : i32
    %c0_i32_1 = arith.constant 0 : i32
    return %c0_i32, %c0_i32_0 : i32, i32
  }
  func.func @transform_6(%arg0: i32) -> (i32, i32) {
    %c0_i32 = arith.constant 0 : i32
    %c0_i32_0 = arith.constant 0 : i32
    %c0_i32_1 = arith.constant 0 : i32
    return %c0_i32, %c0_i32_0 : i32, i32
  }
  func.func @transform_7(%arg0: i32) -> (i32, i32, i32) {
    %c0_i32 = arith.constant 0 : i32
    %c0_i32_0 = arith.constant 0 : i32
    %c0_i32_1 = arith.constant 0 : i32
    return %arg0, %c0_i32, %c0_i32_0 : i32, i32, i32
  }
}

module attributes {stable_mosaic.version = 11 : i64} {
  func.func @_block_kernel(%arg0: i32, %arg1: memref<2x32x64xbf16, #tpu.memory_space<vmem>>, %arg2: memref<2x32x64xbf16, #tpu.memory_space<vmem>>, %arg3: memref<3x64x64xbf16, #tpu.memory_space<vmem>>, %arg4: memref<3x64x64xbf16, #tpu.memory_space<vmem>>, %arg5: memref<1x64xf32, #tpu.memory_space<vmem>>, %arg6: memref<3x64x64xbf16, #tpu.memory_space<vmem>>, %arg7: memref<1x64xf32, #tpu.memory_space<vmem>>, %arg8: memref<64x64xbf16, #tpu.memory_space<vmem>>, %arg9: memref<1x64xf32, #tpu.memory_space<vmem>>, %arg10: memref<2x32x64xbf16, #tpu.memory_space<vmem>>) attributes {dimension_semantics = [#tpu.dimension_semantics<parallel>], iteration_bounds = array<i64: 4>, scalar_prefetch = 0 : i64, scratch_operands = 0 : i64, tpu.core_type = #tpu.core_type<tc>, window_params = [{transform_indices = @transform_0, window_bounds = array<i64: 2, 32, 64>}, {transform_indices = @transform_1, window_bounds = array<i64: 2, 32, 64>}, {pipeline_mode = #tpu.pipeline_mode<synchronous>, transform_indices = @transform_2, window_bounds = array<i64: 3, 64, 64>}, {pipeline_mode = #tpu.pipeline_mode<synchronous>, transform_indices = @transform_3, window_bounds = array<i64: 3, 64, 64>}, {pipeline_mode = #tpu.pipeline_mode<synchronous>, transform_indices = @transform_4, window_bounds = array<i64: 1, 64>}, {pipeline_mode = #tpu.pipeline_mode<synchronous>, transform_indices = @transform_5, window_bounds = array<i64: 3, 64, 64>}, {pipeline_mode = #tpu.pipeline_mode<synchronous>, transform_indices = @transform_6, window_bounds = array<i64: 1, 64>}, {pipeline_mode = #tpu.pipeline_mode<synchronous>, transform_indices = @transform_7, window_bounds = array<i64: 64, 64>}, {pipeline_mode = #tpu.pipeline_mode<synchronous>, transform_indices = @transform_8, window_bounds = array<i64: 1, 64>}, {transform_indices = @transform_9, window_bounds = array<i64: 2, 32, 64>}]} {
    %c0 = arith.constant 0 : index
    %c0_0 = arith.constant 0 : index
    %c0_1 = arith.constant 0 : index
    %0 = vector.load %arg1[%c0, %c0_0, %c0_1] : memref<2x32x64xbf16, #tpu.memory_space<vmem>>, vector<2x32x64xbf16>
    %c0_2 = arith.constant 0 : index
    %c0_3 = arith.constant 0 : index
    %c0_4 = arith.constant 0 : index
    %1 = vector.load %arg2[%c0_2, %c0_3, %c0_4] : memref<2x32x64xbf16, #tpu.memory_space<vmem>>, vector<2x32x64xbf16>
    %cst = arith.constant 0.000000e+00 : bf16
    %2 = vector.broadcast %cst : bf16 to vector<2x1x64xbf16>
    %3 = vector.shape_cast %0 : vector<2x32x64xbf16> to vector<64x64xbf16>
    %c1 = arith.constant 1 : index
    %c0_5 = arith.constant 0 : index
    %c0_6 = arith.constant 0 : index
    %4 = vector.load %arg3[%c1, %c0_5, %c0_6] : memref<3x64x64xbf16, #tpu.memory_space<vmem>>, vector<1x64x64xbf16>
    %5 = vector.shape_cast %4 : vector<1x64x64xbf16> to vector<64x64xbf16>
    %cst_7 = arith.constant dense<0.000000e+00> : vector<64x64xf32>
    %6 = tpu.matmul %3, %5, %cst_7 {dimension_numbers = #tpu.dot_dimension_numbers<[1], [0], [0], [1], [0, 0, 1, 1], [], []>} : vector<64x64xbf16>, vector<64x64xbf16>, vector<64x64xf32> -> vector<64x64xf32>
    %7 = vector.extract_strided_slice %0 {offsets = [0, 0, 0], sizes = [2, 31, 64], strides = [1, 1, 1]} : vector<2x32x64xbf16> to vector<2x31x64xbf16>
    %8 = tpu.concatenate %2, %7 in 1 : vector<2x1x64xbf16>, vector<2x31x64xbf16> -> vector<2x32x64xbf16>
    %9 = vector.shape_cast %8 : vector<2x32x64xbf16> to vector<64x64xbf16>
    %c0_8 = arith.constant 0 : index
    %c0_9 = arith.constant 0 : index
    %c0_10 = arith.constant 0 : index
    %10 = vector.load %arg3[%c0_8, %c0_9, %c0_10] : memref<3x64x64xbf16, #tpu.memory_space<vmem>>, vector<1x64x64xbf16>
    %11 = vector.shape_cast %10 : vector<1x64x64xbf16> to vector<64x64xbf16>
    %cst_11 = arith.constant dense<0.000000e+00> : vector<64x64xf32>
    %12 = tpu.matmul %9, %11, %cst_11 {dimension_numbers = #tpu.dot_dimension_numbers<[1], [0], [0], [1], [0, 0, 1, 1], [], []>} : vector<64x64xbf16>, vector<64x64xbf16>, vector<64x64xf32> -> vector<64x64xf32>
    %13 = arith.addf %6, %12 : vector<64x64xf32>
    %14 = vector.extract_strided_slice %0 {offsets = [0, 1, 0], sizes = [2, 31, 64], strides = [1, 1, 1]} : vector<2x32x64xbf16> to vector<2x31x64xbf16>
    %15 = tpu.concatenate %14, %2 in 1 : vector<2x31x64xbf16>, vector<2x1x64xbf16> -> vector<2x32x64xbf16>
    %16 = vector.shape_cast %15 : vector<2x32x64xbf16> to vector<64x64xbf16>
    %c2 = arith.constant 2 : index
    %c0_12 = arith.constant 0 : index
    %c0_13 = arith.constant 0 : index
    %17 = vector.load %arg3[%c2, %c0_12, %c0_13] : memref<3x64x64xbf16, #tpu.memory_space<vmem>>, vector<1x64x64xbf16>
    %18 = vector.shape_cast %17 : vector<1x64x64xbf16> to vector<64x64xbf16>
    %cst_14 = arith.constant dense<0.000000e+00> : vector<64x64xf32>
    %19 = tpu.matmul %16, %18, %cst_14 {dimension_numbers = #tpu.dot_dimension_numbers<[1], [0], [0], [1], [0, 0, 1, 1], [], []>} : vector<64x64xbf16>, vector<64x64xbf16>, vector<64x64xf32> -> vector<64x64xf32>
    %20 = arith.addf %13, %19 : vector<64x64xf32>
    %cst_15 = arith.constant 0.000000e+00 : bf16
    %21 = vector.broadcast %cst_15 : bf16 to vector<2x1x64xbf16>
    %22 = vector.shape_cast %1 : vector<2x32x64xbf16> to vector<64x64xbf16>
    %c1_16 = arith.constant 1 : index
    %c0_17 = arith.constant 0 : index
    %c0_18 = arith.constant 0 : index
    %23 = vector.load %arg4[%c1_16, %c0_17, %c0_18] : memref<3x64x64xbf16, #tpu.memory_space<vmem>>, vector<1x64x64xbf16>
    %24 = vector.shape_cast %23 : vector<1x64x64xbf16> to vector<64x64xbf16>
    %cst_19 = arith.constant dense<0.000000e+00> : vector<64x64xf32>
    %25 = tpu.matmul %22, %24, %cst_19 {dimension_numbers = #tpu.dot_dimension_numbers<[1], [0], [0], [1], [0, 0, 1, 1], [], []>} : vector<64x64xbf16>, vector<64x64xbf16>, vector<64x64xf32> -> vector<64x64xf32>
    %26 = vector.extract_strided_slice %1 {offsets = [0, 0, 0], sizes = [2, 31, 64], strides = [1, 1, 1]} : vector<2x32x64xbf16> to vector<2x31x64xbf16>
    %27 = tpu.concatenate %21, %26 in 1 : vector<2x1x64xbf16>, vector<2x31x64xbf16> -> vector<2x32x64xbf16>
    %28 = vector.shape_cast %27 : vector<2x32x64xbf16> to vector<64x64xbf16>
    %c0_20 = arith.constant 0 : index
    %c0_21 = arith.constant 0 : index
    %c0_22 = arith.constant 0 : index
    %29 = vector.load %arg4[%c0_20, %c0_21, %c0_22] : memref<3x64x64xbf16, #tpu.memory_space<vmem>>, vector<1x64x64xbf16>
    %30 = vector.shape_cast %29 : vector<1x64x64xbf16> to vector<64x64xbf16>
    %cst_23 = arith.constant dense<0.000000e+00> : vector<64x64xf32>
    %31 = tpu.matmul %28, %30, %cst_23 {dimension_numbers = #tpu.dot_dimension_numbers<[1], [0], [0], [1], [0, 0, 1, 1], [], []>} : vector<64x64xbf16>, vector<64x64xbf16>, vector<64x64xf32> -> vector<64x64xf32>
    %32 = arith.addf %25, %31 : vector<64x64xf32>
    %33 = vector.extract_strided_slice %1 {offsets = [0, 1, 0], sizes = [2, 31, 64], strides = [1, 1, 1]} : vector<2x32x64xbf16> to vector<2x31x64xbf16>
    %34 = tpu.concatenate %33, %21 in 1 : vector<2x31x64xbf16>, vector<2x1x64xbf16> -> vector<2x32x64xbf16>
    %35 = vector.shape_cast %34 : vector<2x32x64xbf16> to vector<64x64xbf16>
    %c2_24 = arith.constant 2 : index
    %c0_25 = arith.constant 0 : index
    %c0_26 = arith.constant 0 : index
    %36 = vector.load %arg4[%c2_24, %c0_25, %c0_26] : memref<3x64x64xbf16, #tpu.memory_space<vmem>>, vector<1x64x64xbf16>
    %37 = vector.shape_cast %36 : vector<1x64x64xbf16> to vector<64x64xbf16>
    %cst_27 = arith.constant dense<0.000000e+00> : vector<64x64xf32>
    %38 = tpu.matmul %35, %37, %cst_27 {dimension_numbers = #tpu.dot_dimension_numbers<[1], [0], [0], [1], [0, 0, 1, 1], [], []>} : vector<64x64xbf16>, vector<64x64xbf16>, vector<64x64xf32> -> vector<64x64xf32>
    %39 = arith.addf %32, %38 : vector<64x64xf32>
    %40 = arith.addf %20, %39 : vector<64x64xf32>
    %c0_28 = arith.constant 0 : index
    %c0_29 = arith.constant 0 : index
    %41 = vector.load %arg5[%c0_28, %c0_29] : memref<1x64xf32, #tpu.memory_space<vmem>>, vector<1x64xf32>
    %42 = vector.broadcast %41 : vector<1x64xf32> to vector<64x64xf32>
    %43 = arith.addf %40, %42 : vector<64x64xf32>
    %cst_30 = arith.constant 0.000000e+00 : f32
    %44 = vector.broadcast %cst_30 : f32 to vector<64x64xf32>
    %45 = arith.maximumf %43, %44 : vector<64x64xf32>
    %46 = arith.truncf %45 : vector<64x64xf32> to vector<64x64xbf16>
    %47 = vector.shape_cast %46 : vector<64x64xbf16> to vector<2x32x64xbf16>
    %cst_31 = arith.constant 0.000000e+00 : bf16
    %48 = vector.broadcast %cst_31 : bf16 to vector<2x1x64xbf16>
    %49 = vector.shape_cast %47 : vector<2x32x64xbf16> to vector<64x64xbf16>
    %c1_32 = arith.constant 1 : index
    %c0_33 = arith.constant 0 : index
    %c0_34 = arith.constant 0 : index
    %50 = vector.load %arg6[%c1_32, %c0_33, %c0_34] : memref<3x64x64xbf16, #tpu.memory_space<vmem>>, vector<1x64x64xbf16>
    %51 = vector.shape_cast %50 : vector<1x64x64xbf16> to vector<64x64xbf16>
    %cst_35 = arith.constant dense<0.000000e+00> : vector<64x64xf32>
    %52 = tpu.matmul %49, %51, %cst_35 {dimension_numbers = #tpu.dot_dimension_numbers<[1], [0], [0], [1], [0, 0, 1, 1], [], []>} : vector<64x64xbf16>, vector<64x64xbf16>, vector<64x64xf32> -> vector<64x64xf32>
    %53 = vector.extract_strided_slice %47 {offsets = [0, 0, 0], sizes = [2, 31, 64], strides = [1, 1, 1]} : vector<2x32x64xbf16> to vector<2x31x64xbf16>
    %54 = tpu.concatenate %48, %53 in 1 : vector<2x1x64xbf16>, vector<2x31x64xbf16> -> vector<2x32x64xbf16>
    %55 = vector.shape_cast %54 : vector<2x32x64xbf16> to vector<64x64xbf16>
    %c0_36 = arith.constant 0 : index
    %c0_37 = arith.constant 0 : index
    %c0_38 = arith.constant 0 : index
    %56 = vector.load %arg6[%c0_36, %c0_37, %c0_38] : memref<3x64x64xbf16, #tpu.memory_space<vmem>>, vector<1x64x64xbf16>
    %57 = vector.shape_cast %56 : vector<1x64x64xbf16> to vector<64x64xbf16>
    %cst_39 = arith.constant dense<0.000000e+00> : vector<64x64xf32>
    %58 = tpu.matmul %55, %57, %cst_39 {dimension_numbers = #tpu.dot_dimension_numbers<[1], [0], [0], [1], [0, 0, 1, 1], [], []>} : vector<64x64xbf16>, vector<64x64xbf16>, vector<64x64xf32> -> vector<64x64xf32>
    %59 = arith.addf %52, %58 : vector<64x64xf32>
    %60 = vector.extract_strided_slice %47 {offsets = [0, 1, 0], sizes = [2, 31, 64], strides = [1, 1, 1]} : vector<2x32x64xbf16> to vector<2x31x64xbf16>
    %61 = tpu.concatenate %60, %48 in 1 : vector<2x31x64xbf16>, vector<2x1x64xbf16> -> vector<2x32x64xbf16>
    %62 = vector.shape_cast %61 : vector<2x32x64xbf16> to vector<64x64xbf16>
    %c2_40 = arith.constant 2 : index
    %c0_41 = arith.constant 0 : index
    %c0_42 = arith.constant 0 : index
    %63 = vector.load %arg6[%c2_40, %c0_41, %c0_42] : memref<3x64x64xbf16, #tpu.memory_space<vmem>>, vector<1x64x64xbf16>
    %64 = vector.shape_cast %63 : vector<1x64x64xbf16> to vector<64x64xbf16>
    %cst_43 = arith.constant dense<0.000000e+00> : vector<64x64xf32>
    %65 = tpu.matmul %62, %64, %cst_43 {dimension_numbers = #tpu.dot_dimension_numbers<[1], [0], [0], [1], [0, 0, 1, 1], [], []>} : vector<64x64xbf16>, vector<64x64xbf16>, vector<64x64xf32> -> vector<64x64xf32>
    %66 = arith.addf %59, %65 : vector<64x64xf32>
    %c0_44 = arith.constant 0 : index
    %c0_45 = arith.constant 0 : index
    %67 = vector.load %arg7[%c0_44, %c0_45] : memref<1x64xf32, #tpu.memory_space<vmem>>, vector<1x64xf32>
    %68 = vector.broadcast %67 : vector<1x64xf32> to vector<64x64xf32>
    %69 = arith.addf %66, %68 : vector<64x64xf32>
    %cst_46 = arith.constant 0.000000e+00 : f32
    %70 = vector.broadcast %cst_46 : f32 to vector<64x64xf32>
    %71 = arith.maximumf %69, %70 : vector<64x64xf32>
    %72 = arith.truncf %71 : vector<64x64xf32> to vector<64x64xbf16>
    %c0_47 = arith.constant 0 : index
    %c0_48 = arith.constant 0 : index
    %73 = vector.load %arg8[%c0_47, %c0_48] : memref<64x64xbf16, #tpu.memory_space<vmem>>, vector<64x64xbf16>
    %cst_49 = arith.constant dense<0.000000e+00> : vector<64x64xf32>
    %74 = tpu.matmul %72, %73, %cst_49 {dimension_numbers = #tpu.dot_dimension_numbers<[1], [0], [0], [1], [0, 0, 1, 1], [], []>} : vector<64x64xbf16>, vector<64x64xbf16>, vector<64x64xf32> -> vector<64x64xf32>
    %c0_50 = arith.constant 0 : index
    %c0_51 = arith.constant 0 : index
    %75 = vector.load %arg9[%c0_50, %c0_51] : memref<1x64xf32, #tpu.memory_space<vmem>>, vector<1x64xf32>
    %76 = vector.broadcast %75 : vector<1x64xf32> to vector<64x64xf32>
    %77 = arith.addf %74, %76 : vector<64x64xf32>
    %78 = arith.truncf %77 : vector<64x64xf32> to vector<64x64xbf16>
    %79 = vector.shape_cast %78 : vector<64x64xbf16> to vector<2x32x64xbf16>
    %c0_52 = arith.constant 0 : index
    %c0_53 = arith.constant 0 : index
    %c0_54 = arith.constant 0 : index
    %80 = vector.load %arg10[%c0_52, %c0_53, %c0_54] : memref<2x32x64xbf16, #tpu.memory_space<vmem>>, vector<2x32x64xbf16>
    tpu.vector_store %arg10[%c0_52, %c0_53, %c0_54], %79 {strides = array<i32>} : memref<2x32x64xbf16, #tpu.memory_space<vmem>>, vector<2x32x64xbf16>,
    return
  }
  func.func @transform_0(%arg0: i32) -> (i32, i32, i32) {
    %c0_i32 = arith.constant 0 : i32
    %c0_i32_0 = arith.constant 0 : i32
    %c0_i32_1 = arith.constant 0 : i32
    return %arg0, %c0_i32, %c0_i32_0 : i32, i32, i32
  }
  func.func @transform_1(%arg0: i32) -> (i32, i32, i32) {
    %c0_i32 = arith.constant 0 : i32
    %c0_i32_0 = arith.constant 0 : i32
    %c0_i32_1 = arith.constant 0 : i32
    return %arg0, %c0_i32, %c0_i32_0 : i32, i32, i32
  }
  func.func @transform_2(%arg0: i32) -> (i32, i32, i32) {
    %c0_i32 = arith.constant 0 : i32
    %c0_i32_0 = arith.constant 0 : i32
    %c0_i32_1 = arith.constant 0 : i32
    %c0_i32_2 = arith.constant 0 : i32
    return %c0_i32, %c0_i32_0, %c0_i32_1 : i32, i32, i32
  }
  func.func @transform_3(%arg0: i32) -> (i32, i32, i32) {
    %c0_i32 = arith.constant 0 : i32
    %c0_i32_0 = arith.constant 0 : i32
    %c0_i32_1 = arith.constant 0 : i32
    %c0_i32_2 = arith.constant 0 : i32
    return %c0_i32, %c0_i32_0, %c0_i32_1 : i32, i32, i32
  }
  func.func @transform_4(%arg0: i32) -> (i32, i32) {
    %c0_i32 = arith.constant 0 : i32
    %c0_i32_0 = arith.constant 0 : i32
    %c0_i32_1 = arith.constant 0 : i32
    return %c0_i32, %c0_i32_0 : i32, i32
  }
  func.func @transform_5(%arg0: i32) -> (i32, i32, i32) {
    %c0_i32 = arith.constant 0 : i32
    %c0_i32_0 = arith.constant 0 : i32
    %c0_i32_1 = arith.constant 0 : i32
    %c0_i32_2 = arith.constant 0 : i32
    return %c0_i32, %c0_i32_0, %c0_i32_1 : i32, i32, i32
  }
  func.func @transform_6(%arg0: i32) -> (i32, i32) {
    %c0_i32 = arith.constant 0 : i32
    %c0_i32_0 = arith.constant 0 : i32
    %c0_i32_1 = arith.constant 0 : i32
    return %c0_i32, %c0_i32_0 : i32, i32
  }
  func.func @transform_7(%arg0: i32) -> (i32, i32) {
    %c0_i32 = arith.constant 0 : i32
    %c0_i32_0 = arith.constant 0 : i32
    %c0_i32_1 = arith.constant 0 : i32
    return %c0_i32, %c0_i32_0 : i32, i32
  }
  func.func @transform_8(%arg0: i32) -> (i32, i32) {
    %c0_i32 = arith.constant 0 : i32
    %c0_i32_0 = arith.constant 0 : i32
    %c0_i32_1 = arith.constant 0 : i32
    return %c0_i32, %c0_i32_0 : i32, i32
  }
  func.func @transform_9(%arg0: i32) -> (i32, i32, i32) {
    %c0_i32 = arith.constant 0 : i32
    %c0_i32_0 = arith.constant 0 : i32
    %c0_i32_1 = arith.constant 0 : i32
    return %arg0, %c0_i32, %c0_i32_0 : i32, i32, i32
  }
}

module attributes {stable_mosaic.version = 11 : i64} {
  func.func @_block_kernel(%arg0: i32, %arg1: memref<2x64x32xbf16, #tpu.memory_space<vmem>>, %arg2: memref<2x64x32xbf16, #tpu.memory_space<vmem>>, %arg3: memref<3x32x32xbf16, #tpu.memory_space<vmem>>, %arg4: memref<3x32x32xbf16, #tpu.memory_space<vmem>>, %arg5: memref<1x32xf32, #tpu.memory_space<vmem>>, %arg6: memref<3x32x32xbf16, #tpu.memory_space<vmem>>, %arg7: memref<1x32xf32, #tpu.memory_space<vmem>>, %arg8: memref<32x3xbf16, #tpu.memory_space<vmem>>, %arg9: memref<1x3xf32, #tpu.memory_space<vmem>>, %arg10: memref<2x64x3xf32, #tpu.memory_space<vmem>>) attributes {dimension_semantics = [#tpu.dimension_semantics<parallel>], iteration_bounds = array<i64: 4>, scalar_prefetch = 0 : i64, scratch_operands = 0 : i64, tpu.core_type = #tpu.core_type<tc>, window_params = [{transform_indices = @transform_0, window_bounds = array<i64: 2, 64, 32>}, {transform_indices = @transform_1, window_bounds = array<i64: 2, 64, 32>}, {pipeline_mode = #tpu.pipeline_mode<synchronous>, transform_indices = @transform_2, window_bounds = array<i64: 3, 32, 32>}, {pipeline_mode = #tpu.pipeline_mode<synchronous>, transform_indices = @transform_3, window_bounds = array<i64: 3, 32, 32>}, {pipeline_mode = #tpu.pipeline_mode<synchronous>, transform_indices = @transform_4, window_bounds = array<i64: 1, 32>}, {pipeline_mode = #tpu.pipeline_mode<synchronous>, transform_indices = @transform_5, window_bounds = array<i64: 3, 32, 32>}, {pipeline_mode = #tpu.pipeline_mode<synchronous>, transform_indices = @transform_6, window_bounds = array<i64: 1, 32>}, {pipeline_mode = #tpu.pipeline_mode<synchronous>, transform_indices = @transform_7, window_bounds = array<i64: 32, 3>}, {pipeline_mode = #tpu.pipeline_mode<synchronous>, transform_indices = @transform_8, window_bounds = array<i64: 1, 3>}, {transform_indices = @transform_9, window_bounds = array<i64: 2, 64, 3>}]} {
    %c0 = arith.constant 0 : index
    %c0_0 = arith.constant 0 : index
    %c0_1 = arith.constant 0 : index
    %0 = vector.load %arg1[%c0, %c0_0, %c0_1] : memref<2x64x32xbf16, #tpu.memory_space<vmem>>, vector<2x64x32xbf16>
    %c0_2 = arith.constant 0 : index
    %c0_3 = arith.constant 0 : index
    %c0_4 = arith.constant 0 : index
    %1 = vector.load %arg2[%c0_2, %c0_3, %c0_4] : memref<2x64x32xbf16, #tpu.memory_space<vmem>>, vector<2x64x32xbf16>
    %cst = arith.constant 0.000000e+00 : bf16
    %2 = vector.broadcast %cst : bf16 to vector<2x1x32xbf16>
    %3 = vector.shape_cast %0 : vector<2x64x32xbf16> to vector<128x32xbf16>
    %c1 = arith.constant 1 : index
    %c0_5 = arith.constant 0 : index
    %c0_6 = arith.constant 0 : index
    %4 = vector.load %arg3[%c1, %c0_5, %c0_6] : memref<3x32x32xbf16, #tpu.memory_space<vmem>>, vector<1x32x32xbf16>
    %5 = vector.shape_cast %4 : vector<1x32x32xbf16> to vector<32x32xbf16>
    %cst_7 = arith.constant dense<0.000000e+00> : vector<128x32xf32>
    %6 = tpu.matmul %3, %5, %cst_7 {dimension_numbers = #tpu.dot_dimension_numbers<[1], [0], [0], [1], [0, 0, 1, 1], [], []>} : vector<128x32xbf16>, vector<32x32xbf16>, vector<128x32xf32> -> vector<128x32xf32>
    %7 = vector.extract_strided_slice %0 {offsets = [0, 0, 0], sizes = [2, 63, 32], strides = [1, 1, 1]} : vector<2x64x32xbf16> to vector<2x63x32xbf16>
    %8 = tpu.concatenate %2, %7 in 1 : vector<2x1x32xbf16>, vector<2x63x32xbf16> -> vector<2x64x32xbf16>
    %9 = vector.shape_cast %8 : vector<2x64x32xbf16> to vector<128x32xbf16>
    %c0_8 = arith.constant 0 : index
    %c0_9 = arith.constant 0 : index
    %c0_10 = arith.constant 0 : index
    %10 = vector.load %arg3[%c0_8, %c0_9, %c0_10] : memref<3x32x32xbf16, #tpu.memory_space<vmem>>, vector<1x32x32xbf16>
    %11 = vector.shape_cast %10 : vector<1x32x32xbf16> to vector<32x32xbf16>
    %cst_11 = arith.constant dense<0.000000e+00> : vector<128x32xf32>
    %12 = tpu.matmul %9, %11, %cst_11 {dimension_numbers = #tpu.dot_dimension_numbers<[1], [0], [0], [1], [0, 0, 1, 1], [], []>} : vector<128x32xbf16>, vector<32x32xbf16>, vector<128x32xf32> -> vector<128x32xf32>
    %13 = arith.addf %6, %12 : vector<128x32xf32>
    %14 = vector.extract_strided_slice %0 {offsets = [0, 1, 0], sizes = [2, 63, 32], strides = [1, 1, 1]} : vector<2x64x32xbf16> to vector<2x63x32xbf16>
    %15 = tpu.concatenate %14, %2 in 1 : vector<2x63x32xbf16>, vector<2x1x32xbf16> -> vector<2x64x32xbf16>
    %16 = vector.shape_cast %15 : vector<2x64x32xbf16> to vector<128x32xbf16>
    %c2 = arith.constant 2 : index
    %c0_12 = arith.constant 0 : index
    %c0_13 = arith.constant 0 : index
    %17 = vector.load %arg3[%c2, %c0_12, %c0_13] : memref<3x32x32xbf16, #tpu.memory_space<vmem>>, vector<1x32x32xbf16>
    %18 = vector.shape_cast %17 : vector<1x32x32xbf16> to vector<32x32xbf16>
    %cst_14 = arith.constant dense<0.000000e+00> : vector<128x32xf32>
    %19 = tpu.matmul %16, %18, %cst_14 {dimension_numbers = #tpu.dot_dimension_numbers<[1], [0], [0], [1], [0, 0, 1, 1], [], []>} : vector<128x32xbf16>, vector<32x32xbf16>, vector<128x32xf32> -> vector<128x32xf32>
    %20 = arith.addf %13, %19 : vector<128x32xf32>
    %cst_15 = arith.constant 0.000000e+00 : bf16
    %21 = vector.broadcast %cst_15 : bf16 to vector<2x1x32xbf16>
    %22 = vector.shape_cast %1 : vector<2x64x32xbf16> to vector<128x32xbf16>
    %c1_16 = arith.constant 1 : index
    %c0_17 = arith.constant 0 : index
    %c0_18 = arith.constant 0 : index
    %23 = vector.load %arg4[%c1_16, %c0_17, %c0_18] : memref<3x32x32xbf16, #tpu.memory_space<vmem>>, vector<1x32x32xbf16>
    %24 = vector.shape_cast %23 : vector<1x32x32xbf16> to vector<32x32xbf16>
    %cst_19 = arith.constant dense<0.000000e+00> : vector<128x32xf32>
    %25 = tpu.matmul %22, %24, %cst_19 {dimension_numbers = #tpu.dot_dimension_numbers<[1], [0], [0], [1], [0, 0, 1, 1], [], []>} : vector<128x32xbf16>, vector<32x32xbf16>, vector<128x32xf32> -> vector<128x32xf32>
    %26 = vector.extract_strided_slice %1 {offsets = [0, 0, 0], sizes = [2, 63, 32], strides = [1, 1, 1]} : vector<2x64x32xbf16> to vector<2x63x32xbf16>
    %27 = tpu.concatenate %21, %26 in 1 : vector<2x1x32xbf16>, vector<2x63x32xbf16> -> vector<2x64x32xbf16>
    %28 = vector.shape_cast %27 : vector<2x64x32xbf16> to vector<128x32xbf16>
    %c0_20 = arith.constant 0 : index
    %c0_21 = arith.constant 0 : index
    %c0_22 = arith.constant 0 : index
    %29 = vector.load %arg4[%c0_20, %c0_21, %c0_22] : memref<3x32x32xbf16, #tpu.memory_space<vmem>>, vector<1x32x32xbf16>
    %30 = vector.shape_cast %29 : vector<1x32x32xbf16> to vector<32x32xbf16>
    %cst_23 = arith.constant dense<0.000000e+00> : vector<128x32xf32>
    %31 = tpu.matmul %28, %30, %cst_23 {dimension_numbers = #tpu.dot_dimension_numbers<[1], [0], [0], [1], [0, 0, 1, 1], [], []>} : vector<128x32xbf16>, vector<32x32xbf16>, vector<128x32xf32> -> vector<128x32xf32>
    %32 = arith.addf %25, %31 : vector<128x32xf32>
    %33 = vector.extract_strided_slice %1 {offsets = [0, 1, 0], sizes = [2, 63, 32], strides = [1, 1, 1]} : vector<2x64x32xbf16> to vector<2x63x32xbf16>
    %34 = tpu.concatenate %33, %21 in 1 : vector<2x63x32xbf16>, vector<2x1x32xbf16> -> vector<2x64x32xbf16>
    %35 = vector.shape_cast %34 : vector<2x64x32xbf16> to vector<128x32xbf16>
    %c2_24 = arith.constant 2 : index
    %c0_25 = arith.constant 0 : index
    %c0_26 = arith.constant 0 : index
    %36 = vector.load %arg4[%c2_24, %c0_25, %c0_26] : memref<3x32x32xbf16, #tpu.memory_space<vmem>>, vector<1x32x32xbf16>
    %37 = vector.shape_cast %36 : vector<1x32x32xbf16> to vector<32x32xbf16>
    %cst_27 = arith.constant dense<0.000000e+00> : vector<128x32xf32>
    %38 = tpu.matmul %35, %37, %cst_27 {dimension_numbers = #tpu.dot_dimension_numbers<[1], [0], [0], [1], [0, 0, 1, 1], [], []>} : vector<128x32xbf16>, vector<32x32xbf16>, vector<128x32xf32> -> vector<128x32xf32>
    %39 = arith.addf %32, %38 : vector<128x32xf32>
    %40 = arith.addf %20, %39 : vector<128x32xf32>
    %c0_28 = arith.constant 0 : index
    %c0_29 = arith.constant 0 : index
    %41 = vector.load %arg5[%c0_28, %c0_29] : memref<1x32xf32, #tpu.memory_space<vmem>>, vector<1x32xf32>
    %42 = vector.broadcast %41 : vector<1x32xf32> to vector<128x32xf32>
    %43 = arith.addf %40, %42 : vector<128x32xf32>
    %cst_30 = arith.constant 0.000000e+00 : f32
    %44 = vector.broadcast %cst_30 : f32 to vector<128x32xf32>
    %45 = arith.maximumf %43, %44 : vector<128x32xf32>
    %46 = arith.truncf %45 : vector<128x32xf32> to vector<128x32xbf16>
    %47 = vector.shape_cast %46 : vector<128x32xbf16> to vector<2x64x32xbf16>
    %cst_31 = arith.constant 0.000000e+00 : bf16
    %48 = vector.broadcast %cst_31 : bf16 to vector<2x1x32xbf16>
    %49 = vector.shape_cast %47 : vector<2x64x32xbf16> to vector<128x32xbf16>
    %c1_32 = arith.constant 1 : index
    %c0_33 = arith.constant 0 : index
    %c0_34 = arith.constant 0 : index
    %50 = vector.load %arg6[%c1_32, %c0_33, %c0_34] : memref<3x32x32xbf16, #tpu.memory_space<vmem>>, vector<1x32x32xbf16>
    %51 = vector.shape_cast %50 : vector<1x32x32xbf16> to vector<32x32xbf16>
    %cst_35 = arith.constant dense<0.000000e+00> : vector<128x32xf32>
    %52 = tpu.matmul %49, %51, %cst_35 {dimension_numbers = #tpu.dot_dimension_numbers<[1], [0], [0], [1], [0, 0, 1, 1], [], []>} : vector<128x32xbf16>, vector<32x32xbf16>, vector<128x32xf32> -> vector<128x32xf32>
    %53 = vector.extract_strided_slice %47 {offsets = [0, 0, 0], sizes = [2, 63, 32], strides = [1, 1, 1]} : vector<2x64x32xbf16> to vector<2x63x32xbf16>
    %54 = tpu.concatenate %48, %53 in 1 : vector<2x1x32xbf16>, vector<2x63x32xbf16> -> vector<2x64x32xbf16>
    %55 = vector.shape_cast %54 : vector<2x64x32xbf16> to vector<128x32xbf16>
    %c0_36 = arith.constant 0 : index
    %c0_37 = arith.constant 0 : index
    %c0_38 = arith.constant 0 : index
    %56 = vector.load %arg6[%c0_36, %c0_37, %c0_38] : memref<3x32x32xbf16, #tpu.memory_space<vmem>>, vector<1x32x32xbf16>
    %57 = vector.shape_cast %56 : vector<1x32x32xbf16> to vector<32x32xbf16>
    %cst_39 = arith.constant dense<0.000000e+00> : vector<128x32xf32>
    %58 = tpu.matmul %55, %57, %cst_39 {dimension_numbers = #tpu.dot_dimension_numbers<[1], [0], [0], [1], [0, 0, 1, 1], [], []>} : vector<128x32xbf16>, vector<32x32xbf16>, vector<128x32xf32> -> vector<128x32xf32>
    %59 = arith.addf %52, %58 : vector<128x32xf32>
    %60 = vector.extract_strided_slice %47 {offsets = [0, 1, 0], sizes = [2, 63, 32], strides = [1, 1, 1]} : vector<2x64x32xbf16> to vector<2x63x32xbf16>
    %61 = tpu.concatenate %60, %48 in 1 : vector<2x63x32xbf16>, vector<2x1x32xbf16> -> vector<2x64x32xbf16>
    %62 = vector.shape_cast %61 : vector<2x64x32xbf16> to vector<128x32xbf16>
    %c2_40 = arith.constant 2 : index
    %c0_41 = arith.constant 0 : index
    %c0_42 = arith.constant 0 : index
    %63 = vector.load %arg6[%c2_40, %c0_41, %c0_42] : memref<3x32x32xbf16, #tpu.memory_space<vmem>>, vector<1x32x32xbf16>
    %64 = vector.shape_cast %63 : vector<1x32x32xbf16> to vector<32x32xbf16>
    %cst_43 = arith.constant dense<0.000000e+00> : vector<128x32xf32>
    %65 = tpu.matmul %62, %64, %cst_43 {dimension_numbers = #tpu.dot_dimension_numbers<[1], [0], [0], [1], [0, 0, 1, 1], [], []>} : vector<128x32xbf16>, vector<32x32xbf16>, vector<128x32xf32> -> vector<128x32xf32>
    %66 = arith.addf %59, %65 : vector<128x32xf32>
    %c0_44 = arith.constant 0 : index
    %c0_45 = arith.constant 0 : index
    %67 = vector.load %arg7[%c0_44, %c0_45] : memref<1x32xf32, #tpu.memory_space<vmem>>, vector<1x32xf32>
    %68 = vector.broadcast %67 : vector<1x32xf32> to vector<128x32xf32>
    %69 = arith.addf %66, %68 : vector<128x32xf32>
    %cst_46 = arith.constant 0.000000e+00 : f32
    %70 = vector.broadcast %cst_46 : f32 to vector<128x32xf32>
    %71 = arith.maximumf %69, %70 : vector<128x32xf32>
    %72 = arith.truncf %71 : vector<128x32xf32> to vector<128x32xbf16>
    %c0_47 = arith.constant 0 : index
    %c0_48 = arith.constant 0 : index
    %73 = vector.load %arg8[%c0_47, %c0_48] : memref<32x3xbf16, #tpu.memory_space<vmem>>, vector<32x3xbf16>
    %cst_49 = arith.constant dense<0.000000e+00> : vector<128x3xf32>
    %74 = tpu.matmul %72, %73, %cst_49 {dimension_numbers = #tpu.dot_dimension_numbers<[1], [0], [0], [1], [0, 0, 1, 1], [], []>} : vector<128x32xbf16>, vector<32x3xbf16>, vector<128x3xf32> -> vector<128x3xf32>
    %c0_50 = arith.constant 0 : index
    %c0_51 = arith.constant 0 : index
    %75 = vector.load %arg9[%c0_50, %c0_51] : memref<1x3xf32, #tpu.memory_space<vmem>>, vector<1x3xf32>
    %76 = vector.broadcast %75 : vector<1x3xf32> to vector<128x3xf32>
    %77 = arith.addf %74, %76 : vector<128x3xf32>
    %78 = vector.shape_cast %77 : vector<128x3xf32> to vector<2x64x3xf32>
    %c0_52 = arith.constant 0 : index
    %c0_53 = arith.constant 0 : index
    %c0_54 = arith.constant 0 : index
    %79 = vector.load %arg10[%c0_52, %c0_53, %c0_54] : memref<2x64x3xf32, #tpu.memory_space<vmem>>, vector<2x64x3xf32>
    tpu.vector_store %arg10[%c0_52, %c0_53, %c0_54], %78 {strides = array<i32>} : memref<2x64x3xf32, #tpu.memory_space<vmem>>, vector<2x64x3xf32>,
    return
  }
  func.func @transform_0(%arg0: i32) -> (i32, i32, i32) {
    %c0_i32 = arith.constant 0 : i32
    %c0_i32_0 = arith.constant 0 : i32
    %c0_i32_1 = arith.constant 0 : i32
    return %arg0, %c0_i32, %c0_i32_0 : i32, i32, i32
  }
  func.func @transform_1(%arg0: i32) -> (i32, i32, i32) {
    %c0_i32 = arith.constant 0 : i32
    %c0_i32_0 = arith.constant 0 : i32
    %c0_i32_1 = arith.constant 0 : i32
    return %arg0, %c0_i32, %c0_i32_0 : i32, i32, i32
  }
  func.func @transform_2(%arg0: i32) -> (i32, i32, i32) {
    %c0_i32 = arith.constant 0 : i32
    %c0_i32_0 = arith.constant 0 : i32
    %c0_i32_1 = arith.constant 0 : i32
    %c0_i32_2 = arith.constant 0 : i32
    return %c0_i32, %c0_i32_0, %c0_i32_1 : i32, i32, i32
  }
  func.func @transform_3(%arg0: i32) -> (i32, i32, i32) {
    %c0_i32 = arith.constant 0 : i32
    %c0_i32_0 = arith.constant 0 : i32
    %c0_i32_1 = arith.constant 0 : i32
    %c0_i32_2 = arith.constant 0 : i32
    return %c0_i32, %c0_i32_0, %c0_i32_1 : i32, i32, i32
  }
  func.func @transform_4(%arg0: i32) -> (i32, i32) {
    %c0_i32 = arith.constant 0 : i32
    %c0_i32_0 = arith.constant 0 : i32
    %c0_i32_1 = arith.constant 0 : i32
    return %c0_i32, %c0_i32_0 : i32, i32
  }
  func.func @transform_5(%arg0: i32) -> (i32, i32, i32) {
    %c0_i32 = arith.constant 0 : i32
    %c0_i32_0 = arith.constant 0 : i32
    %c0_i32_1 = arith.constant 0 : i32
    %c0_i32_2 = arith.constant 0 : i32
    return %c0_i32, %c0_i32_0, %c0_i32_1 : i32, i32, i32
  }
  func.func @transform_6(%arg0: i32) -> (i32, i32) {
    %c0_i32 = arith.constant 0 : i32
    %c0_i32_0 = arith.constant 0 : i32
    %c0_i32_1 = arith.constant 0 : i32
    return %c0_i32, %c0_i32_0 : i32, i32
  }
  func.func @transform_7(%arg0: i32) -> (i32, i32) {
    %c0_i32 = arith.constant 0 : i32
    %c0_i32_0 = arith.constant 0 : i32
    %c0_i32_1 = arith.constant 0 : i32
    return %c0_i32, %c0_i32_0 : i32, i32
  }
  func.func @transform_8(%arg0: i32) -> (i32, i32) {
    %c0_i32 = arith.constant 0 : i32
    %c0_i32_0 = arith.constant 0 : i32
    %c0_i32_1 = arith.constant 0 : i32
    return %c0_i32, %c0_i32_0 : i32, i32
  }
  func.func @transform_9(%arg0: i32) -> (i32, i32, i32) {
    %c0_i32 = arith.constant 0 : i32
    %c0_i32_0 = arith.constant 0 : i32
    %c0_i32_1 = arith.constant 0 : i32
    return %arg0, %c0_i32, %c0_i32_0 : i32, i32, i32
  }
}

</mosaic_0001>

<bundles_post_ra>
// kernel: conditional_unet1d.6
= control target key start
LH: loop header
LB: loop body
LE: loop exit
PB: predicated region body
PF: predicated region fallthrough
CT: control target
= control target key end

     0   :  { %s1468_s18 = smov 0   ;;  %s1637_s0 = inlined_call_operand.vmem [shape: bf16[8,32,64], index: 0, kind: input, shape index: {}]   ;;  %s1638_s1 = inlined_call_operand.vmem [shape: bf16[3,32,64], index: 1, kind: input, shape index: {}]   ;;  %s1639_s2 = inlined_call_operand.vmem [shape: f32[1,64], index: 2, kind: input, shape index: {}]   ;;  %s1640_s3 = inlined_call_operand.vmem [shape: bf16[3,64,64], index: 3, kind: input, shape index: {}]   ;;  %s1641_s4 = inlined_call_operand.vmem [shape: f32[1,64], index: 4, kind: input, shape index: {}]   ;;  %s1642_s5 = inlined_call_operand.vmem [shape: bf16[8,32,64], index: 5, kind: output, shape index: {}]  }
   0x1 LB: > { %s1173_s19 = sadd.s32 4294967295, %s1435_s18   ;;  %p1177_p0 = scmp.ge.s32.totalorder %s1435_s18, 1  ;;  %s1435_s18 = sphi %s1468_s18, %s15_s18  }
   0x2   : > { %p189_p1 = scmp.lt.s32.totalorder %s1435_s18, 5 }
   0x4   : > { %p190_p2 = pnand %p1177_p0, %p189_p1 }
   0x5   : > { %s1178_s20 = sshll.u32 (!%p190_p2), %s1173_s19, 1  ;;  %s1437_s8 = smov (!%p190_p2), 96  }
   0x6   : > { %193 = sbr.rel (%p190_p2) target bundleno = 609 (0x261), region = 40  ;;  %p220_p3 = scmp.lt.s32.totalorder (!%p190_p2), %s1178_s20, 7 }
   0xb   : > { %v1411_v0 = vld [vmem:[%s1638_s1 + $0x18] sm:$0xff]   ;;  %v1412_v1 = vld [vmem:[%s1638_s1 + $0x10] sm:$0xff]   ;;  %s1648_s20 = smov (!%p220_p3, %s1178_s20), 7  ;;  %v1413_v2 = vld [vmem:[%s1638_s1 + $0x8] sm:$0xff]   ;;  %vm360_vm0 = vcmask 261120   ;;  %vm340_vm2 = vcmask 1040384  }
   0xc   : > { %1330 = vmatprep.subr.bf16.mxu1 %v1411_v0  ;;  %s1266_s27 = sshll.u32 %s1648_s20, 4  ;;  %1318 = vmatprep.subr.bf16.mxu0 %v1413_v2  ;;  %v1414_v3 = vld [vmem:[%s1638_s1] sm:$0xff]   ;;  %v1415_v10 = vld [vmem:[%s1638_s1 + $0x28] sm:$0xff]   ;;  %vm307_vm1 = vsmask.f32 256  ;;  %vm536_vm5 = vcmask 1047552  }
   0xd   : > { %1331 = vmatpush3.bf16.msra.mxu1 %v1411_v0  ;;  %s224_s7 = scalar_lea.vmem %s1637_s0, %s1266_s27  ;;  %1319 = vmatpush3.bf16.msra.mxu0 %v1413_v2  ;;  %vm1503_vm3 = vmand %vm340_vm2, %vm307_vm1  ;;  %v1416_v47 = vld [vmem:[%s1638_s1 + $0x20] sm:$0xff]   ;;  %vm523_vm4 = vsmask.f32 7424  ;;  %vm744_vm7 = vcmask 523264   ;;  %s1616_s23 = scalar_lea.vmem %s1642_s5, %s1266_s27  ;;  %vm1106_vm8 = vcmask 519168  }
   0xe   : > { %1332 = vmatprep.subr.bf16.mxu1 %v1412_v1  ;;  %v236_v4 = vld [vmem:[%s224_s7 + $0x8] sm:$0xf]  ;;  %v234_v5 = vld [vmem:[%s224_s7] sm:$0xf]  ;;  %1320 = vmatprep.subr.bf16.mxu0 %v1414_v3  ;;  %v237_v6 = vld [vmem:[%s224_s7 + $0xc] sm:$0xf] }
   0xf   : > { %254 = vrot.lane.b32.xlu1 %v236_v4, %s1437_s8  ;;  %250 = vrot.lane.b32.xlu0 %v234_v5, %s1437_s8  ;;  %v235_v7 = vld [vmem:[%s224_s7 + $0x4] sm:$0xf]  ;;  %v239_v8 = vld [vmem:[%s224_s7 + $0x14] sm:$0xf]  ;;  %vm1524_vm6 = vmand %vm536_vm5, %vm523_vm4 }
  0x10   : > { %v238_v9 = vld [vmem:[%s224_s7 + $0x10] sm:$0xf]  ;;  %v241_v11 = vld [vmem:[%s224_s7 + $0x1c] sm:$0xf]  ;;  %v240_v12 = vld [vmem:[%s224_s7 + $0x18] sm:$0xf] }
  0x11   : > { %1333 = vmatpush3.bf16.msra.mxu1 %v1412_v1  ;;  %1321 = vmatpush3.bf16.msra.mxu0 %v1414_v3  ;;  %v1255_v61 = vld [vmem:[%s1641_s4] ss:$0 sm:$0xff] }
  0x12   : > { %1342 = vmatprep.subr.bf16.mxu0 %v1415_v10 }
  0x13   : > { %256 = vrot.lane.b32.xlu1 %v237_v6, %s1437_s8  ;;  %252 = vrot.lane.b32.xlu0 %v235_v7, %s1437_s8 }
  0x17   : > { %260 = vrot.lane.b32.xlu1 %v239_v8, %s1437_s8  ;;  %258 = vrot.lane.b32.xlu0 %v238_v9, %s1437_s8 }
  0x1b   : > { %264 = vrot.lane.b32.xlu1 %v241_v11, %s1437_s8  ;;  %262 = vrot.lane.b32.xlu0 %v240_v12, %s1437_s8 }
  0x81   : > { %v255_v13 = vpop.permute.xlu1 %254  ;;  %v251_v14 = vpop.permute.xlu0 %250 }
  0x82   : > { %v276_v17 = vmax.bf16 %v255_v13, %v236_v4  ;;  %v274_v18 = vmax.bf16 %v251_v14, %v234_v5  ;;  %v1417_v4 = vld [vmem:[%s1640_s3 + $0x38] sm:$0xff]   ;;  %v1418_v5 = vld [vmem:[%s1640_s3 + $0x30] sm:$0xff]  }
  0x85   : > { %v257_v15 = vpop.permute.xlu1 %256  ;;  %v253_v16 = vpop.permute.xlu0 %252 }
  0x86   : > { %v277_v19 = vmax.bf16 %v257_v15, %v237_v6  ;;  %v275_v20 = vmax.bf16 %v253_v16, %v235_v7  ;;  %v1419_v6 = vld [vmem:[%s1640_s3 + $0x18] sm:$0xff]   ;;  %v1420_v7 = vld [vmem:[%s1640_s3 + $0x28] sm:$0xff]  }
  0x87   : > { %1354 = vmatprep.subr.bf16.mxu1 %v1419_v6 }
  0x88   : > { %v1189_v21 = vcombine.low %v276_v17, %v277_v19  ;;  %v1188_v22 = vcombine.low %v274_v18, %v275_v20 }
  0x89   : > { %v261_v23 = vpop.permute.xlu1 %260  ;;  %v259_v24 = vpop.permute.xlu0 %258 }
  0x8a   : > { %v316_v25 = vshrl.u32 %v1189_v21, 16  ;;  %v279_v26 = vmax.bf16 %v261_v23, %v239_v8  ;;  %v278_v27 = vmax.bf16 %v259_v24, %v238_v9  ;;  %1334 = vmatprep.mubr.msk.bf16.mxu1 %vm360_vm0, %v1188_v22  ;;  %v309_v28 = vshrl.u32 %v1188_v22, 16  ;;  %v1421_v8 = vld [vmem:[%s1640_s3 + $0x10] sm:$0xff]   ;;  %v1422_v9 = vld [vmem:[%s1640_s3 + $0x20] sm:$0xff]  }
  0x8b   : > { %1335 = vmatmul.mubr.msk.bf16.vlgmr.msra.gmra.mxu1 %vm360_vm0, %v1189_v21  ;;  %v319_v31 = vshll.u32 %v1189_v21, 16  ;;  %v312_v35 = vshll.u32 %v1188_v22, 16 }
  0x8c   : > { %v318_v29 = vrot.slane %v316_v25, 7  ;;  %v1190_v30 = vcombine.low %v278_v27, %v279_v26  ;;  %v311_v34 = vrot.slane %v309_v28, 7  ;;  %1355 = vmatpush3.bf16.msra.mxu1 %v1419_v6 }
  0x8d   : > { %v265_v32 = vpop.permute.xlu1 %264  ;;  %v263_v33 = vpop.permute.xlu0 %262  ;;  %v524_v50 = vrot.slane %v312_v35, 1  ;;  %v526_v57 = vrot.slane %v319_v31, 1  ;;  %1356 = vmatprep.subr.bf16.mxu1 %v1421_v8 }
  0x8e   : > { %v324_v36 = vshrl.u32 %v1190_v30, 16  ;;  %v281_v37 = vmax.bf16 %v265_v32, %v241_v11  ;;  %v280_v38 = vmax.bf16 %v263_v33, %v240_v12  ;;  %1338 = vmatprep.mubr.msk.bf16.mxu1 %vm360_vm0, %v1190_v30  ;;  %v314_v40 = vor.u32 %v312_v35, %v311_v34  ;;  %v1424_v11 = vld [vmem:[%s1640_s3] sm:$0xff]   ;;  %v1563_v12 = vld [vmem:[%s1640_s3 + $0x58] sm:$0xff]  }
  0x8f   : > { %v321_v41 = vor.u32 %v319_v31, %v318_v29  ;;  %v327_v42 = vshll.u32 %v1190_v30, 16  ;;  %v525_v55 = vor.u32 %v524_v50, %v309_v28  ;;  %v528_v60 = vor.u32 %v526_v57, %v316_v25  ;;  %v1214_v30 = vld [vmem:[%s1639_s2] ss:$0 sm:$0xff] }
  0x90   : > { %v1191_v43 = vcombine.low %v280_v38, %v281_v37  ;;  %v326_v44 = vrot.slane %v324_v36, 7  ;;  %v342_v45 = vsel %vm1503_vm3, 0, %v314_v40  ;;  %1357 = vmatpush3.bf16.msra.mxu1 %v1421_v8 }
  0x91   : > { %v322_v46 = vsel %vm307_vm1, %v311_v34, %v321_v41  ;;  %1322 = vmatprep.mubr.msk.bf16.mxu0 %vm360_vm0, %v342_v45  ;;  %v527_v58 = vsel %vm523_vm4, %v525_v55, %v526_v57  ;;  %v529_v59 = vrot.slane %v327_v42, 1  ;;  %v538_v0 = vsel %vm1524_vm6, %v528_v60, 0 }
  0x92   : > { %v331_v48 = vshrl.u32 %v1191_v43, 16  ;;  %v329_v49 = vor.u32 %v327_v42, %v326_v44  ;;  %1323 = vmatmul.mubr.msk.bf16.vlgmr.msra.gmra.mxu0 %vm360_vm0, %v322_v46  ;;  %v334_v52 = vshll.u32 %v1191_v43, 16 }
  0x93   : > { %1339 = vmatmul.mubr.msk.bf16.gmra.mxu1 %vm360_vm0, %v1191_v43  ;;  %1343 = vmatpush3.bf16.msra.mxu0 %v1415_v10  ;;  %v530_v63 = vor.u32 %v529_v59, %v324_v36  ;;  %v1423_v10 = vld [vmem:[%s1640_s3 + $0x8] sm:$0xff]  }
  0x94   : > { %v333_v51 = vrot.slane %v331_v48, 7  ;;  %v343_v53 = vsel %vm1503_vm3, 0, %v329_v49  ;;  %1344 = vmatprep.subr.bf16.mxu0 %v1416_v47  ;;  %v531_v62 = vrot.slane %v334_v52, 1  ;;  %1358 = vmatprep.subr.bf16.mxu1 %v1423_v10 }
  0x95   : > { %1326 = vmatprep.mubr.msk.bf16.mxu0 %vm360_vm0, %v343_v53  ;;  %1359 = vmatpush3.bf16.msra.mxu1 %v1423_v10 }
  0x96   : > { %v336_v54 = vor.u32 %v334_v52, %v333_v51  ;;  %v532_v1 = vsel %vm523_vm4, %v530_v63, %v531_v62  ;;  %v533_v2 = vor.u32 %v531_v62, %v331_v48  ;;  %1360 = vmatprep.subr.bf16.mxu1 %v1424_v11 }
  0x97   : > { %1345 = vmatpush3.bf16.msra.mxu0 %v1416_v47 }
  0x98   : > { %v337_v56 = vsel %vm307_vm1, %v326_v44, %v336_v54  ;;  %v539_v3 = vsel %vm1524_vm6, %v533_v2, 0  ;;  %1370 = vmatprep.subr.bf16.mxu0 %v1417_v4 }
  0x99   : > { %1361 = vmatpush3.bf16.msra.mxu1 %v1424_v11 }
  0x9a   : > { %1327 = vmatmul.mubr.msk.bf16.gmra.mxu0 %vm360_vm0, %v337_v56  ;;  %1386 = vmatprep.subr.bf16.mxu1 %v1563_v12 }
  0x9b   : > { %1346 = vmatprep.mubr.msk.bf16.mxu0 %vm360_vm0, %v527_v58 }
  0xa2   : > { %1347 = vmatmul.mubr.msk.bf16.vlgmr.msra.gmra.mxu0 %vm360_vm0, %v538_v0 }
  0xa3   : > { %1350 = vmatprep.mubr.msk.bf16.mxu0 %vm360_vm0, %v532_v1  ;;  %1371 = vmatpush3.bf16.msra.mxu0 %v1417_v4 }
  0xa4   : > { %1372 = vmatprep.subr.bf16.mxu0 %v1418_v5 }
  0xa7   : > { %1373 = vmatpush3.bf16.msra.mxu0 %v1418_v5 }
  0xa8   : > { %1374 = vmatprep.subr.bf16.mxu0 %v1420_v7 }
  0xaa   : > { %1351 = vmatmul.mubr.msk.bf16.gmra.mxu0 %vm360_vm0, %v539_v3 }
  0xab   : > { %1375 = vmatpush3.bf16.msra.mxu0 %v1420_v7 }
  0xac   : > { %1376 = vmatprep.subr.bf16.mxu0 %v1422_v9 }
  0xaf   : > { %1377 = vmatpush3.bf16.msra.mxu0 %v1422_v9 }
 0x14b   : > { %v1336_v13 = vpop.f32.mrf.mxu1 }
 0x14d   : > { %v492_v16 = vpop.f32.mrf.mxu1 }
 0x14f   : > { %v1337_v19 = vpop.f32.mrf.mxu1 }
 0x151   : > { %v495_v22 = vpop.f32.mrf.mxu1 }
 0x152   : > { %v1324_v14 = vpop.f32.mrf.mxu0 }
 0x153   : > { %v501_v25 = vadd.f32 %v1336_v13, %v1324_v14  ;;  %v1340_v26 = vpop.f32.mrf.mxu1 }
 0x154   : > { %v407_v15 = vpop.f32.mrf.mxu0 }
 0x155   : > { %v493_v28 = vadd.f32 %v492_v16, %v407_v15  ;;  %v508_v34 = vpop.f32.mrf.mxu1 }
 0x156   : > { %v1325_v17 = vpop.f32.mrf.mxu0 }
 0x157   : > { %v504_v32 = vadd.f32 %v1337_v19, %v1325_v17  ;;  %v1341_v44 = vpop.f32.mrf.mxu1 }
 0x158   : > { %v410_v18 = vpop.f32.mrf.mxu0 }
 0x159   : > { %v496_v36 = vadd.f32 %v495_v22, %v410_v18  ;;  %v511_v57 = vpop.f32.mrf.mxu1  ;;  %v1426_v22 = vld [vmem:[%s1640_s3 + $0x50] sm:$0xff]  }
 0x15a   : > { %v1328_v20 = vpop.f32.mrf.mxu0 }
 0x15b   : > { %v517_v45 = vadd.f32 %v1340_v26, %v1328_v20 }
 0x15c   : > { %v423_v21 = vpop.f32.mrf.mxu0 }
 0x15d   : > { %v509_v47 = vadd.f32 %v508_v34, %v423_v21 }
 0x15e   : > { %v1329_v23 = vpop.f32.mrf.mxu0 }
 0x15f   : > { %v520_v58 = vadd.f32 %v1341_v44, %v1329_v23 }
 0x160   : > { %v426_v24 = vpop.f32.mrf.mxu0 }
 0x161   : > { %v512_v60 = vadd.f32 %v511_v57, %v426_v24 }
 0x162   : > { %v1348_v27 = vpop.f32.mrf.mxu0 }
 0x163   : > { %v636_v29 = vadd.f32 %v1348_v27, %v501_v25 }
 0x164   : > { %v603_v31 = vpop.f32.mrf.mxu0 }
 0x165   : > { %v634_v33 = vadd.f32 %v603_v31, %v493_v28  ;;  %v651_v37 = vadd.f32 %v1214_v30, %v636_v29  ;;  %v1427_v31 = vld [vmem:[%s1640_s3 + $0x48] sm:$0xff]  }
 0x166   : > { %v1349_v35 = vpop.f32.mrf.mxu0 }
 0x167   : > { %v637_v38 = vadd.f32 %v1349_v35, %v504_v32  ;;  %v649_v41 = vadd.f32 %v1214_v30, %v634_v33  ;;  %v659_v48 = vmax.f32 %v651_v37, 0.0 }
 0x168   : > { %v606_v40 = vpop.f32.mrf.mxu0 }
 0x169   : > { %v652_v42 = vadd.f32 %v1214_v30, %v637_v38  ;;  %v635_v43 = vadd.f32 %v606_v40, %v496_v36  ;;  %v657_v53 = vmax.f32 %v649_v41, 0.0 }
 0x16a   : > { %v1352_v46 = vpop.f32.mrf.mxu0 }
 0x16b   : > { %v660_v49 = vmax.f32 %v652_v42, 0.0  ;;  %v650_v50 = vadd.f32 %v1214_v30, %v635_v43  ;;  %v640_v51 = vadd.f32 %v1352_v46, %v517_v45 }
 0x16c   : > { %v619_v52 = vpop.f32.mrf.mxu0 }
 0x16d   : > { %v1569_v54 = vpack.c.bf16 %v660_v49, %v659_v48  ;;  %v658_v55 = vmax.f32 %v650_v50, 0.0  ;;  %v638_v56 = vadd.f32 %v619_v52, %v509_v47  ;;  %v655_v0 = vadd.f32 %v1214_v30, %v640_v51 }
 0x16e   : > { %v1353_v59 = vpop.f32.mrf.mxu0 }
 0x16f   : > { %v686_v62 = vshrl.u32 %v1569_v54, 16  ;;  %v665_v63 = vpack.c.bf16 %v658_v55, %v657_v53  ;;  %v641_v1 = vadd.f32 %v1353_v59, %v520_v58  ;;  %v653_v4 = vadd.f32 %v1214_v30, %v638_v56 }
 0x170   : > { %v622_v2 = vpop.f32.mrf.mxu0  ;;  %v689_v7 = vshll.u32 %v1569_v54, 16  ;;  %v663_v14 = vmax.f32 %v655_v0, 0.0 }
 0x171   : > { %v688_v3 = vrot.slane %v686_v62, 7  ;;  %v639_v5 = vadd.f32 %v622_v2, %v512_v60  ;;  %1378 = vmatprep.mubr.msk.bf16.mxu0 %vm744_vm7, %v665_v63  ;;  %v679_v6 = vshrl.u32 %v665_v63, 16  ;;  %v656_v8 = vadd.f32 %v1214_v30, %v641_v1 }
 0x172   : > { %1379 = vmatmul.mubr.msk.bf16.vlgmr.msra.gmra.mxu0 %vm744_vm7, %v1569_v54  ;;  %v682_v11 = vshll.u32 %v665_v63, 16  ;;  %v661_v16 = vmax.f32 %v653_v4, 0.0  ;;  %v921_v36 = vrot.slane %v689_v7, 1 }
 0x173   : > { %v654_v9 = vadd.f32 %v1214_v30, %v639_v5  ;;  %v681_v10 = vrot.slane %v679_v6, 7  ;;  %v691_v13 = vor.u32 %v689_v7, %v688_v3  ;;  %v664_v15 = vmax.f32 %v656_v8, 0.0 }
 0x174   : > { %v919_v25 = vrot.slane %v682_v11, 1  ;;  %v923_v39 = vor.u32 %v921_v36, %v686_v62 }
 0x175   : > { %v662_v17 = vmax.f32 %v654_v9, 0.0  ;;  %v684_v18 = vor.u32 %v682_v11, %v681_v10  ;;  %v668_v19 = vpack.c.bf16 %v664_v15, %v663_v14  ;;  %v692_v24 = vsel %vm307_vm1, %v681_v10, %v691_v13 }
 0x176   : > { %v920_v34 = vor.u32 %v919_v25, %v679_v6  ;;  %v931_v43 = vsel %vm1524_vm6, %v923_v39, 0 }
 0x177   : > { %v667_v20 = vpack.c.bf16 %v662_v17, %v661_v16  ;;  %v710_v21 = vsel %vm1503_vm3, 0, %v684_v18  ;;  %v701_v23 = vshrl.u32 %v668_v19, 16  ;;  %v704_v27 = vshll.u32 %v668_v19, 16 }
 0x178   : > { %1362 = vmatprep.mubr.msk.bf16.mxu1 %vm744_vm7, %v710_v21  ;;  %v922_v40 = vsel %vm523_vm4, %v920_v34, %v921_v36 }
 0x179   : > { %1363 = vmatmul.mubr.msk.bf16.vlgmr.msra.gmra.mxu1 %vm744_vm7, %v692_v24  ;;  %1382 = vmatprep.mubr.msk.bf16.mxu0 %vm744_vm7, %v667_v20  ;;  %v694_v26 = vshrl.u32 %v667_v20, 16  ;;  %v703_v28 = vrot.slane %v701_v23, 7  ;;  %v697_v30 = vshll.u32 %v667_v20, 16  ;;  %v926_v42 = vrot.slane %v704_v27, 1 }
 0x17a   : > { %1387 = vmatpush3.bf16.msra.mxu1 %v1563_v12  ;;  %1383 = vmatmul.mubr.msk.bf16.gmra.mxu0 %vm744_vm7, %v668_v19  ;;  %v1428_v12 = vld [vmem:[%s1640_s3 + $0x40] sm:$0xff]  }
 0x17b   : > { %1388 = vmatprep.subr.bf16.mxu1 %v1426_v22  ;;  %v696_v29 = vrot.slane %v694_v26, 7  ;;  %v706_v32 = vor.u32 %v704_v27, %v703_v28  ;;  %v924_v38 = vrot.slane %v697_v30, 1  ;;  %v928_v45 = vor.u32 %v926_v42, %v701_v23 }
 0x17d   : > { %v699_v33 = vor.u32 %v697_v30, %v696_v29  ;;  %v707_v37 = vsel %vm307_vm1, %v696_v29, %v706_v32  ;;  %v925_v41 = vor.u32 %v924_v38, %v694_v26  ;;  %v932_v46 = vsel %vm1524_vm6, %v928_v45, 0 }
 0x17e   : > { %1389 = vmatpush3.bf16.msra.mxu1 %v1426_v22 }
 0x17f   : > { %v711_v35 = vsel %vm1503_vm3, 0, %v699_v33  ;;  %1390 = vmatprep.subr.bf16.mxu1 %v1427_v31  ;;  %v927_v44 = vsel %vm523_vm4, %v925_v41, %v926_v42 }
 0x180   : > { %1366 = vmatprep.mubr.msk.bf16.mxu1 %vm744_vm7, %v711_v35 }
 0x181   : > { %1367 = vmatmul.mubr.msk.bf16.gmra.mxu1 %vm744_vm7, %v707_v37 }
 0x182   : > { %1391 = vmatpush3.bf16.msra.mxu1 %v1427_v31  ;;  %1394 = vmatprep.mubr.msk.bf16.mxu1 %vm744_vm7, %v922_v40 }
 0x183   : > { %1392 = vmatprep.subr.bf16.mxu1 %v1428_v12 }
 0x186   : > { %1393 = vmatpush3.bf16.msra.mxu1 %v1428_v12 }
 0x189   : > { %1395 = vmatmul.mubr.msk.bf16.vlgmr.msra.gmra.mxu1 %vm744_vm7, %v931_v43 }
 0x18a   : > { %1398 = vmatprep.mubr.msk.bf16.mxu1 %vm744_vm7, %v927_v44 }
 0x191   : > { %1399 = vmatmul.mubr.msk.bf16.gmra.mxu1 %vm744_vm7, %v932_v46 }
 0x232   : > { %v1380_v47 = vpop.f32.mrf.mxu0 }
 0x234   : > { %v888_v50 = vpop.f32.mrf.mxu0 }
 0x236   : > { %v1381_v53 = vpop.f32.mrf.mxu0 }
 0x238   : > { %v891_v56 = vpop.f32.mrf.mxu0 }
 0x239   : > { %v1364_v48 = vpop.f32.mrf.mxu1 }
 0x23a   : > { %v897_v59 = vadd.f32 %v1380_v47, %v1364_v48  ;;  %v1384_v60 = vpop.f32.mrf.mxu0 }
 0x23b   : > { %v791_v49 = vpop.f32.mrf.mxu1 }
 0x23c   : > { %v889_v63 = vadd.f32 %v888_v50, %v791_v49  ;;  %v904_v2 = vpop.f32.mrf.mxu0 }
 0x23d   : > { %v1365_v51 = vpop.f32.mrf.mxu1 }
 0x23e   : > { %v900_v3 = vadd.f32 %v1381_v53, %v1365_v51  ;;  %v1385_v14 = vpop.f32.mrf.mxu0 }
 0x23f   : > { %v794_v52 = vpop.f32.mrf.mxu1 }
 0x240   : > { %v892_v7 = vadd.f32 %v891_v56, %v794_v52  ;;  %v907_v27 = vpop.f32.mrf.mxu0 }
 0x241   : > { %v1368_v54 = vpop.f32.mrf.mxu1 }
 0x242   : > { %v913_v11 = vadd.f32 %v1384_v60, %v1368_v54 }
 0x243   : > { %v807_v55 = vpop.f32.mrf.mxu1 }
 0x244   : > { %v905_v19 = vadd.f32 %v904_v2, %v807_v55 }
 0x245   : > { %v1369_v57 = vpop.f32.mrf.mxu1 }
 0x246   : > { %v916_v25 = vadd.f32 %v1385_v14, %v1369_v57 }
 0x247   : > { %v810_v58 = vpop.f32.mrf.mxu1 }
 0x248   : > { %v908_v32 = vadd.f32 %v907_v27, %v810_v58 }
 0x249   : > { %v1396_v62 = vpop.f32.mrf.mxu1 }
 0x24a   : > { %v1045_v0 = vadd.f32 %v1396_v62, %v897_v59 }
 0x24b   : > { %v1012_v1 = vpop.f32.mrf.mxu1 }
 0x24c   : > { %v1060_v4 = vadd.f32 %v1255_v61, %v1045_v0  ;;  %v1043_v5 = vadd.f32 %v1012_v1, %v889_v63 }
 0x24d   : > { %v1397_v6 = vpop.f32.mrf.mxu1 }
 0x24e   : > { %v1068_v8 = vmax.f32 %v1060_v4, 0.0  ;;  %v1058_v9 = vadd.f32 %v1255_v61, %v1043_v5  ;;  %v1046_v10 = vadd.f32 %v1397_v6, %v900_v3 }
 0x24f   : > { %v1015_v13 = vpop.f32.mrf.mxu1 }
 0x250   : > { %v1270_v15 = vpack.c.bf16 %v1068_v8, %v1068_v8  ;;  %v1066_v16 = vmax.f32 %v1058_v9, 0.0  ;;  %v1061_v17 = vadd.f32 %v1255_v61, %v1046_v10  ;;  %v1044_v18 = vadd.f32 %v1015_v13, %v892_v7 }
 0x251   : > { %v1400_v20 = vpop.f32.mrf.mxu1 }
 0x252   : > { %1109 = vst.msk [vmem:[%s1616_s23 + $0x8] sm:$0xf] %vm1106_vm8, %v1270_v15  ;;  %v1268_v21 = vpack.c.bf16 %v1066_v16, %v1066_v16  ;;  %v1069_v22 = vmax.f32 %v1061_v17, 0.0  ;;  %v1059_v23 = vadd.f32 %v1255_v61, %v1044_v18  ;;  %v1049_v24 = vadd.f32 %v1400_v20, %v913_v11 }
 0x253   : > { %v1028_v26 = vpop.f32.mrf.mxu1 }
 0x254   : > { %1107 = vst.msk [vmem:[%s1616_s23] sm:$0xf] %vm1106_vm8, %v1268_v21  ;;  %v1271_v28 = vpack.c.bf16 %v1069_v22, %v1069_v22  ;;  %v1067_v29 = vmax.f32 %v1059_v23, 0.0  ;;  %v1064_v30 = vadd.f32 %v1255_v61, %v1049_v24  ;;  %v1047_v31 = vadd.f32 %v1028_v26, %v905_v19 }
 0x255   : > { %v1401_v33 = vpop.f32.mrf.mxu1 }
 0x256   : > { %1110 = vst.msk [vmem:[%s1616_s23 + $0xc] sm:$0xf] %vm1106_vm8, %v1271_v28  ;;  %v1269_v34 = vpack.c.bf16 %v1067_v29, %v1067_v29  ;;  %v1072_v35 = vmax.f32 %v1064_v30, 0.0  ;;  %v1062_v36 = vadd.f32 %v1255_v61, %v1047_v31  ;;  %v1050_v12 = vadd.f32 %v1401_v33, %v916_v25 }
 0x257   : > { %v1031_v37 = vpop.f32.mrf.mxu1 }
 0x258   : > { %1108 = vst.msk [vmem:[%s1616_s23 + $0x4] sm:$0xf] %vm1106_vm8, %v1269_v34  ;;  %v1274_v38 = vpack.c.bf16 %v1072_v35, %v1072_v35  ;;  %v1070_v40 = vmax.f32 %v1062_v36, 0.0  ;;  %v1065_v39 = vadd.f32 %v1255_v61, %v1050_v12  ;;  %v1048_v41 = vadd.f32 %v1031_v37, %v908_v32 }
 0x25a   : > { %1113 = vst.msk [vmem:[%s1616_s23 + $0x18] sm:$0xf] %vm1106_vm8, %v1274_v38  ;;  %v1272_v42 = vpack.c.bf16 %v1070_v40, %v1070_v40  ;;  %v1073_v43 = vmax.f32 %v1065_v39, 0.0  ;;  %v1063_v44 = vadd.f32 %v1255_v61, %v1048_v41 }
 0x25c   : > { %1111 = vst.msk [vmem:[%s1616_s23 + $0x10] sm:$0xf] %vm1106_vm8, %v1272_v42  ;;  %v1275_v45 = vpack.c.bf16 %v1073_v43, %v1073_v43  ;;  %v1071_v46 = vmax.f32 %v1063_v44, 0.0 }
 0x25e   : > { %1114 = vst.msk [vmem:[%s1616_s23 + $0x1c] sm:$0xf] %vm1106_vm8, %v1275_v45  ;;  %v1273_v47 = vpack.c.bf16 %v1071_v46, %v1071_v46 }
 0x260   : > { %1112 = vst.msk [vmem:[%s1616_s23 + $0x14] sm:$0xf] %vm1106_vm8, %v1273_v47 }
 0x261 PF: > { %s15_s18 = sadd.s32 1, %s1435_s18  }
 0x262   : > { %p12_p4 = scmp.ge.s32.totalorder %s15_s18, 6  }
 0x264   :  { %14 = sbr.rel (!%p12_p4) target bundleno = 1 (0x1), region = 74 }

// kernel: conditional_unet1d.5
= control target key start
LH: loop header
LB: loop body
LE: loop exit
PB: predicated region body
PF: predicated region fallthrough
CT: control target
= control target key end

     0   :  { %s2650_s24 = smov 0   ;;  %s3322_s0 = inlined_call_operand.vmem [shape: bf16[8,64,3], index: 0, kind: input, shape index: {}]   ;;  %s3323_s1 = inlined_call_operand.vmem [shape: bf16[8,64,3], index: 1, kind: input, shape index: {}]   ;;  %s3324_s2 = inlined_call_operand.vmem [shape: bf16[3,3,32], index: 2, kind: input, shape index: {}]   ;;  %s3325_s3 = inlined_call_operand.vmem [shape: bf16[3,3,32], index: 3, kind: input, shape index: {}]   ;;  %s3326_s4 = inlined_call_operand.vmem [shape: f32[1,32], index: 4, kind: input, shape index: {}]   ;;  %s3327_s5 = inlined_call_operand.vmem [shape: bf16[3,32,32], index: 5, kind: input, shape index: {}]   ;;  %s3328_s6 = inlined_call_operand.vmem [shape: f32[1,32], index: 6, kind: input, shape index: {}]   ;;  %s3329_s7 = inlined_call_operand.vmem [shape: bf16[8,64,32], index: 7, kind: output, shape index: {}]  }
   0x1 LB: > { %s2157_s25 = sadd.s32 4294967295, %s2607_s24   ;;  %p2161_p0 = scmp.ge.s32.totalorder %s2607_s24, 1  ;;  %s2607_s24 = sphi %s2650_s24, %s17_s24  }
   0x2   : > { %p251_p1 = scmp.lt.s32.totalorder %s2607_s24, 5 }
   0x4   : > { %p252_p2 = pnand %p2161_p0, %p251_p1 }
   0x6   : > { %255 = sbr.rel (%p252_p2) target bundleno = 589 (0x24d), region = 48 }
   0xb   : > { %vm452_vm0 = vcmask 1040384   ;;  %v456_v0 = vld [vmem:[%s3324_s2] sm:$0x3]  ;;  %vm483_vm1 = vcmask 1041408   ;;  %s2162_s28 = sshll.u32 %s2157_s25, 1  ;;  %v2609_v1 = vmov 65535  }
   0xc   : > { %v484_v2 = vsel %vm452_vm0, 4294967295, %v2609_v1  ;;  %p292_p3 = scmp.lt.s32.totalorder %s2162_s28, 7  ;;  %v2171_v4 = vld [vmem:[%s3324_s2 + $0x2] sm:$0x3]  ;;  %v2196_v5 = vld [vmem:[%s3324_s2 + $0x4] sm:$0x3] }
   0xd   : > { %v2662_v3 = vsel %vm483_vm1, %v484_v2, 0  ;;  %vm387_vm2 = vsmask.f32 256  ;;  %v981_v13 = vld [vmem:[%s3325_s3] sm:$0x3]  ;;  %v3335_v20 = vmov 0 }
   0xe   : > { %v487_v6 = vand.u32 %v2662_v3, %v456_v0  ;;  %s3376_s28 = smov (!%p292_p3, %s2162_s28), 7  ;;  %v2672_v7 = vand.u32 %v2171_v4, %v2662_v3  ;;  %v2675_v8 = vand.u32 %v2196_v5, %v2662_v3  ;;  %v2205_v14 = vld [vmem:[%s3325_s3 + $0x2] sm:$0x3]  ;;  %vm2711_vm3 = vmand %vm452_vm0, %vm387_vm2  ;;  %vm457_vm4 = vcmask 23552  }
   0xf   : > { %s2677_s10 = sshll.u32 %s3376_s28, 5  ;;  %v3336_v20 = vsel %vm2711_vm3, 4294967295, %v3335_v20  ;;  %vm702_vm5 = vsmask.f32 7424  ;;  %v2733_v32 = vand.u32 %v981_v13, %v2662_v3  ;;  %v2736_v33 = vand.u32 %v2205_v14, %v2662_v3 }
  0x10   : > { %2568 = vmatprep.subr.bf16.mxu1 %v487_v6  ;;  %2400 = vmatprep.subr.bf16.mxu0 %v487_v6  ;;  %s2683_s13 = scalar_lea.vmem %s3322_s0, %s2677_s10  ;;  %3337 = vst [vmem:[#allocation2_spill] sm:$0xff] %v3336_v20  ;;  %s2760_s20 = scalar_lea.vmem %s3323_s1, %s2677_s10  ;;  %vm727_vm6 = vcmask 1047552   ;;  %v3338_v14 = vmov 0  ;;  %vm1540_vm8 = vcmask 261120   ;;  %vm2070_vm9 = vcmask 257024  }
  0x11   : > { %2569 = vmatpush3.bf16.msra.mxu1 %v487_v6  ;;  %2401 = vmatpush3.bf16.msra.mxu0 %v487_v6  ;;  %v2686_v9 = vld [vmem:[%s2683_s13] sm:$0xff]   ;;  %v2704_v17 = vld [vmem:[%s2683_s13 + $0x8] sm:$0xff]   ;;  %v2722_v27 = vld [vmem:[%s2683_s13 + $0x10] sm:$0xff]  }
  0x12   : > { %2418 = vmatprep.subr.bf16.mxu1 %v2672_v7  ;;  %2436 = vmatprep.subr.bf16.mxu0 %v2675_v8  ;;  %v2691_v10 = vld [vmem:[%s2683_s13 + $0x20] sm:$0xff]   ;;  %v389_v11 = vshrl.u32 %v2686_v9, 16  ;;  %v392_v12 = vshll.u32 %v2686_v9, 16  ;;  %v2707_v18 = vld [vmem:[%s2683_s13 + $0x28] sm:$0xff]   ;;  %v396_v22 = vshrl.u32 %v2704_v17, 16  ;;  %v399_v23 = vshll.u32 %v2704_v17, 16  ;;  %vm2809_vm7 = vmand %vm727_vm6, %vm702_vm5 }
  0x13   : > { %v420_v15 = vshrl.u32 %v2691_v10, 16  ;;  %v423_v16 = vshll.u32 %v2691_v10, 16  ;;  %v427_v25 = vshrl.u32 %v2707_v18, 16  ;;  %v430_v26 = vshll.u32 %v2707_v18, 16  ;;  %v2725_v28 = vld [vmem:[%s2683_s13 + $0x30] sm:$0xff]   ;;  %v2730_v31 = vld [vmem:[%s2683_s13 + $0x18] sm:$0xff]  }
  0x14   : > { %v391_v19 = vrot.slane %v389_v11, 7  ;;  %v398_v30 = vrot.slane %v396_v22, 7  ;;  %v404_v36 = vshrl.u32 %v2722_v27, 16  ;;  %v407_v37 = vshll.u32 %v2722_v27, 16  ;;  %v2750_v42 = vld [vmem:[%s2683_s13 + $0x38] sm:$0xff]  }
  0x15   : > { %v422_v21 = vrot.slane %v420_v15, 7  ;;  %v429_v35 = vrot.slane %v427_v25, 7  ;;  %v435_v40 = vshrl.u32 %v2725_v28, 16  ;;  %v438_v41 = vshll.u32 %v2725_v28, 16 }
  0x16   : > { %v394_v24 = vor.u32 %v392_v12, %v391_v19  ;;  %v401_v39 = vor.u32 %v399_v23, %v398_v30  ;;  %v703_v43 = vrot.slane %v392_v12, 1  ;;  %v406_v45 = vrot.slane %v404_v36, 7 }
  0x17   : > { %v425_v29 = vor.u32 %v423_v16, %v422_v21  ;;  %v432_v44 = vor.u32 %v430_v26, %v429_v35  ;;  %v412_v46 = vshrl.u32 %v2730_v31, 16  ;;  %v437_v48 = vrot.slane %v435_v40, 7 }
  0x18   : > { %v454_v34 = vsel %vm2711_vm3, 0, %v394_v24  ;;  %v402_v47 = vsel %vm387_vm2, %v391_v19, %v401_v39  ;;  %v415_v49 = vshll.u32 %v2730_v31, 16  ;;  %v443_v50 = vshrl.u32 %v2750_v42, 16 }
  0x19   : > { %2402 = vmatprep.mubr.msk.bf16.mxu0 %vm457_vm4, %v454_v34  ;;  %v455_v38 = vsel %vm2711_vm3, 0, %v425_v29  ;;  %v433_v51 = vsel %vm387_vm2, %v422_v21, %v432_v44  ;;  %v409_v52 = vor.u32 %v407_v37, %v406_v45  ;;  %v414_v53 = vrot.slane %v412_v46, 7  ;;  %v2823_v21 = vld [vmem:[%s2760_s20] sm:$0xff]  }
  0x1a   : > { %2410 = vmatprep.mubr.msk.bf16.mxu1 %vm457_vm4, %v455_v38  ;;  %2403 = vmatmul.mubr.msk.bf16.vlgmr.msra.gmra.mxu0 %vm457_vm4, %v402_v47  ;;  %v446_v54 = vshll.u32 %v2750_v42, 16  ;;  %v440_v55 = vor.u32 %v438_v41, %v437_v48  ;;  %v445_v56 = vrot.slane %v443_v50, 7  ;;  %v704_v59 = vor.u32 %v703_v43, %v389_v11  ;;  %v2865_v38 = vld [vmem:[%s2760_s20 + $0x18] sm:$0xff]  }
  0x1b   : > { %2411 = vmatmul.mubr.msk.bf16.vlgmr.msra.gmra.mxu1 %vm457_vm4, %v433_v51  ;;  %2437 = vmatpush3.bf16.msra.mxu0 %v2675_v8  ;;  %v410_v57 = vsel %vm387_vm2, %v398_v30, %v409_v52  ;;  %v417_v58 = vor.u32 %v415_v49, %v414_v53  ;;  %v705_v60 = vrot.slane %v399_v23, 1  ;;  %v708_v2 = vrot.slane %v407_v37, 1  ;;  %v2841_v30 = vld [vmem:[%s2760_s20 + $0x8] sm:$0xff]   ;;  %v2593_v53 = vld [vmem:[%s2760_s20 + $0x30] sm:$0xff]  }
  0x1c   : > { %2419 = vmatpush3.bf16.msra.mxu1 %v2672_v7  ;;  %2472 = vmatprep.subr.bf16.mxu0 %v2736_v33  ;;  %v441_v61 = vsel %vm387_vm2, %v429_v35, %v440_v55  ;;  %v448_v62 = vor.u32 %v446_v54, %v445_v56  ;;  %v711_v6 = vrot.slane %v415_v49, 1  ;;  %v2230_v7 = vld [vmem:[%s3325_s3 + $0x4] sm:$0x3]  ;;  %v714_v11 = vrot.slane %v423_v16, 1 }
  0x1d   : > { %2406 = vmatprep.mubr.msk.bf16.mxu0 %vm457_vm4, %v410_v57  ;;  %2414 = vmatprep.mubr.msk.bf16.mxu1 %vm457_vm4, %v441_v61  ;;  %v418_v63 = vsel %vm387_vm2, %v406_v45, %v417_v58  ;;  %v706_v1 = vsel %vm702_vm5, %v704_v59, %v705_v60  ;;  %v707_v4 = vor.u32 %v705_v60, %v396_v22  ;;  %v3339_v14 = vsel %vm2809_vm7, 4294967295, %v3338_v14  ;;  %v2594_v61 = vld [vmem:[%s2760_s20 + $0x38] sm:$0xff]  }
  0x1e   : > { %2454 = vmatprep.subr.bf16.mxu1 %v2733_v32  ;;  %v449_v0 = vsel %vm387_vm2, %v437_v48, %v448_v62  ;;  %v710_v5 = vor.u32 %v708_v2, %v404_v36  ;;  %v2799_v13 = vand.u32 %v2230_v7, %v2662_v3  ;;  %3340 = vst [vmem:[#allocation3_spill] sm:$0xff] %v3339_v14  ;;  %v716_v16 = vrot.slane %v430_v26, 1 }
  0x1f   : > { %v709_v8 = vsel %vm702_vm5, %v707_v4, %v708_v2  ;;  %v715_v3 = vor.u32 %v714_v11, %v420_v15  ;;  %v719_v15 = vrot.slane %v438_v41, 1  ;;  %v722_v24 = vrot.slane %v446_v54, 1  ;;  %v2873_v41 = vld [vmem:[%s2760_s20 + $0x20] sm:$0xff]  }
  0x20   : > { %v712_v12 = vsel %vm702_vm5, %v710_v5, %v711_v6  ;;  %v718_v22 = vor.u32 %v716_v16, %v427_v25  ;;  %v916_v26 = vshrl.u32 %v2823_v21, 16  ;;  %v919_v25 = vshll.u32 %v2823_v21, 16 }
  0x21   : > { %v717_v19 = vsel %vm702_vm5, %v715_v3, %v716_v16  ;;  %v721_v23 = vor.u32 %v719_v15, %v435_v40  ;;  %v939_v44 = vshrl.u32 %v2865_v38, 16  ;;  %v942_v49 = vshll.u32 %v2865_v38, 16 }
  0x22   : > { %2407 = vmatmul.mubr.msk.bf16.gmra.mxu0 %vm457_vm4, %v418_v63  ;;  %v950_v52 = vshll.u32 %v2873_v41, 16  ;;  %v962_v57 = vshrl.u32 %v2593_v53, 16  ;;  %v970_v2 = vshrl.u32 %v2594_v61, 16  ;;  %v973_v7 = vshll.u32 %v2594_v61, 16 }
  0x23   : > { %2415 = vmatmul.mubr.msk.bf16.gmra.mxu1 %vm457_vm4, %v449_v0  ;;  %2438 = vmatprep.mubr.msk.bf16.mxu0 %vm457_vm4, %v706_v1  ;;  %v723_v29 = vsel %vm702_vm5, %v721_v23, %v722_v24  ;;  %v941_v48 = vrot.slane %v939_v44, 7  ;;  %v965_v0 = vshll.u32 %v2593_v53, 16 }
  0x24   : > { %2420 = vmatprep.mubr.msk.bf16.mxu1 %vm457_vm4, %v2686_v9  ;;  %v713_v9 = vor.u32 %v711_v6, %v412_v46  ;;  %v947_v46 = vshrl.u32 %v2873_v41, 16  ;;  %v964_v63 = vrot.slane %v962_v57, 7  ;;  %v972_v6 = vrot.slane %v970_v2, 7 }
  0x25   : > { %v944_v54 = vor.u32 %v942_v49, %v941_v48  ;;  %v1233_v23 = vrot.slane %v950_v52, 1 }
  0x26   : > { %v949_v51 = vrot.slane %v947_v46, 7  ;;  %v967_v4 = vor.u32 %v965_v0, %v964_v63 }
  0x28   : > { %v952_v56 = vor.u32 %v950_v52, %v949_v51 }
  0x2a   : > { %2439 = vmatmul.mubr.msk.bf16.vlgmr.msra.gmra.mxu0 %vm457_vm4, %v709_v8  ;;  %v980_v62 = vsel %vm2711_vm3, 0, %v952_v56  ;;  %v1222_v8 = vrot.slane %v919_v25, 1 }
  0x2b   : > { %2421 = vmatmul.mubr.msk.bf16.vlgmr.msra.gmra.mxu1 %vm457_vm4, %v2704_v17  ;;  %2442 = vmatprep.mubr.msk.bf16.mxu0 %vm457_vm4, %v712_v12  ;;  %v729_v17 = vsel %vm2809_vm7, %v713_v9, 0  ;;  %v975_v12 = vor.u32 %v973_v7, %v972_v6 }
  0x2c   : > { %2455 = vmatpush3.bf16.msra.mxu1 %v2733_v32  ;;  %2424 = vmatprep.mubr.msk.bf16.mxu1 %vm457_vm4, %v2722_v27  ;;  %v720_v27 = vsel %vm702_vm5, %v718_v22, %v719_v15  ;;  %v2847_v32 = vld [vmem:[%s2760_s20 + $0x10] sm:$0xff]  }
  0x2d   : > { %2473 = vmatpush3.bf16.msra.mxu0 %v2736_v33  ;;  %2490 = vmatprep.subr.bf16.mxu1 %v2799_v13  ;;  %v923_v33 = vshrl.u32 %v2841_v30, 16  ;;  %v931_v35 = vshrl.u32 %v2847_v32, 16  ;;  %v934_v40 = vshll.u32 %v2847_v32, 16  ;;  %v976_v3 = vsel %vm387_vm2, %v964_v63, %v975_v12 }
  0x2f   : > { %v925_v37 = vrot.slane %v923_v33, 7 }
  0x32   : > { %2443 = vmatmul.mubr.msk.bf16.gmra.mxu0 %vm457_vm4, %v729_v17  ;;  %v1227_v17 = vrot.slane %v934_v40, 1 }
  0x33   : > { %2425 = vmatmul.mubr.msk.bf16.gmra.mxu1 %vm457_vm4, %v2730_v31  ;;  %2446 = vmatprep.mubr.msk.bf16.mxu0 %vm457_vm4, %v717_v19  ;;  %v918_v31 = vrot.slane %v916_v26, 7 }
  0x34   : > { %2428 = vmatprep.mubr.msk.bf16.mxu1 %vm457_vm4, %v2691_v10  ;;  %v724_v10 = vor.u32 %v722_v24, %v443_v50  ;;  %v2886_v50 = vld [vmem:[%s2760_s20 + $0x28] sm:$0xff]   ;;  %v1229_v15 = vor.u32 %v1227_v17, %v931_v35  ;;  %s3264_s20 = scalar_lea.vmem %s3329_s7, %s2677_s10 }
  0x35   : > { %v921_v34 = vor.u32 %v919_v25, %v918_v31  ;;  %v954_v55 = vshrl.u32 %v2886_v50, 16  ;;  %v957_v60 = vshll.u32 %v2886_v50, 16  ;;  %v1238_v25 = vrot.slane %v965_v0, 1 }
  0x36   : > { %v730_v36 = vsel %vm2809_vm7, %v724_v10, 0 }
  0x37   : > { %v979_v39 = vsel %vm2711_vm3, 0, %v921_v34  ;;  %v956_v59 = vrot.slane %v954_v55, 7  ;;  %v1240_v10 = vor.u32 %v1238_v25, %v962_v57 }
  0x39   : > { %v959_v1 = vor.u32 %v957_v60, %v956_v59  ;;  %v968_v11 = vsel %vm387_vm2, %v956_v59, %v967_v4 }
  0x3a   : > { %2447 = vmatmul.mubr.msk.bf16.gmra.mxu0 %vm457_vm4, %v720_v27  ;;  %v1234_v27 = vor.u32 %v1233_v23, %v947_v46 }
  0x3b   : > { %2429 = vmatmul.mubr.msk.bf16.gmra.mxu1 %vm457_vm4, %v2707_v18  ;;  %2450 = vmatprep.mubr.msk.bf16.mxu0 %vm457_vm4, %v723_v29  ;;  %v926_v18 = vshll.u32 %v2841_v30, 16  ;;  %v960_v5 = vsel %vm387_vm2, %v949_v51, %v959_v1  ;;  %v1235_v29 = vrot.slane %v957_v60, 1 }
  0x3c   : > { %2432 = vmatprep.mubr.msk.bf16.mxu1 %vm457_vm4, %v2725_v28  ;;  %v933_v28 = vrot.slane %v931_v35, 7 }
  0x3d   : > { %v928_v43 = vor.u32 %v926_v18, %v925_v37  ;;  %v1224_v9 = vrot.slane %v926_v18, 1  ;;  %v2595_v18 = vld [vmem:[%s3327_s5 + $0x8] sm:$0xff]  }
  0x3e   : > { %v936_v45 = vor.u32 %v934_v40, %v933_v28  ;;  %v945_v58 = vsel %vm387_vm2, %v933_v28, %v944_v54  ;;  %2508 = vmatprep.subr.bf16.mxu0 %v2595_v18  ;;  %v2596_v28 = vld [vmem:[%s3327_s5] sm:$0xff]   ;;  %v2959_v40 = vld [vmem:[%s3327_s5 + $0x28] sm:$0xff]  }
  0x3f   : > { %v929_v47 = vsel %vm387_vm2, %v918_v31, %v928_v43  ;;  %v1226_v19 = vor.u32 %v1224_v9, %v923_v33  ;;  %v1236_v31 = vsel %vm702_vm5, %v1234_v27, %v1235_v29  ;;  %v1241_v33 = vrot.slane %v973_v7, 1  ;;  %3341 = vst [vmem:[#allocation4_spill] sm:$0xff] %v2959_v40 }
  0x41   : > { %v1228_v22 = vsel %vm702_vm5, %v1226_v19, %v1227_v17  ;;  %v1242_v35 = vsel %vm702_vm5, %v1240_v10, %v1241_v33 }
  0x42   : > { %2451 = vmatmul.mubr.msk.bf16.gmra.mxu0 %vm457_vm4, %v730_v36  ;;  %v1243_v36 = vor.u32 %v1241_v33, %v970_v2 }
  0x43   : > { %2433 = vmatmul.mubr.msk.bf16.gmra.mxu1 %vm457_vm4, %v2750_v42  ;;  %2474 = vmatprep.mubr.msk.bf16.mxu0 %vm457_vm4, %v2823_v21  ;;  %v937_v42 = vsel %vm387_vm2, %v925_v37, %v936_v45  ;;  %v1230_v21 = vrot.slane %v942_v49, 1 }
  0x44   : > { %2456 = vmatprep.mubr.msk.bf16.mxu1 %vm457_vm4, %v979_v39  ;;  %v1247_v37 = vsel %vm2809_vm7, %v1243_v36, 0  ;;  %v2598_v39 = vld [vmem:[%s3327_s5 + $0x10] sm:$0xff]  }
  0x45   : > { %v1231_v24 = vsel %vm702_vm5, %v1229_v15, %v1230_v21 }
  0x4a   : > { %2475 = vmatmul.mubr.msk.bf16.vlgmr.msra.gmra.mxu0 %vm457_vm4, %v2841_v30 }
  0x4b   : > { %2457 = vmatmul.mubr.msk.bf16.vlgmr.msra.gmra.mxu1 %vm457_vm4, %v929_v47  ;;  %2478 = vmatprep.mubr.msk.bf16.mxu0 %vm457_vm4, %v2847_v32  ;;  %v1237_v32 = vor.u32 %v1235_v29, %v954_v55 }
  0x4c   : > { %2491 = vmatpush3.bf16.msra.mxu1 %v2799_v13  ;;  %2460 = vmatprep.mubr.msk.bf16.mxu1 %vm457_vm4, %v937_v42  ;;  %v1223_v13 = vor.u32 %v1222_v8, %v916_v26  ;;  %v1232_v26 = vor.u32 %v1230_v21, %v939_v44 }
  0x4d   : > { %v1239_v34 = vsel %vm702_vm5, %v1237_v32, %v1238_v25  ;;  %2509 = vmatpush3.bf16.msra.mxu0 %v2595_v18 }
  0x4e   : > { %v1225_v16 = vsel %vm702_vm5, %v1223_v13, %v1224_v9  ;;  %v1246_v30 = vsel %vm2809_vm7, %v1232_v26, 0  ;;  %2510 = vmatprep.subr.bf16.mxu0 %v2596_v28 }
  0x51   : > { %2511 = vmatpush3.bf16.msra.mxu0 %v2596_v28 }
  0x52   : > { %2479 = vmatmul.mubr.msk.bf16.gmra.mxu0 %vm457_vm4, %v2865_v38  ;;  %v2597_v38 = vld [vmem:[%s3327_s5 + $0x18] sm:$0xff]   ;;  %2548 = vmatprep.subr.bf16.mxu0 %v2959_v40 }
  0x53   : > { %2461 = vmatmul.mubr.msk.bf16.gmra.mxu1 %vm457_vm4, %v945_v58  ;;  %2482 = vmatprep.mubr.msk.bf16.mxu0 %vm457_vm4, %v2873_v41 }
  0x54   : > { %2464 = vmatprep.mubr.msk.bf16.mxu1 %vm457_vm4, %v980_v62  ;;  %2528 = vmatprep.subr.bf16.mxu1 %v2597_v38 }
  0x5a   : > { %2483 = vmatmul.mubr.msk.bf16.gmra.mxu0 %vm457_vm4, %v2886_v50 }
  0x5b   : > { %2465 = vmatmul.mubr.msk.bf16.gmra.mxu1 %vm457_vm4, %v960_v5  ;;  %2486 = vmatprep.mubr.msk.bf16.mxu0 %vm457_vm4, %v2593_v53 }
  0x5c   : > { %2468 = vmatprep.mubr.msk.bf16.mxu1 %vm457_vm4, %v968_v11 }
  0x62   : > { %2487 = vmatmul.mubr.msk.bf16.gmra.mxu0 %vm457_vm4, %v2594_v61 }
  0x63   : > { %2469 = vmatmul.mubr.msk.bf16.gmra.mxu1 %vm457_vm4, %v976_v3 }
  0x64   : > { %2492 = vmatprep.mubr.msk.bf16.mxu1 %vm457_vm4, %v1225_v16 }
  0x6b   : > { %2493 = vmatmul.mubr.msk.bf16.vlgmr.msra.gmra.mxu1 %vm457_vm4, %v1228_v22 }
  0x6c   : > { %2496 = vmatprep.mubr.msk.bf16.mxu1 %vm457_vm4, %v1231_v24  ;;  %2529 = vmatpush3.bf16.msra.mxu1 %v2597_v38 }
  0x6d   : > { %2530 = vmatprep.subr.bf16.mxu1 %v2598_v39 }
  0x70   : > { %2531 = vmatpush3.bf16.msra.mxu1 %v2598_v39 }
  0x73   : > { %2497 = vmatmul.mubr.msk.bf16.gmra.mxu1 %vm457_vm4, %v1246_v30 }
  0x74   : > { %2500 = vmatprep.mubr.msk.bf16.mxu1 %vm457_vm4, %v1236_v31 }
  0x7b   : > { %2501 = vmatmul.mubr.msk.bf16.gmra.mxu1 %vm457_vm4, %v1239_v34 }
  0x7c   : > { %2504 = vmatprep.mubr.msk.bf16.mxu1 %vm457_vm4, %v1242_v35 }
  0x83   : > { %2505 = vmatmul.mubr.msk.bf16.gmra.mxu1 %vm457_vm4, %v1247_v37 }
  0xda   : > { %v2962_v41 = vpop.f32.mrf.mxu0 }
  0xdb   : > { %v2412_v43 = vpop.f32.mrf.mxu1 }
  0xdc   : > { %v2964_v44 = vpop.f32.mrf.mxu0 }
  0xdd   : > { %v555_v45 = vpop.f32.mrf.mxu1 }
  0xde   : > { %v2966_v46 = vpop.f32.mrf.mxu0 }
  0xdf   : > { %v2413_v47 = vpop.f32.mrf.mxu1 }
  0xe0   : > { %v2968_v48 = vpop.f32.mrf.mxu0 }
  0xe1   : > { %v2970_v49 = vpop.f32.mrf.mxu1 }
  0xe2   : > { %v2972_v50 = vpop.f32.mrf.mxu0 }
  0xe3   : > { %v2416_v42 = vpop.f32.mrf.mxu1 }
  0xe4   : > { %v2974_v51 = vpop.f32.mrf.mxu0 }
  0xe5   : > { %v571_v52 = vpop.f32.mrf.mxu1 }
  0xe6   : > { %v2976_v53 = vpop.f32.mrf.mxu0 }
  0xe7   : > { %v2417_v54 = vpop.f32.mrf.mxu1 }
  0xe8   : > { %v2978_v55 = vpop.f32.mrf.mxu0 }
  0xe9   : > { %v2980_v56 = vpop.f32.mrf.mxu1 }
  0xea   : > { %v2982_v57 = vpop.f32.mrf.mxu0 }
  0xeb   : > { %v2984_v58 = vpop.f32.mrf.mxu1 }
  0xec   : > { %v2986_v59 = vpop.f32.mrf.mxu0 }
  0xed   : > { %v639_v60 = vpop.f32.mrf.mxu1 }
  0xee   : > { %v2988_v61 = vpop.f32.mrf.mxu0 }
  0xef   : > { %v2423_v62 = vpop.f32.mrf.mxu1 }
  0xf0   : > { %v2990_v63 = vpop.f32.mrf.mxu0 }
  0xf1   : > { %v2992_v0 = vpop.f32.mrf.mxu1 }
  0xf2   : > { %v2994_v1 = vpop.f32.mrf.mxu0 }
  0xf3   : > { %v2426_v2 = vpop.f32.mrf.mxu1 }
  0xf4   : > { %v2996_v4 = vpop.f32.mrf.mxu0 }
  0xf5   : > { %v655_v5 = vpop.f32.mrf.mxu1 }
  0xf6   : > { %v2998_v6 = vpop.f32.mrf.mxu0 }
  0xf7   : > { %v2427_v7 = vpop.f32.mrf.mxu1 }
  0xf8   : > { %v3000_v8 = vpop.f32.mrf.mxu0 }
  0xf9   : > { %v3002_v11 = vpop.f32.mrf.mxu1 }
  0xfa   : > { %v3004_v12 = vpop.f32.mrf.mxu0 }
  0xfb   : > { %v2430_v13 = vpop.f32.mrf.mxu1 }
  0xfc   : > { %v3006_v9 = vadd.f32 %v2430_v13, %v2412_v43  ;;  %v3008_v3 = vpop.f32.mrf.mxu0 }
  0xfd   : > { %v671_v16 = vpop.f32.mrf.mxu1 }
  0xfe   : > { %v3010_v17 = vadd.f32 %v671_v16, %v555_v45  ;;  %v3012_v19 = vpop.f32.mrf.mxu0 }
  0xff   : > { %v2431_v15 = vpop.f32.mrf.mxu1 }
 0x100   : > { %v3014_v21 = vadd.f32 %v2431_v15, %v2413_v47  ;;  %v3016_v22 = vpop.f32.mrf.mxu0 }
 0x101   : > { %v3018_v23 = vpop.f32.mrf.mxu1 }
 0x102   : > { %v3020_v24 = vpop.f32.mrf.mxu0 }
 0x103   : > { %v2434_v26 = vpop.f32.mrf.mxu1 }
 0x104   : > { %v3022_v27 = vadd.f32 %v2434_v26, %v2416_v42  ;;  %v3024_v29 = vpop.f32.mrf.mxu0 }
 0x105   : > { %v687_v30 = vpop.f32.mrf.mxu1 }
 0x106   : > { %v3026_v31 = vadd.f32 %v687_v30, %v571_v52  ;;  %v3028_v25 = vpop.f32.mrf.mxu0 }
 0x107   : > { %v2435_v32 = vpop.f32.mrf.mxu1 }
 0x108   : > { %v3030_v10 = vadd.f32 %v2435_v32, %v2417_v54  ;;  %v3032_v33 = vpop.f32.mrf.mxu0 }
 0x109   : > { %3342 = vst [vmem:[#allocation5_spill] sm:$0xff] %v3032_v33  ;;  %v3034_v34 = vpop.f32.mrf.mxu1 }
 0x10a   : > { %v2476_v35 = vpop.f32.mrf.mxu0 }
 0x10b   : > { %v2458_v36 = vpop.f32.mrf.mxu1 }
 0x10c   : > { %v1159_v37 = vpop.f32.mrf.mxu0 }
 0x10d   : > { %v1043_v18 = vpop.f32.mrf.mxu1 }
 0x10e   : > { %v2477_v38 = vpop.f32.mrf.mxu0 }
 0x10f   : > { %v2459_v39 = vpop.f32.mrf.mxu1 }
 0x110   : > { %v1162_v28 = vpop.f32.mrf.mxu0 }
 0x111   : > { %v1046_v43 = vpop.f32.mrf.mxu1 }
 0x112   : > { %v2480_v45 = vpop.f32.mrf.mxu0 }
 0x113   : > { %v2462_v47 = vpop.f32.mrf.mxu1 }
 0x114   : > { %v1175_v42 = vpop.f32.mrf.mxu0 }
 0x115   : > { %v1059_v52 = vpop.f32.mrf.mxu1 }
 0x116   : > { %v3036_v13 = vpop.f32.mrf.mxu0 }
 0x117   : > { %3343 = vst [vmem:[#allocation6_spill] sm:$0xff] %v3036_v13  ;;  %v3038_v54 = vpop.f32.mrf.mxu1 }
 0x118   : > { %3344 = vst [vmem:[#allocation7_spill] sm:$0xff] %v3038_v54  ;;  %v3042_v15 = vpop.f32.mrf.mxu0 }
 0x119   : > { %v3040_v16 = vpop.f32.mrf.mxu1  ;;  %3346 = vst [vmem:[#allocation9_spill] sm:$0xff] %v3042_v15 }
 0x11a   : > { %3345 = vst [vmem:[#allocation8_spill] sm:$0xff] %v3040_v16  ;;  %v3048_v32 = vpop.f32.mrf.mxu0 }
 0x11b   : > { %v3044_v26 = vpop.f32.mrf.mxu1  ;;  %3349 = vst [vmem:[#allocation12_spill] sm:$0xff] %v3048_v32 }
 0x11c   : > { %3347 = vst [vmem:[#allocation10_spill] sm:$0xff] %v3044_v26  ;;  %v3054_v40 = vpop.f32.mrf.mxu0  ;;  %v648_v26 = vadd.f32 %v2984_v58, %v2962_v41  ;;  %v667_v41 = vadd.f32 %v2427_v7, %v2976_v53 }
 0x11d   : > { %v3046_v30 = vpop.f32.mrf.mxu1  ;;  %3352 = vst [vmem:[#allocation15_spill] sm:$0xff] %v3054_v40 }
 0x11e   : > { %3348 = vst [vmem:[#allocation11_spill] sm:$0xff] %v3046_v30  ;;  %v3060_v54 = vpop.f32.mrf.mxu0  ;;  %v640_v30 = vadd.f32 %v639_v60, %v2964_v44  ;;  %v859_v40 = vadd.f32 %v2982_v57, %v648_v26  ;;  %v1160_v44 = vadd.f32 %v1159_v37, %v1043_v18 }
 0x11f   : > { %v3050_v14 = vpop.f32.mrf.mxu1  ;;  %3355 = vst [vmem:[#allocation18_spill] sm:$0xff] %v3060_v54  ;;  %v656_v54 = vadd.f32 %v655_v5, %v2974_v51  ;;  %v675_v5 = vadd.f32 %v3018_v23, %v2970_v49  ;;  %v3100_v49 = vadd.f32 %v3008_v3, %v3010_v17  ;;  %v1176_v3 = vadd.f32 %v1175_v42, %v1059_v52 }
 0x120   : > { %3350 = vst [vmem:[#allocation13_spill] sm:$0xff] %v3050_v14  ;;  %v651_v14 = vadd.f32 %v2423_v62, %v2966_v46  ;;  %v3070_v15 = vpop.f32.mrf.mxu0  ;;  %v857_v60 = vadd.f32 %v2986_v59, %v640_v30  ;;  %v659_v46 = vadd.f32 %v3002_v11, %v2978_v55  ;;  %v3090_v55 = vld [vmem:[%s3326_s4] ss:$0 sm:$0xff] }
 0x121   : > { %v3052_v33 = vpop.f32.mrf.mxu1  ;;  %v861_v53 = vadd.f32 %v2996_v4, %v656_v54 }
 0x122   : > { %3351 = vst [vmem:[#allocation14_spill] sm:$0xff] %v3052_v33  ;;  %v1168_v33 = vadd.f32 %v2476_v35, %v2458_v36  ;;  %v860_v35 = vadd.f32 %v2988_v61, %v651_v14  ;;  %v864_v14 = vadd.f32 %v2998_v6, %v667_v41  ;;  %v1163_v61 = vadd.f32 %v1162_v28, %v1046_v43 }
 0x123   : > { %v3056_v20 = vpop.f32.mrf.mxu1  ;;  %v1184_v6 = vadd.f32 %v2480_v45, %v2462_v47  ;;  %v3108_v36 = vadd.f32 %v3016_v22, %v675_v5  ;;  %v3122_v22 = vadd.f32 %v3028_v25, %v3030_v10  ;;  %v3361_v54 = vld [vmem:[#allocation10_spill] sm:$0xff]  ;;  %v3362_v25 = vld [vmem:[#allocation12_spill] sm:$0xff] }
 0x124   : > { %3353 = vst [vmem:[#allocation16_spill] sm:$0xff] %v3056_v20  ;;  %v643_v20 = vadd.f32 %v2992_v0, %v2968_v48  ;;  %v1171_v48 = vadd.f32 %v2477_v38, %v2459_v39  ;;  %v2488_v0 = vpop.f32.mrf.mxu0  ;;  %v3358_v38 = vld [vmem:[#allocation6_spill] sm:$0xff]  ;;  %v3360_v39 = vld [vmem:[#allocation9_spill] sm:$0xff]  ;;  %v1200_v10 = vadd.f32 %v3362_v25, %v3361_v54  ;;  %v3364_v26 = vld [vmem:[#allocation15_spill] sm:$0xff] }
 0x125   : > { %v3058_v13 = vpop.f32.mrf.mxu1 }
 0x126   : > { %3354 = vst [vmem:[#allocation17_spill] sm:$0xff] %v3058_v13  ;;  %v664_v13 = vadd.f32 %v2426_v2, %v2972_v50  ;;  %v858_v51 = vadd.f32 %v2990_v63, %v643_v20  ;;  %v862_v20 = vadd.f32 %v3000_v8, %v659_v46  ;;  %v3096_v63 = vadd.f32 %v3004_v12, %v3006_v9  ;;  %v1207_v11 = vpop.f32.mrf.mxu0  ;;  %v3366_v30 = vld [vmem:[#allocation18_spill] sm:$0xff] }
 0x127   : > { %v3062_v16 = vpop.f32.mrf.mxu1  ;;  %v3112_v12 = vadd.f32 %v3020_v24, %v3022_v27  ;;  %v3116_v9 = vadd.f32 %v3024_v29, %v3026_v31  ;;  %v3126_v24 = vadd.f32 %v3034_v34, %v2980_v56  ;;  %v3357_v27 = vld [vmem:[#allocation7_spill] sm:$0xff]  ;;  %v3359_v31 = vld [vmem:[#allocation8_spill] sm:$0xff]  ;;  %v3365_v34 = vld [vmem:[#allocation13_spill] sm:$0xff] }
 0x128   : > { %3356 = vst [vmem:[#allocation19_spill] sm:$0xff] %v3062_v16  ;;  %v863_v57 = vadd.f32 %v2994_v1, %v664_v13  ;;  %v3104_v1 = vadd.f32 %v3012_v19, %v3014_v21  ;;  %v1187_v29 = vadd.f32 %v3358_v38, %v3357_v27  ;;  %v1179_v28 = vadd.f32 %v3360_v39, %v3359_v31  ;;  %v2489_v45 = vpop.f32.mrf.mxu0 }
 0x129   : > { %v3067_v32 = vpop.f32.mrf.mxu1  ;;  %v1203_v41 = vadd.f32 %v3366_v30, %v3365_v34 }
 0x12b   : > { %v2494_v16 = vpop.f32.mrf.mxu1 }
 0x12c   : > { %v1376_v58 = vadd.f32 %v2494_v16, %v1168_v33  ;;  %v3363_v16 = vld [vmem:[#allocation11_spill] sm:$0xff] }
 0x12d   : > { %v1311_v62 = vpop.f32.mrf.mxu1  ;;  %v1192_v56 = vadd.f32 %v3364_v26, %v3363_v16  ;;  %v3369_v5 = vld [vmem:[#allocation17_spill] sm:$0xff] }
 0x12e   : > { %v1392_v50 = vadd.f32 %v1376_v58, %v859_v40  ;;  %v1374_v2 = vadd.f32 %v1311_v62, %v1160_v44 }
 0x12f   : > { %v2495_v59 = vpop.f32.mrf.mxu1 }
 0x130   : > { %v1390_v40 = vadd.f32 %v1374_v2, %v857_v60  ;;  %v1377_v7 = vadd.f32 %v2495_v59, %v1171_v48  ;;  %v1415_v23 = vadd.f32 %v3090_v55, %v1392_v50  ;;  %v3367_v48 = vld [vmem:[#allocation14_spill] sm:$0xff]  ;;  %v3368_v2 = vld [vmem:[#allocation16_spill] sm:$0xff]  ;;  %v3143_v59 = vadd.f32 %v1207_v11, %v3369_v5 }
 0x131   : > { %v1314_v4 = vpop.f32.mrf.mxu1  ;;  %v1195_v50 = vadd.f32 %v3070_v15, %v3367_v48 }
 0x132   : > { %v1393_v33 = vadd.f32 %v1377_v7, %v860_v35  ;;  %v1375_v8 = vadd.f32 %v1314_v4, %v1163_v61  ;;  %v1413_v19 = vadd.f32 %v3090_v55, %v1390_v40  ;;  %v1431_v47 = vmax.f32 %v1415_v23, 0.0  ;;  %v3370_v7 = vld [vmem:[#allocation19_spill] sm:$0xff] }
 0x133   : > { %v2498_v17 = vpop.f32.mrf.mxu1  ;;  %v3146_v4 = vadd.f32 %v2489_v45, %v3370_v7 }
 0x134   : > { %v1416_v21 = vadd.f32 %v3090_v55, %v1393_v33  ;;  %v1391_v37 = vadd.f32 %v1375_v8, %v858_v51  ;;  %v1380_v18 = vadd.f32 %v2498_v17, %v1184_v6  ;;  %v1429_v60 = vmax.f32 %v1413_v19, 0.0  ;;  %v1210_v6 = vpop.f32.mrf.mxu0 }
 0x135   : > { %v1327_v43 = vpop.f32.mrf.mxu1  ;;  %v1216_v51 = vadd.f32 %v2488_v0, %v3368_v2 }
 0x136   : > { %v1432_v42 = vmax.f32 %v1416_v21, 0.0  ;;  %v1414_v52 = vadd.f32 %v3090_v55, %v1391_v37  ;;  %v1378_v13 = vadd.f32 %v1327_v43, %v1176_v3  ;;  %v1396_v44 = vadd.f32 %v1380_v18, %v863_v57 }
 0x137   : > { %v2499_v58 = vpop.f32.mrf.mxu1  ;;  %v3154_v37 = vadd.f32 %v1210_v6, %v3067_v32 }
 0x138   : > { %v1446_v46 = vpack.c.bf16 %v1432_v42, %v1431_v47  ;;  %v1430_v62 = vmax.f32 %v1414_v52, 0.0  ;;  %v1394_v35 = vadd.f32 %v1378_v13, %v861_v53  ;;  %v1381_v61 = vadd.f32 %v2499_v58, %v1187_v29 }
 0x139   : > { %v1330_v40 = vpop.f32.mrf.mxu1  ;;  %v1419_v8 = vadd.f32 %v3090_v55, %v1396_v44 }
 0x13a   : > { %v1466_v57 = vshrl.u32 %v1446_v46, 16  ;;  %v1469_v23 = vshll.u32 %v1446_v46, 16  ;;  %v1445_v33 = vpack.c.bf16 %v1430_v62, %v1429_v60  ;;  %v1417_v53 = vadd.f32 %v3090_v55, %v1394_v35  ;;  %v2600_v35 = vld [vmem:[%s3327_s5 + $0x20] sm:$0xff]  }
 0x13b   : > { %v1397_v3 = vadd.f32 %v1381_v61, %v864_v14  ;;  %v1379_v15 = vadd.f32 %v1330_v40, %v1179_v28  ;;  %v2502_v17 = vpop.f32.mrf.mxu1  ;;  %v1435_v43 = vmax.f32 %v1419_v8, 0.0 }
 0x13c   : > { %v3150_v0 = vrot.slane %v1466_v57, 7  ;;  %v1384_v11 = vadd.f32 %v2502_v17, %v1200_v10  ;;  %2532 = vmatprep.mubr.msk.bf16.mxu1 %vm1540_vm8, %v1445_v33  ;;  %v1459_v19 = vshrl.u32 %v1445_v33, 16  ;;  %v1462_v21 = vshll.u32 %v1445_v33, 16 }
 0x13d   : > { %v1420_v18 = vadd.f32 %v3090_v55, %v1397_v3  ;;  %v1395_v27 = vadd.f32 %v1379_v15, %v862_v20  ;;  %v1343_v38 = vpop.f32.mrf.mxu1  ;;  %2533 = vmatmul.mubr.msk.bf16.vlgmr.msra.gmra.mxu1 %vm1540_vm8, %v1446_v46  ;;  %v1789_v29 = vrot.slane %v1469_v23, 1  ;;  %v1433_v52 = vmax.f32 %v1417_v53, 0.0 }
 0x13e   : > { %v1400_v14 = vadd.f32 %v1384_v11, %v3096_v63  ;;  %v1382_v31 = vadd.f32 %v1343_v38, %v1192_v56  ;;  %v1461_v39 = vrot.slane %v1459_v19, 7  ;;  %v1787_v28 = vrot.slane %v1462_v21, 1 }
 0x13f   : > { %v1436_v45 = vmax.f32 %v1420_v18, 0.0  ;;  %v1418_v47 = vadd.f32 %v3090_v55, %v1395_v27  ;;  %v2503_v42 = vpop.f32.mrf.mxu1  ;;  %v1471_v32 = vor.u32 %v1469_v23, %v3150_v0  ;;  %v1791_v44 = vor.u32 %v1789_v29, %v1466_v57  ;;  %v3372_v23 = vld [vmem:[#allocation4_spill] sm:$0xff] }
 0x140   : > { %v1398_v13 = vadd.f32 %v1382_v31, %v3100_v49  ;;  %v1385_v20 = vadd.f32 %v2503_v42, %v1203_v41  ;;  %v1464_v54 = vor.u32 %v1462_v21, %v1461_v39  ;;  %v1788_v26 = vor.u32 %v1787_v28, %v1459_v19 }
 0x141   : > { %v3162_v25 = vpack.c.bf16 %v1436_v45, %v1435_v43  ;;  %v1434_v10 = vmax.f32 %v1418_v47, 0.0  ;;  %v1346_v16 = vpop.f32.mrf.mxu1  ;;  %v1472_v63 = vsel %vm387_vm2, %v1461_v39, %v1471_v32  ;;  %v1423_v56 = vadd.f32 %v3090_v55, %v1400_v14 }
 0x142   : > { %v1401_v34 = vadd.f32 %v1385_v20, %v3104_v1  ;;  %v1383_v30 = vadd.f32 %v1346_v16, %v1195_v50  ;;  %v1421_v49 = vadd.f32 %v3090_v55, %v1398_v13  ;;  %v1522_v62 = vsel %vm2711_vm3, 0, %v1464_v54 }
 0x143   : > { %v1482_v58 = vshrl.u32 %v3162_v25, 16  ;;  %v1447_v60 = vpack.c.bf16 %v1434_v10, %v1433_v52  ;;  %v2506_v41 = vpop.f32.mrf.mxu1  ;;  %2512 = vmatprep.mubr.msk.bf16.mxu0 %vm1540_vm8, %v1522_v62  ;;  %v1485_v50 = vshll.u32 %v3162_v25, 16  ;;  %v3183_v6 = vsel %vm702_vm5, %v1788_v26, %v1789_v29 }
 0x144   : > { %v1424_v48 = vadd.f32 %v3090_v55, %v1401_v34  ;;  %v1399_v2 = vadd.f32 %v1383_v30, %v3108_v36  ;;  %v1388_v1 = vadd.f32 %v2506_v41, %v1216_v51  ;;  %2513 = vmatmul.mubr.msk.bf16.vlgmr.msra.gmra.mxu0 %vm1540_vm8, %v1472_v63  ;;  %v1439_v57 = vmax.f32 %v1423_v56, 0.0 }
 0x145   : > { %v1474_v5 = vshrl.u32 %v1447_v60, 16  ;;  %2536 = vmatprep.mubr.msk.bf16.mxu1 %vm1540_vm8, %v1447_v60  ;;  %v1359_v61 = vpop.f32.mrf.mxu1  ;;  %v1477_v40 = vshll.u32 %v1447_v60, 16  ;;  %v1484_v7 = vrot.slane %v1482_v58, 7  ;;  %2549 = vmatpush3.bf16.msra.mxu0 %v3372_v23  ;;  %v1437_v11 = vmax.f32 %v1421_v49, 0.0 }
 0x146   : > { %v1440_v36 = vmax.f32 %v1424_v48, 0.0  ;;  %v1422_v51 = vadd.f32 %v3090_v55, %v1399_v2  ;;  %v1386_v33 = vadd.f32 %v1359_v61, %v3143_v59  ;;  %2537 = vmatmul.mubr.msk.bf16.gmra.mxu1 %vm1540_vm8, %v3162_v25  ;;  %v1404_v8 = vadd.f32 %v1388_v1, %v3112_v12  ;;  %2550 = vmatprep.subr.bf16.mxu0 %v2600_v35  ;;  %v3373_v12 = vld [vmem:[#allocation5_spill] sm:$0xff] }
 0x147   : > { %v2507_v53 = vpop.f32.mrf.mxu1  ;;  %v1476_v3 = vrot.slane %v1474_v5, 7  ;;  %v1792_v15 = vrot.slane %v1477_v40, 1  ;;  %v1487_v17 = vor.u32 %v1485_v50, %v1484_v7  ;;  %v870_v31 = vadd.f32 %v3373_v12, %v3126_v24 }
 0x148   : > { %v1450_v19 = vpack.c.bf16 %v1440_v36, %v1439_v57  ;;  %v1438_v21 = vmax.f32 %v1422_v51, 0.0  ;;  %v1402_v18 = vadd.f32 %v1386_v33, %v3116_v9  ;;  %v1389_v27 = vadd.f32 %v2507_v53, %v3146_v4 }
 0x149   : > { %v1362_v38 = vpop.f32.mrf.mxu1  ;;  %v1479_v29 = vor.u32 %v1477_v40, %v1476_v3  ;;  %v1488_v59 = vsel %vm387_vm2, %v1476_v3, %v1487_v17  ;;  %v1793_v14 = vsel %vm702_vm5, %v1791_v44, %v1792_v15  ;;  %2551 = vmatpush3.bf16.msra.mxu0 %v2600_v35  ;;  %v1795_v43 = vrot.slane %v1485_v50, 1 }
 0x14a   : > { %v1497_v39 = vshrl.u32 %v1450_v19, 16  ;;  %v1449_v28 = vpack.c.bf16 %v1438_v21, %v1437_v11  ;;  %v1427_v45 = vadd.f32 %v3090_v55, %v1404_v8  ;;  %v1405_v47 = vadd.f32 %v1389_v27, %v3122_v22 }
 0x14b   : > { %v1387_v9 = vadd.f32 %v1362_v38, %v3154_v37  ;;  %v1480_v4 = vsel %vm387_vm2, %v3150_v0, %v1479_v29  ;;  %v1500_v52 = vshll.u32 %v1450_v19, 16  ;;  %v1425_v13 = vadd.f32 %v3090_v55, %v1402_v18 }
 0x14c   : > { %2516 = vmatprep.mubr.msk.bf16.mxu0 %vm1540_vm8, %v1480_v4  ;;  %2540 = vmatprep.mubr.msk.bf16.mxu1 %vm1540_vm8, %v1449_v28  ;;  %v1490_v42 = vshrl.u32 %v1449_v28, 16  ;;  %v1493_v32 = vshll.u32 %v1449_v28, 16  ;;  %v1499_v24 = vrot.slane %v1497_v39, 7  ;;  %v1428_v20 = vadd.f32 %v3090_v55, %v1405_v47 }
 0x14d   : > { %v1403_v54 = vadd.f32 %v1387_v9, %v870_v31  ;;  %2517 = vmatmul.mubr.msk.bf16.gmra.mxu0 %vm1540_vm8, %v1488_v59  ;;  %v1794_v22 = vor.u32 %v1792_v15, %v1474_v5  ;;  %v1443_v16 = vmax.f32 %v1427_v45, 0.0  ;;  %v1800_v60 = vrot.slane %v1500_v52, 1 }
 0x14e   : > { %2541 = vmatmul.mubr.msk.bf16.gmra.mxu1 %vm1540_vm8, %v1450_v19  ;;  %v1492_v37 = vrot.slane %v1490_v42, 7  ;;  %v1798_v0 = vrot.slane %v1493_v32, 1  ;;  %v1502_v10 = vor.u32 %v1500_v52, %v1499_v24  ;;  %v1444_v63 = vmax.f32 %v1428_v20, 0.0 }
 0x14f   : > { %v1426_v26 = vadd.f32 %v3090_v55, %v1403_v54  ;;  %v1796_v56 = vsel %vm702_vm5, %v1794_v22, %v1795_v43  ;;  %v1441_v49 = vmax.f32 %v1425_v13, 0.0  ;;  %v1802_v46 = vor.u32 %v1800_v60, %v1497_v39 }
 0x150   : > { %v1495_v34 = vor.u32 %v1493_v32, %v1492_v37  ;;  %v1503_v30 = vsel %vm387_vm2, %v1492_v37, %v1502_v10  ;;  %v1799_v44 = vor.u32 %v1798_v0, %v1490_v42  ;;  %v1452_v41 = vpack.c.bf16 %v1444_v63, %v1443_v16  ;;  %v3256_v0 = vld [vmem:[%s3328_s6] ss:$0 sm:$0xff] }
 0x151   : > { %v1442_v62 = vmax.f32 %v1426_v26, 0.0  ;;  %v1797_v15 = vor.u32 %v1795_v43, %v1482_v58 }
 0x152   : > { %v1523_v35 = vsel %vm2711_vm3, 0, %v1495_v34  ;;  %v1801_v48 = vsel %vm702_vm5, %v1799_v44, %v1800_v60  ;;  %v1513_v2 = vshrl.u32 %v1452_v41, 16  ;;  %v1516_v55 = vshll.u32 %v1452_v41, 16 }
 0x153   : > { %v1451_v1 = vpack.c.bf16 %v1442_v62, %v1441_v49  ;;  %2520 = vmatprep.mubr.msk.bf16.mxu0 %vm1540_vm8, %v1523_v35  ;;  %v1811_v11 = vsel %vm2809_vm7, %v1797_v15, 0 }
 0x154   : > { %v1515_v61 = vrot.slane %v1513_v2, 7  ;;  %v1806_v36 = vrot.slane %v1516_v55, 1 }
 0x155   : > { %v1505_v50 = vshrl.u32 %v1451_v1, 16  ;;  %2521 = vmatmul.mubr.msk.bf16.gmra.mxu0 %vm1540_vm8, %v1503_v30  ;;  %2544 = vmatprep.mubr.msk.bf16.mxu1 %vm1540_vm8, %v1451_v1  ;;  %v1508_v5 = vshll.u32 %v1451_v1, 16 }
 0x156   : > { %2545 = vmatmul.mubr.msk.bf16.gmra.mxu1 %vm1540_vm8, %v1452_v41  ;;  %v1518_v7 = vor.u32 %v1516_v55, %v1515_v61  ;;  %v1808_v19 = vor.u32 %v1806_v36, %v1513_v2 }
 0x157   : > { %v1507_v40 = vrot.slane %v1505_v50, 7  ;;  %v1803_v57 = vrot.slane %v1508_v5, 1 }
 0x159   : > { %v1510_v51 = vor.u32 %v1508_v5, %v1507_v40  ;;  %v1519_v23 = vsel %vm387_vm2, %v1507_v40, %v1518_v7  ;;  %v1804_v33 = vsel %vm702_vm5, %v1802_v46, %v1803_v57  ;;  %v1805_v8 = vor.u32 %v1803_v57, %v1505_v50 }
 0x15b   : > { %v1511_v53 = vsel %vm387_vm2, %v1499_v24, %v1510_v51  ;;  %v1807_v3 = vsel %vm702_vm5, %v1805_v8, %v1806_v36 }
 0x15c   : > { %2524 = vmatprep.mubr.msk.bf16.mxu0 %vm1540_vm8, %v1511_v53 }
 0x15d   : > { %2525 = vmatmul.mubr.msk.bf16.gmra.mxu0 %vm1540_vm8, %v1519_v23 }
 0x15e   : > { %2552 = vmatprep.mubr.msk.bf16.mxu0 %vm1540_vm8, %v3183_v6  ;;  %v1812_v6 = vsel %vm2809_vm7, %v1808_v19, 0 }
 0x165   : > { %2553 = vmatmul.mubr.msk.bf16.vlgmr.msra.gmra.mxu0 %vm1540_vm8, %v1793_v14 }
 0x166   : > { %2556 = vmatprep.mubr.msk.bf16.mxu0 %vm1540_vm8, %v1796_v56 }
 0x16d   : > { %2557 = vmatmul.mubr.msk.bf16.gmra.mxu0 %vm1540_vm8, %v1811_v11 }
 0x16e   : > { %2560 = vmatprep.mubr.msk.bf16.mxu0 %vm1540_vm8, %v1801_v48 }
 0x175   : > { %2561 = vmatmul.mubr.msk.bf16.gmra.mxu0 %vm1540_vm8, %v1804_v33 }
 0x176   : > { %2564 = vmatprep.mubr.msk.bf16.mxu0 %vm1540_vm8, %v1807_v3 }
 0x17d   : > { %2565 = vmatmul.mubr.msk.bf16.gmra.mxu0 %vm1540_vm8, %v1812_v6 }
 0x1fd   : > { %v2534_v21 = vpop.f32.mrf.mxu1 }
 0x1ff   : > { %v1724_v18 = vpop.f32.mrf.mxu1 }
 0x201   : > { %v2535_v29 = vpop.f32.mrf.mxu1 }
 0x203   : > { %v1727_v12 = vpop.f32.mrf.mxu1 }
 0x204   : > { %v2514_v25 = vpop.f32.mrf.mxu0 }
 0x205   : > { %v1733_v54 = vadd.f32 %v2534_v21, %v2514_v25 }
 0x206   : > { %v1599_v58 = vpop.f32.mrf.mxu0  ;;  %v2538_v28 = vpop.f32.mrf.mxu1 }
 0x207   : > { %v1725_v10 = vadd.f32 %v1724_v18, %v1599_v58 }
 0x208   : > { %v2515_v27 = vpop.f32.mrf.mxu0  ;;  %v1740_v47 = vpop.f32.mrf.mxu1 }
 0x209   : > { %v1736_v26 = vadd.f32 %v2535_v29, %v2515_v27 }
 0x20a   : > { %v1602_v38 = vpop.f32.mrf.mxu0  ;;  %v2539_v42 = vpop.f32.mrf.mxu1 }
 0x20b   : > { %v1728_v60 = vadd.f32 %v1727_v12, %v1602_v38 }
 0x20c   : > { %v1743_v52 = vpop.f32.mrf.mxu1 }
 0x20d   : > { %v2518_v59 = vpop.f32.mrf.mxu0 }
 0x20e   : > { %v2542_v22 = vpop.f32.mrf.mxu1  ;;  %v1749_v35 = vadd.f32 %v2538_v28, %v2518_v59 }
 0x20f   : > { %v1615_v14 = vpop.f32.mrf.mxu0 }
 0x210   : > { %v1756_v56 = vpop.f32.mrf.mxu1  ;;  %v1741_v61 = vadd.f32 %v1740_v47, %v1615_v14 }
 0x211   : > { %v2519_v31 = vpop.f32.mrf.mxu0 }
 0x212   : > { %v2543_v2 = vpop.f32.mrf.mxu1  ;;  %v1752_v51 = vadd.f32 %v2539_v42, %v2519_v31 }
 0x213   : > { %v1618_v39 = vpop.f32.mrf.mxu0 }
 0x214   : > { %v1759_v33 = vpop.f32.mrf.mxu1  ;;  %v1744_v17 = vadd.f32 %v1743_v52, %v1618_v39 }
 0x215   : > { %v2522_v43 = vpop.f32.mrf.mxu0 }
 0x216   : > { %v1765_v58 = vadd.f32 %v2542_v22, %v2522_v43  ;;  %v2546_v27 = vpop.f32.mrf.mxu1 }
 0x217   : > { %v3239_v45 = vpop.f32.mrf.mxu0 }
 0x218   : > { %v1757_v12 = vadd.f32 %v1756_v56, %v3239_v45 }
 0x219   : > { %v3241_v9 = vpop.f32.mrf.mxu0 }
 0x21a   : > { %v1768_v42 = vadd.f32 %v2543_v2, %v3241_v9 }
 0x21b   : > { %v3243_v4 = vpop.f32.mrf.mxu0 }
 0x21d   : > { %v3245_v32 = vpop.f32.mrf.mxu0 }
 0x21f   : > { %v3247_v24 = vpop.f32.mrf.mxu0 }
 0x221   : > { %v3249_v13 = vpop.f32.mrf.mxu0 }
 0x223   : > { %v3251_v20 = vpop.f32.mrf.mxu0 }
 0x225   : > { %v2554_v37 = vpop.f32.mrf.mxu0 }
 0x226   : > { %v1953_v16 = vadd.f32 %v2554_v37, %v1733_v54  ;;  %v1772_v54 = vpop.f32.mrf.mxu1 }
 0x227   : > { %v1888_v63 = vpop.f32.mrf.mxu0 }
 0x228   : > { %v1976_v34 = vadd.f32 %v3256_v0, %v1953_v16  ;;  %v1951_v30 = vadd.f32 %v1888_v63, %v1725_v10  ;;  %v1760_v16 = vadd.f32 %v1759_v33, %v3243_v4 }
 0x229   : > { %v2555_v44 = vpop.f32.mrf.mxu0 }
 0x22a   : > { %v1992_v49 = vmax.f32 %v1976_v34, 0.0  ;;  %v1974_v41 = vadd.f32 %v3256_v0, %v1951_v30  ;;  %v1954_v62 = vadd.f32 %v2555_v44, %v1736_v26  ;;  %v1781_v30 = vadd.f32 %v2546_v27, %v3245_v32 }
 0x22b   : > { %v1891_v48 = vpop.f32.mrf.mxu0 }
 0x22c   : > { %v2302_v1 = vpack.c.bf16 %v1992_v49, %v1992_v49  ;;  %v1990_v55 = vmax.f32 %v1974_v41, 0.0  ;;  %v1977_v50 = vadd.f32 %v3256_v0, %v1954_v62  ;;  %v1952_v5 = vadd.f32 %v1891_v48, %v1728_v60  ;;  %v2547_v60 = vpop.f32.mrf.mxu1 }
 0x22d   : > { %v2558_v40 = vpop.f32.mrf.mxu0 }
 0x22e   : > { %2073 = vst.msk [vmem:[%s3264_s20 + $0x8] sm:$0xf] %vm2070_vm9, %v2302_v1  ;;  %v2300_v7 = vpack.c.bf16 %v1990_v55, %v1990_v55  ;;  %v1993_v46 = vmax.f32 %v1977_v50, 0.0  ;;  %v1975_v57 = vadd.f32 %v3256_v0, %v1952_v5  ;;  %v1957_v36 = vadd.f32 %v2558_v40, %v1749_v35 }
 0x22f   : > { %v1904_v23 = vpop.f32.mrf.mxu0  ;;  %v1773_v35 = vadd.f32 %v1772_v54, %v3247_v24  ;;  %v1784_v50 = vadd.f32 %v2547_v60, %v3249_v13 }
 0x230   : > { %2071 = vst.msk [vmem:[%s3264_s20] sm:$0xf] %vm2070_vm9, %v2300_v7  ;;  %v2303_v8 = vpack.c.bf16 %v1993_v46, %v1993_v46  ;;  %v1991_v53 = vmax.f32 %v1975_v57, 0.0  ;;  %v1980_v3 = vadd.f32 %v3256_v0, %v1957_v36  ;;  %v1955_v15 = vadd.f32 %v1904_v23, %v1741_v61  ;;  %v1775_v61 = vpop.f32.mrf.mxu1 }
 0x231   : > { %v2559_v11 = vpop.f32.mrf.mxu0  ;;  %v1776_v57 = vadd.f32 %v1775_v61, %v3251_v20 }
 0x232   : > { %2074 = vst.msk [vmem:[%s3264_s20 + $0xc] sm:$0xf] %vm2070_vm9, %v2303_v8  ;;  %v2301_v19 = vpack.c.bf16 %v1991_v53, %v1991_v53  ;;  %v1996_v6 = vmax.f32 %v1980_v3, 0.0  ;;  %v1978_v21 = vadd.f32 %v3256_v0, %v1955_v15  ;;  %v1958_v25 = vadd.f32 %v2559_v11, %v1752_v51 }
 0x233   : > { %v1907_v18 = vpop.f32.mrf.mxu0 }
 0x234   : > { %2072 = vst.msk [vmem:[%s3264_s20 + $0x4] sm:$0xf] %vm2070_vm9, %v2301_v19  ;;  %v2306_v38 = vpack.c.bf16 %v1996_v6, %v1996_v6  ;;  %v1994_v29 = vmax.f32 %v1978_v21, 0.0  ;;  %v1981_v59 = vadd.f32 %v3256_v0, %v1958_v25  ;;  %v1956_v14 = vadd.f32 %v1907_v18, %v1744_v17 }
 0x235   : > { %v2562_v31 = vpop.f32.mrf.mxu0 }
 0x236   : > { %2077 = vst.msk [vmem:[%s3264_s20 + $0x18] sm:$0xf] %vm2070_vm9, %v2306_v38  ;;  %v2304_v39 = vpack.c.bf16 %v1994_v29, %v1994_v29  ;;  %v1997_v28 = vmax.f32 %v1981_v59, 0.0  ;;  %v1979_v43 = vadd.f32 %v3256_v0, %v1956_v14  ;;  %v1961_v47 = vadd.f32 %v2562_v31, %v1765_v58 }
 0x237   : > { %v1920_v52 = vpop.f32.mrf.mxu0 }
 0x238   : > { %2075 = vst.msk [vmem:[%s3264_s20 + $0x10] sm:$0xf] %vm2070_vm9, %v2304_v39  ;;  %v2307_v22 = vpack.c.bf16 %v1997_v28, %v1997_v28  ;;  %v1995_v37 = vmax.f32 %v1979_v43, 0.0  ;;  %v1984_v45 = vadd.f32 %v3256_v0, %v1961_v47  ;;  %v1959_v10 = vadd.f32 %v1920_v52, %v1757_v12 }
 0x239   : > { %v2563_v63 = vpop.f32.mrf.mxu0 }
 0x23a   : > { %2078 = vst.msk [vmem:[%s3264_s20 + $0x1c] sm:$0xf] %vm2070_vm9, %v2307_v22  ;;  %v2305_v26 = vpack.c.bf16 %v1995_v37, %v1995_v37  ;;  %v2000_v56 = vmax.f32 %v1984_v45, 0.0  ;;  %v1982_v9 = vadd.f32 %v3256_v0, %v1959_v10  ;;  %v1962_v34 = vadd.f32 %v2563_v63, %v1768_v42 }
 0x23b   : > { %v1923_v44 = vpop.f32.mrf.mxu0 }
 0x23c   : > { %2076 = vst.msk [vmem:[%s3264_s20 + $0x14] sm:$0xf] %vm2070_vm9, %v2305_v26  ;;  %v2310_v49 = vpack.c.bf16 %v2000_v56, %v2000_v56  ;;  %v1998_v41 = vmax.f32 %v1982_v9, 0.0  ;;  %v1985_v4 = vadd.f32 %v3256_v0, %v1962_v34  ;;  %v1960_v62 = vadd.f32 %v1923_v44, %v1760_v16 }
 0x23d   : > { %v2566_v48 = vpop.f32.mrf.mxu0 }
 0x23e   : > { %2081 = vst.msk [vmem:[%s3264_s20 + $0x28] sm:$0xf] %vm2070_vm9, %v2310_v49  ;;  %v2308_v2 = vpack.c.bf16 %v1998_v41, %v1998_v41  ;;  %v2001_v1 = vmax.f32 %v1985_v4, 0.0  ;;  %v1983_v32 = vadd.f32 %v3256_v0, %v1960_v62  ;;  %v1965_v55 = vadd.f32 %v2566_v48, %v1781_v30 }
 0x23f   : > { %v1936_v5 = vpop.f32.mrf.mxu0 }
 0x240   : > { %2079 = vst.msk [vmem:[%s3264_s20 + $0x20] sm:$0xf] %vm2070_vm9, %v2308_v2  ;;  %v2311_v40 = vpack.c.bf16 %v2001_v1, %v2001_v1  ;;  %v1999_v7 = vmax.f32 %v1983_v32, 0.0  ;;  %v1988_v24 = vadd.f32 %v3256_v0, %v1965_v55  ;;  %v1963_v46 = vadd.f32 %v1936_v5, %v1773_v35 }
 0x241   : > { %v2567_v36 = vpop.f32.mrf.mxu0 }
 0x242   : > { %2082 = vst.msk [vmem:[%s3264_s20 + $0x2c] sm:$0xf] %vm2070_vm9, %v2311_v40  ;;  %v2309_v51 = vpack.c.bf16 %v1999_v7, %v1999_v7  ;;  %v2004_v23 = vmax.f32 %v1988_v24, 0.0  ;;  %v1986_v13 = vadd.f32 %v3256_v0, %v1963_v46  ;;  %v1966_v33 = vadd.f32 %v2567_v36, %v1784_v50 }
 0x243   : > { %v1939_v8 = vpop.f32.mrf.mxu0 }
 0x244   : > { %2080 = vst.msk [vmem:[%s3264_s20 + $0x24] sm:$0xf] %vm2070_vm9, %v2309_v51  ;;  %v2314_v53 = vpack.c.bf16 %v2004_v23, %v2004_v23  ;;  %v2002_v3 = vmax.f32 %v1986_v13, 0.0  ;;  %v1989_v15 = vadd.f32 %v3256_v0, %v1966_v33  ;;  %v1964_v17 = vadd.f32 %v1939_v8, %v1776_v57 }
 0x246   : > { %2085 = vst.msk [vmem:[%s3264_s20 + $0x38] sm:$0xf] %vm2070_vm9, %v2314_v53  ;;  %v2312_v20 = vpack.c.bf16 %v2002_v3, %v2002_v3  ;;  %v2005_v11 = vmax.f32 %v1989_v15, 0.0  ;;  %v1987_v19 = vadd.f32 %v3256_v0, %v1964_v17 }
 0x248   : > { %2083 = vst.msk [vmem:[%s3264_s20 + $0x30] sm:$0xf] %vm2070_vm9, %v2312_v20  ;;  %v2315_v6 = vpack.c.bf16 %v2005_v11, %v2005_v11  ;;  %v2003_v21 = vmax.f32 %v1987_v19, 0.0 }
 0x24a   : > { %2086 = vst.msk [vmem:[%s3264_s20 + $0x3c] sm:$0xf] %vm2070_vm9, %v2315_v6  ;;  %v2313_v25 = vpack.c.bf16 %v2003_v21, %v2003_v21 }
 0x24c   : > { %2084 = vst.msk [vmem:[%s3264_s20 + $0x34] sm:$0xf] %vm2070_vm9, %v2313_v25 }
 0x24d PF: > { %s17_s24 = sadd.s32 1, %s2607_s24  }
 0x24e   : > { %p14_p4 = scmp.ge.s32.totalorder %s17_s24, 6  }
 0x250   :  { %16 = sbr.rel (!%p14_p4) target bundleno = 1 (0x1), region = 87 }

// kernel: conditional_unet1d.7
= control target key start
LH: loop header
LB: loop body
LE: loop exit
PB: predicated region body
PF: predicated region fallthrough
CT: control target
= control target key end

     0   :  { %s1636_s24 = smov 0   ;;  %s1831_s0 = inlined_call_operand.vmem [shape: bf16[8,16,128], index: 0, kind: input, shape index: {}]   ;;  %s1832_s1 = inlined_call_operand.vmem [shape: bf16[3,64,128], index: 1, kind: input, shape index: {}]   ;;  %s1833_s2 = inlined_call_operand.vmem [shape: f32[1,128], index: 2, kind: input, shape index: {}]   ;;  %s1834_s3 = inlined_call_operand.vmem [shape: bf16[3,128,128], index: 3, kind: input, shape index: {}]   ;;  %s1835_s4 = inlined_call_operand.vmem [shape: f32[1,128], index: 4, kind: input, shape index: {}]   ;;  %s1836_s5 = inlined_call_operand.vmem [shape: bf16[128,128], index: 5, kind: input, shape index: {}]   ;;  %s1837_s6 = inlined_call_operand.vmem [shape: f32[1,128], index: 6, kind: input, shape index: {}]   ;;  %s1838_s7 = inlined_call_operand.vmem [shape: bf16[8,16,128], index: 7, kind: output, shape index: {}]  }
   0x1 LB: > { %s1223_s25 = sadd.s32 4294967295, %s1593_s24   ;;  %p1227_p0 = scmp.ge.s32.totalorder %s1593_s24, 1  ;;  %s1593_s24 = sphi %s1636_s24, %s17_s24  }
   0x2   : > { %p239_p1 = scmp.lt.s32.totalorder %s1593_s24, 5 }
   0x4   : > { %p240_p2 = pnand %p1227_p0, %p239_p1 }
   0x5   : > { %s1228_s26 = sshll.u32 (!%p240_p2), %s1223_s25, 1  ;;  %s1595_s18 = smov (!%p240_p2), 64  }
   0x6   : > { %243 = sbr.rel (%p240_p2) target bundleno = 822 (0x336), region = 48  ;;  %p274_p3 = scmp.lt.s32.totalorder (!%p240_p2), %s1228_s26, 7 }
   0xb   : > { %v1543_v0 = vld [vmem:[%s1832_s1 + $0x38] sm:$0xff]   ;;  %v1544_v1 = vld [vmem:[%s1832_s1 + $0x30] sm:$0xff]   ;;  %s1844_s26 = smov (!%p274_p3, %s1228_s26), 7  ;;  %v1546_v4 = vld [vmem:[%s1832_s1 + $0x28] sm:$0xff]   ;;  %vm384_vm0 = vcmask 523264   ;;  %vm347_vm1 = vcmask 1040384  }
   0xc   : > { %1430 = vmatprep.subr.bf16.mxu1 %v1543_v0  ;;  %v1545_v2 = vld [vmem:[%s1832_s1 + $0x18] sm:$0xff]   ;;  %s1343_s10 = sshll.u32 %s1844_s26, 3  ;;  %v1547_v3 = vld [vmem:[%s1832_s1 + $0x10] sm:$0xff]   ;;  %v1549_v8 = vld [vmem:[%s1832_s1 + $0x8] sm:$0xff]   ;;  %vm348_vm2 = vsmask.f32 256 }
   0xd   : > { %1431 = vmatpush3.bf16.msra.mxu1 %v1543_v0  ;;  %1418 = vmatprep.subr.bf16.mxu0 %v1545_v2  ;;  %s278_s15 = scalar_lea.vmem %s1831_s0, %s1343_s10  ;;  %v1548_v10 = vld [vmem:[%s1832_s1 + $0x20] sm:$0xff]   ;;  %v1551_v12 = vld [vmem:[%s1832_s1 + $0x58] sm:$0xff]   ;;  %vm523_vm3 = vcmask 1047552   ;;  %vm524_vm4 = vsmask.f32 7424  ;;  %vm1681_vm5 = vmand %vm347_vm1, %vm348_vm2  ;;  %s285_s27 = scalar_lea.vmem %s1838_s7, %s1343_s10 }
   0xe   : > { %1432 = vmatprep.subr.bf16.mxu1 %v1544_v1  ;;  %1419 = vmatpush3.bf16.msra.mxu0 %v1545_v2  ;;  %v290_v5 = vld [vmem:[%s278_s15 + $0x8] sm:$0xf]  ;;  %v288_v6 = vld [vmem:[%s278_s15] sm:$0xf]  ;;  %v291_v7 = vld [vmem:[%s278_s15 + $0xc] sm:$0xf] }
   0xf   : > { %1420 = vmatprep.subr.bf16.mxu0 %v1547_v3  ;;  %300 = vrot.lane.b32.xlu1 %v290_v5, %s1595_s18  ;;  %v289_v9 = vld [vmem:[%s278_s15 + $0x4] sm:$0xf]  ;;  %vm1685_vm6 = vmand %vm523_vm3, %vm524_vm4  ;;  %v1552_v37 = vld [vmem:[%s1832_s1 + $0x50] sm:$0xff]  }
  0x10   : > { %296 = vrot.lane.b32.xlu0 %v288_v6, %s1595_s18  ;;  %v1550_v11 = vld [vmem:[%s1832_s1] sm:$0xff]   ;;  %v1553_v39 = vld [vmem:[%s1832_s1 + $0x48] sm:$0xff]   ;;  %v1555_v44 = vld [vmem:[%s1834_s3 + $0x78] sm:$0xff]  }
  0x11   : > { %1433 = vmatpush3.bf16.msra.mxu1 %v1544_v1  ;;  %v1554_v40 = vld [vmem:[%s1832_s1 + $0x40] sm:$0xff]   ;;  %v1556_v45 = vld [vmem:[%s1834_s3 + $0x70] sm:$0xff]   ;;  %v1557_v46 = vld [vmem:[%s1834_s3 + $0x38] sm:$0xff]  }
  0x12   : > { %1434 = vmatprep.subr.bf16.mxu1 %v1546_v4  ;;  %1421 = vmatpush3.bf16.msra.mxu0 %v1547_v3  ;;  %v1558_v47 = vld [vmem:[%s1834_s3 + $0x68] sm:$0xff]   ;;  %v1559_v48 = vld [vmem:[%s1834_s3 + $0x30] sm:$0xff]   ;;  %v1560_v49 = vld [vmem:[%s1834_s3 + $0x60] sm:$0xff]  }
  0x13   : > { %1422 = vmatprep.subr.bf16.mxu0 %v1549_v8  ;;  %302 = vrot.lane.b32.xlu1 %v291_v7, %s1595_s18  ;;  %v1561_v50 = vld [vmem:[%s1834_s3 + $0x28] sm:$0xff]   ;;  %v1562_v51 = vld [vmem:[%s1834_s3 + $0x58] sm:$0xff]   ;;  %v1563_v52 = vld [vmem:[%s1834_s3 + $0x20] sm:$0xff]  }
  0x14   : > { %298 = vrot.lane.b32.xlu0 %v289_v9, %s1595_s18  ;;  %v1564_v53 = vld [vmem:[%s1834_s3 + $0x50] sm:$0xff]   ;;  %v1565_v54 = vld [vmem:[%s1834_s3 + $0x18] sm:$0xff]   ;;  %v1566_v55 = vld [vmem:[%s1834_s3 + $0x48] sm:$0xff]  }
  0x15   : > { %1435 = vmatpush3.bf16.msra.mxu1 %v1546_v4  ;;  %v1567_v56 = vld [vmem:[%s1834_s3 + $0x10] sm:$0xff]   ;;  %v1568_v57 = vld [vmem:[%s1834_s3 + $0x40] sm:$0xff]   ;;  %v1569_v58 = vld [vmem:[%s1834_s3 + $0x8] sm:$0xff]  }
  0x16   : > { %1436 = vmatprep.subr.bf16.mxu1 %v1548_v10  ;;  %1423 = vmatpush3.bf16.msra.mxu0 %v1549_v8  ;;  %v1570_v59 = vld [vmem:[%s1834_s3] sm:$0xff]   ;;  %v1571_v60 = vld [vmem:[%s1834_s3 + $0xb8] sm:$0xff]  }
  0x17   : > { %1424 = vmatprep.subr.bf16.mxu0 %v1550_v11  ;;  %v1270_v8 = vld [vmem:[%s1833_s2] ss:$0 sm:$0xff]  ;;  %v1575_v30 = vld [vmem:[%s1834_s3 + $0x98] sm:$0xff]  }
  0x18   : > { %v1582_v34 = vld [vmem:[%s1836_s5 + $0x20] sm:$0xff]  }
  0x19   : > { %1437 = vmatpush3.bf16.msra.mxu1 %v1548_v10 }
  0x1a   : > { %1425 = vmatpush3.bf16.msra.mxu0 %v1550_v11  ;;  %1454 = vmatprep.subr.bf16.mxu1 %v1557_v46 }
  0x1b   : > { %1442 = vmatprep.subr.bf16.mxu0 %v1551_v12 }
  0x81   : > { %v301_v13 = vpop.permute.xlu1 %300 }
  0x82   : > { %v297_v14 = vpop.permute.xlu0 %296  ;;  %v310_v17 = vmax.bf16 %v301_v13, %v290_v5 }
  0x83   : > { %v308_v18 = vmax.bf16 %v297_v14, %v288_v6 }
  0x85   : > { %v303_v15 = vpop.permute.xlu1 %302 }
  0x86   : > { %v299_v16 = vpop.permute.xlu0 %298  ;;  %v311_v19 = vmax.bf16 %v303_v15, %v291_v7 }
  0x87   : > { %v309_v20 = vmax.bf16 %v299_v16, %v289_v9 }
  0x88   : > { %v1243_v21 = vcombine.low %v310_v17, %v311_v19 }
  0x89   : > { %v1242_v22 = vcombine.low %v308_v18, %v309_v20 }
  0x8a   : > { %v339_v23 = vshrl.u32 %v1243_v21, 16  ;;  %v342_v26 = vshll.u32 %v1243_v21, 16 }
  0x8b   : > { %1438 = vmatprep.mubr.msk.bf16.mxu1 %vm384_vm0, %v1242_v22  ;;  %v332_v24 = vshrl.u32 %v1242_v22, 16  ;;  %v335_v25 = vshll.u32 %v1242_v22, 16 }
  0x8c   : > { %1439 = vmatmul.mubr.msk.bf16.vlgmr.msra.gmra.mxu1 %vm384_vm0, %v1243_v21  ;;  %v341_v29 = vrot.slane %v339_v23, 7  ;;  %v519_v41 = vrot.slane %v342_v26, 1 }
  0x8d   : > { %v334_v27 = vrot.slane %v332_v24, 7  ;;  %v517_v28 = vrot.slane %v335_v25, 1  ;;  %1455 = vmatpush3.bf16.msra.mxu1 %v1557_v46  ;;  %v1576_v46 = vld [vmem:[%s1834_s3 + $0x90] sm:$0xff]  }
  0x8e   : > { %v344_v32 = vor.u32 %v342_v26, %v341_v29  ;;  %v520_v42 = vor.u32 %v519_v41, %v339_v23  ;;  %1456 = vmatprep.subr.bf16.mxu1 %v1559_v48  ;;  %v1572_v41 = vld [vmem:[%s1834_s3 + $0xb0] sm:$0xff]  }
  0x8f   : > { %v337_v31 = vor.u32 %v335_v25, %v334_v27  ;;  %v518_v33 = vor.u32 %v517_v28, %v332_v24 }
  0x90   : > { %v351_v36 = vsel %vm1681_vm5, 0, %v344_v32  ;;  %v527_v43 = vsel %vm1685_vm6, %v520_v42, 0 }
  0x91   : > { %v350_v35 = vsel %vm1681_vm5, 0, %v337_v31  ;;  %v526_v38 = vsel %vm1685_vm6, %v518_v33, 0  ;;  %1457 = vmatpush3.bf16.msra.mxu1 %v1559_v48  ;;  %v1578_v48 = vld [vmem:[%s1834_s3 + $0x80] sm:$0xff]  }
  0x92   : > { %1426 = vmatprep.mubr.msk.bf16.mxu0 %vm384_vm0, %v350_v35  ;;  %1458 = vmatprep.subr.bf16.mxu1 %v1561_v50 }
  0x93   : > { %1427 = vmatmul.mubr.msk.bf16.vlgmr.msra.gmra.mxu0 %vm384_vm0, %v351_v36 }
  0x94   : > { %1443 = vmatpush3.bf16.msra.mxu0 %v1551_v12  ;;  %1450 = vmatprep.mubr.msk.bf16.mxu0 %vm384_vm0, %v526_v38 }
  0x95   : > { %1444 = vmatprep.subr.bf16.mxu0 %v1552_v37  ;;  %1459 = vmatpush3.bf16.msra.mxu1 %v1561_v50 }
  0x96   : > { %1460 = vmatprep.subr.bf16.mxu1 %v1563_v52 }
  0x98   : > { %1445 = vmatpush3.bf16.msra.mxu0 %v1552_v37 }
  0x99   : > { %1446 = vmatprep.subr.bf16.mxu0 %v1553_v39  ;;  %1461 = vmatpush3.bf16.msra.mxu1 %v1563_v52  ;;  %v1579_v52 = vld [vmem:[%s1836_s5 + $0x38] sm:$0xff]  }
  0x9a   : > { %1462 = vmatprep.subr.bf16.mxu1 %v1565_v54 }
  0x9c   : > { %1447 = vmatpush3.bf16.msra.mxu0 %v1553_v39 }
  0x9d   : > { %1448 = vmatprep.subr.bf16.mxu0 %v1554_v40  ;;  %1463 = vmatpush3.bf16.msra.mxu1 %v1565_v54  ;;  %v1581_v54 = vld [vmem:[%s1836_s5 + $0x28] sm:$0xff]  }
  0x9e   : > { %1464 = vmatprep.subr.bf16.mxu1 %v1567_v56 }
  0xa0   : > { %1449 = vmatpush3.bf16.msra.mxu0 %v1554_v40 }
  0xa1   : > { %1474 = vmatprep.subr.bf16.mxu0 %v1555_v44  ;;  %1465 = vmatpush3.bf16.msra.mxu1 %v1567_v56  ;;  %v1584_v56 = vld [vmem:[%s1836_s5 + $0x10] sm:$0xff]  }
  0xa2   : > { %1466 = vmatprep.subr.bf16.mxu1 %v1569_v58 }
  0xa3   : > { %1451 = vmatmul.mubr.msk.bf16.vlgmr.msra.gmra.mxu0 %vm384_vm0, %v527_v43 }
  0xa4   : > { %1475 = vmatpush3.bf16.msra.mxu0 %v1555_v44  ;;  %v1573_v44 = vld [vmem:[%s1834_s3 + $0xa8] sm:$0xff]  }
  0xa5   : > { %1476 = vmatprep.subr.bf16.mxu0 %v1556_v45  ;;  %1467 = vmatpush3.bf16.msra.mxu1 %v1569_v58  ;;  %v1586_v58 = vld [vmem:[%s1836_s5] sm:$0xff]  }
  0xa6   : > { %1468 = vmatprep.subr.bf16.mxu1 %v1570_v59 }
  0xa8   : > { %1477 = vmatpush3.bf16.msra.mxu0 %v1556_v45  ;;  %v1574_v45 = vld [vmem:[%s1834_s3 + $0xa0] sm:$0xff]  }
  0xa9   : > { %1478 = vmatprep.subr.bf16.mxu0 %v1558_v47  ;;  %1469 = vmatpush3.bf16.msra.mxu1 %v1570_v59 }
  0xaa   : > { %1494 = vmatprep.subr.bf16.mxu1 %v1571_v60 }
  0xac   : > { %1479 = vmatpush3.bf16.msra.mxu0 %v1558_v47  ;;  %v1577_v47 = vld [vmem:[%s1834_s3 + $0x88] sm:$0xff]  }
  0xad   : > { %1480 = vmatprep.subr.bf16.mxu0 %v1560_v49 }
  0xb0   : > { %1481 = vmatpush3.bf16.msra.mxu0 %v1560_v49 }
  0xb1   : > { %1482 = vmatprep.subr.bf16.mxu0 %v1562_v51 }
  0xb4   : > { %1483 = vmatpush3.bf16.msra.mxu0 %v1562_v51 }
  0xb5   : > { %1484 = vmatprep.subr.bf16.mxu0 %v1564_v53 }
  0xb8   : > { %1485 = vmatpush3.bf16.msra.mxu0 %v1564_v53  ;;  %v1580_v53 = vld [vmem:[%s1836_s5 + $0x30] sm:$0xff]  }
  0xb9   : > { %1486 = vmatprep.subr.bf16.mxu0 %v1566_v55 }
  0xbc   : > { %1487 = vmatpush3.bf16.msra.mxu0 %v1566_v55  ;;  %v1583_v55 = vld [vmem:[%s1836_s5 + $0x18] sm:$0xff]  }
  0xbd   : > { %1488 = vmatprep.subr.bf16.mxu0 %v1568_v57 }
  0xc0   : > { %1489 = vmatpush3.bf16.msra.mxu0 %v1568_v57  ;;  %v1585_v57 = vld [vmem:[%s1836_s5 + $0x8] sm:$0xff]  }
  0xc1   : > { %1514 = vmatprep.subr.bf16.mxu0 %v1579_v52 }
 0x14c   : > { %v1440_v63 = vpop.f32.mrf.mxu1 }
 0x14e   : > { %v502_v1 = vpop.f32.mrf.mxu1 }
 0x150   : > { %v1441_v4 = vpop.f32.mrf.mxu1 }
 0x152   : > { %v505_v12 = vpop.f32.mrf.mxu1 }
 0x153   : > { %v1428_v61 = vpop.f32.mrf.mxu0 }
 0x154   : > { %v511_v3 = vadd.f32 %v1440_v63, %v1428_v61 }
 0x155   : > { %v425_v62 = vpop.f32.mrf.mxu0 }
 0x156   : > { %v503_v6 = vadd.f32 %v502_v1, %v425_v62 }
 0x157   : > { %v1429_v0 = vpop.f32.mrf.mxu0 }
 0x158   : > { %v514_v10 = vadd.f32 %v1441_v4, %v1429_v0 }
 0x159   : > { %v428_v2 = vpop.f32.mrf.mxu0 }
 0x15a   : > { %v506_v14 = vadd.f32 %v505_v12, %v428_v2  ;;  %v1327_v12 = vld [vmem:[%s1835_s4] ss:$0 sm:$0xff] }
 0x163   : > { %v1452_v5 = vpop.f32.mrf.mxu0 }
 0x164   : > { %v618_v7 = vadd.f32 %v1452_v5, %v511_v3 }
 0x165   : > { %v601_v9 = vpop.f32.mrf.mxu0 }
 0x166   : > { %v616_v11 = vadd.f32 %v601_v9, %v503_v6  ;;  %v629_v15 = vadd.f32 %v1270_v8, %v618_v7 }
 0x167   : > { %v1453_v13 = vpop.f32.mrf.mxu0 }
 0x168   : > { %v619_v16 = vadd.f32 %v1453_v13, %v514_v10  ;;  %v627_v18 = vadd.f32 %v1270_v8, %v616_v11  ;;  %v633_v21 = vmax.f32 %v629_v15, 0.0 }
 0x169   : > { %v604_v17 = vpop.f32.mrf.mxu0 }
 0x16a   : > { %v630_v19 = vadd.f32 %v1270_v8, %v619_v16  ;;  %v617_v20 = vadd.f32 %v604_v17, %v506_v14  ;;  %v631_v24 = vmax.f32 %v627_v18, 0.0 }
 0x16c   : > { %v634_v22 = vmax.f32 %v630_v19, 0.0  ;;  %v628_v23 = vadd.f32 %v1270_v8, %v617_v20 }
 0x16e   : > { %v636_v25 = vpack.c.bf16 %v634_v22, %v633_v21  ;;  %v632_v26 = vmax.f32 %v628_v23, 0.0 }
 0x170   : > { %v635_v27 = vpack.c.bf16 %v632_v26, %v631_v24  ;;  %v662_v28 = vshrl.u32 %v636_v25, 16  ;;  %v665_v33 = vshll.u32 %v636_v25, 16 }
 0x172   : > { %1490 = vmatprep.mubr.bf16.mxu0 %v635_v27  ;;  %v655_v29 = vshrl.u32 %v635_v27, 16  ;;  %v658_v31 = vshll.u32 %v635_v27, 16  ;;  %v664_v32 = vrot.slane %v662_v28, 7  ;;  %v884_v49 = vrot.slane %v665_v33, 1 }
 0x173   : > { %1491 = vmatmul.mubr.bf16.vlgmr.msra.gmra.mxu0 %v636_v25 }
 0x174   : > { %v657_v35 = vrot.slane %v655_v29, 7  ;;  %v882_v36 = vrot.slane %v658_v31, 1  ;;  %v667_v37 = vor.u32 %v665_v33, %v664_v32  ;;  %v885_v50 = vor.u32 %v884_v49, %v662_v28  ;;  %1515 = vmatpush3.bf16.msra.mxu0 %v1579_v52 }
 0x175   : > { %1516 = vmatprep.subr.bf16.mxu0 %v1580_v53 }
 0x176   : > { %v660_v38 = vor.u32 %v658_v31, %v657_v35  ;;  %v883_v39 = vor.u32 %v882_v36, %v655_v29  ;;  %v671_v42 = vsel %vm1681_vm5, 0, %v667_v37  ;;  %v889_v51 = vsel %vm1685_vm6, %v885_v50, 0  ;;  %v1328_v29 = vld [vmem:[%s1837_s6] ss:$0 sm:$0xff] }
 0x178   : > { %v670_v40 = vsel %vm1681_vm5, 0, %v660_v38  ;;  %v888_v43 = vsel %vm1685_vm6, %v883_v39, 0  ;;  %1517 = vmatpush3.bf16.msra.mxu0 %v1580_v53 }
 0x179   : > { %1470 = vmatprep.mubr.bf16.mxu1 %v670_v40  ;;  %1518 = vmatprep.subr.bf16.mxu0 %v1581_v54 }
 0x17a   : > { %1471 = vmatmul.mubr.bf16.vlgmr.msra.gmra.mxu1 %v671_v42 }
 0x17b   : > { %1495 = vmatpush3.bf16.msra.mxu1 %v1571_v60  ;;  %1510 = vmatprep.mubr.bf16.mxu1 %v888_v43 }
 0x17c   : > { %1496 = vmatprep.subr.bf16.mxu1 %v1572_v41  ;;  %1519 = vmatpush3.bf16.msra.mxu0 %v1581_v54 }
 0x17d   : > { %1520 = vmatprep.subr.bf16.mxu0 %v1582_v34 }
 0x17f   : > { %1497 = vmatpush3.bf16.msra.mxu1 %v1572_v41 }
 0x180   : > { %1498 = vmatprep.subr.bf16.mxu1 %v1573_v44  ;;  %1521 = vmatpush3.bf16.msra.mxu0 %v1582_v34 }
 0x181   : > { %1522 = vmatprep.subr.bf16.mxu0 %v1583_v55 }
 0x183   : > { %1499 = vmatpush3.bf16.msra.mxu1 %v1573_v44 }
 0x184   : > { %1500 = vmatprep.subr.bf16.mxu1 %v1574_v45  ;;  %1523 = vmatpush3.bf16.msra.mxu0 %v1583_v55 }
 0x185   : > { %1524 = vmatprep.subr.bf16.mxu0 %v1584_v56 }
 0x187   : > { %1501 = vmatpush3.bf16.msra.mxu1 %v1574_v45 }
 0x188   : > { %1502 = vmatprep.subr.bf16.mxu1 %v1575_v30  ;;  %1525 = vmatpush3.bf16.msra.mxu0 %v1584_v56 }
 0x189   : > { %1526 = vmatprep.subr.bf16.mxu0 %v1585_v57 }
 0x18b   : > { %1503 = vmatpush3.bf16.msra.mxu1 %v1575_v30 }
 0x18c   : > { %1504 = vmatprep.subr.bf16.mxu1 %v1576_v46  ;;  %1527 = vmatpush3.bf16.msra.mxu0 %v1585_v57 }
 0x18d   : > { %1528 = vmatprep.subr.bf16.mxu0 %v1586_v58 }
 0x18f   : > { %1505 = vmatpush3.bf16.msra.mxu1 %v1576_v46 }
 0x190   : > { %1506 = vmatprep.subr.bf16.mxu1 %v1577_v47  ;;  %1529 = vmatpush3.bf16.msra.mxu0 %v1586_v58 }
 0x193   : > { %1507 = vmatpush3.bf16.msra.mxu1 %v1577_v47 }
 0x194   : > { %1508 = vmatprep.subr.bf16.mxu1 %v1578_v48 }
 0x197   : > { %1509 = vmatpush3.bf16.msra.mxu1 %v1578_v48 }
 0x19a   : > { %1511 = vmatmul.mubr.bf16.vlgmr.msra.gmra.mxu1 %v889_v51 }
 0x233   : > { %v1492_v61 = vpop.f32.mrf.mxu0 }
 0x235   : > { %v867_v63 = vpop.f32.mrf.mxu0 }
 0x237   : > { %v1493_v1 = vpop.f32.mrf.mxu0 }
 0x239   : > { %v870_v8 = vpop.f32.mrf.mxu0 }
 0x23a   : > { %v1472_v59 = vpop.f32.mrf.mxu1 }
 0x23b   : > { %v876_v4 = vadd.f32 %v1492_v61, %v1472_v59 }
 0x23c   : > { %v770_v60 = vpop.f32.mrf.mxu1 }
 0x23d   : > { %v868_v3 = vadd.f32 %v867_v63, %v770_v60 }
 0x23e   : > { %v1473_v62 = vpop.f32.mrf.mxu1 }
 0x23f   : > { %v879_v6 = vadd.f32 %v1493_v1, %v1473_v62 }
 0x240   : > { %v773_v0 = vpop.f32.mrf.mxu1 }
 0x241   : > { %v871_v11 = vadd.f32 %v870_v8, %v773_v0 }
 0x25a   : > { %v1512_v2 = vpop.f32.mrf.mxu1 }
 0x25b   : > { %v1006_v9 = vadd.f32 %v1512_v2, %v876_v4 }
 0x25c   : > { %v989_v5 = vpop.f32.mrf.mxu1 }
 0x25d   : > { %v1004_v7 = vadd.f32 %v989_v5, %v868_v3  ;;  %v1017_v18 = vadd.f32 %v1327_v12, %v1006_v9 }
 0x25e   : > { %v1513_v10 = vpop.f32.mrf.mxu1 }
 0x25f   : > { %v1007_v13 = vadd.f32 %v1513_v10, %v879_v6  ;;  %v1015_v15 = vadd.f32 %v1327_v12, %v1004_v7  ;;  %v1021_v23 = vmax.f32 %v1017_v18, 0.0 }
 0x260   : > { %v992_v14 = vpop.f32.mrf.mxu1 }
 0x261   : > { %v1018_v16 = vadd.f32 %v1327_v12, %v1007_v13  ;;  %v1005_v17 = vadd.f32 %v992_v14, %v871_v11  ;;  %v1019_v21 = vmax.f32 %v1015_v15, 0.0 }
 0x263   : > { %v1016_v19 = vadd.f32 %v1327_v12, %v1005_v17  ;;  %v1022_v20 = vmax.f32 %v1018_v16, 0.0 }
 0x265   : > { %v1020_v22 = vmax.f32 %v1016_v19, 0.0  ;;  %v1024_v25 = vpack.c.bf16 %v1022_v20, %v1021_v23 }
 0x267   : > { %v1023_v24 = vpack.c.bf16 %v1020_v22, %v1019_v21 }
 0x269   : > { %1530 = vmatprep.mubr.bf16.mxu0 %v1023_v24 }
 0x26a   : > { %1531 = vmatmul.mubr.bf16.vlgmr.msra.gmra.mxu0 %v1024_v25 }
 0x32a   : > { %v1532_v26 = vpop.f32.mrf.mxu0 }
 0x32b   : > { %v1139_v36 = vadd.f32 %v1532_v26, %v1328_v29 }
 0x32c   : > { %v1130_v27 = vpop.f32.mrf.mxu0 }
 0x32d   : > { %v1131_v33 = vadd.f32 %v1328_v29, %v1130_v27 }
 0x32e   : > { %v1533_v28 = vpop.f32.mrf.mxu0 }
 0x32f   : > { %v1142_v31 = vadd.f32 %v1533_v28, %v1328_v29 }
 0x330   : > { %v1133_v32 = vpop.f32.mrf.mxu0 }
 0x331   : > { %v1134_v35 = vadd.f32 %v1328_v29, %v1133_v32  ;;  %v1357_v38 = vpack.c.bf16 %v1142_v31, %v1139_v36 }
 0x333   : > { %v1352_v37 = vpack.c.bf16 %v1134_v35, %v1131_v33  ;;  %1359 = vst [vmem:[%s285_s27 + $0x8] sm:$0xff] %v1357_v38  }
 0x335   : > { %1353 = vst [vmem:[%s285_s27] sm:$0xff] %v1352_v37  }
 0x336 PF: > { %s17_s24 = sadd.s32 1, %s1593_s24  }
 0x337   : > { %p14_p4 = scmp.ge.s32.totalorder %s17_s24, 6  }
 0x339   :  { %16 = sbr.rel (!%p14_p4) target bundleno = 1 (0x1), region = 82 }

// kernel: conditional_unet1d.8
= control target key start
LH: loop header
LB: loop body
LE: loop exit
PB: predicated region body
PF: predicated region fallthrough
CT: control target
= control target key end

     0   :  { %s2390_s30 = smov 0   ;;  %s2746_s0 = inlined_call_operand.vmem [shape: bf16[8,32,64], index: 0, kind: input, shape index: {}]   ;;  %s2747_s1 = inlined_call_operand.vmem [shape: bf16[8,32,64], index: 1, kind: input, shape index: {}]   ;;  %s2748_s2 = inlined_call_operand.vmem [shape: bf16[3,64,64], index: 2, kind: input, shape index: {}]   ;;  %s2749_s3 = inlined_call_operand.vmem [shape: bf16[3,64,64], index: 3, kind: input, shape index: {}]   ;;  %s2750_s4 = inlined_call_operand.vmem [shape: f32[1,64], index: 4, kind: input, shape index: {}]   ;;  %s2751_s5 = inlined_call_operand.vmem [shape: bf16[3,64,64], index: 5, kind: input, shape index: {}]   ;;  %s2752_s6 = inlined_call_operand.vmem [shape: f32[1,64], index: 6, kind: input, shape index: {}]   ;;  %s2753_s7 = inlined_call_operand.vmem [shape: bf16[64,64], index: 7, kind: input, shape index: {}]   ;;  %s2754_s8 = inlined_call_operand.vmem [shape: f32[1,64], index: 8, kind: input, shape index: {}]   ;;  %s2755_s9 = inlined_call_operand.vmem [shape: bf16[8,32,64], index: 9, kind: output, shape index: {}]  }
   0x1 LB: > { %s1862_s10 = sadd.s32 4294967295, %s2338_s30   ;;  %p1866_p0 = scmp.ge.s32.totalorder %s2338_s30, 1  ;;  %s2338_s30 = sphi %s2390_s30, %s19_s30  }
   0x2   : > { %p301_p1 = scmp.lt.s32.totalorder %s2338_s30, 5 }
   0x4   : > { %p302_p2 = pnand %p1866_p0, %p301_p1 }
   0x5   : > { %s1867_s13 = sshll.u32 (!%p302_p2), %s1862_s10, 1 }
   0x6   : > { %305 = sbr.rel (%p302_p2) target bundleno = 716 (0x2cc), region = 56  ;;  %p346_p3 = scmp.lt.s32.totalorder (!%p302_p2), %s1867_s13, 7 }
   0xb   : > { %v2284_v0 = vld [vmem:[%s2748_s2 + $0x18] sm:$0xff]   ;;  %v2286_v2 = vld [vmem:[%s2748_s2 + $0x10] sm:$0xff]   ;;  %s2761_s13 = smov (!%p346_p3, %s1867_s13), 7  ;;  %v2288_v4 = vld [vmem:[%s2748_s2 + $0x8] sm:$0xff]   ;;  %vm481_vm0 = vcmask 523264   ;;  %vm445_vm1 = vcmask 1040384  }
   0xc   : > { %v2285_v1 = vld [vmem:[%s2748_s2 + $0x38] sm:$0xff]   ;;  %2116 = vmatprep.subr.bf16.mxu0 %v2284_v0  ;;  %v2287_v3 = vld [vmem:[%s2748_s2 + $0x30] sm:$0xff]   ;;  %v2289_v5 = vld [vmem:[%s2748_s2 + $0x28] sm:$0xff]   ;;  %s2416_s24 = sshll.u32 %s2761_s13, 4  ;;  %vm412_vm2 = vsmask.f32 256 }
   0xd   : > { %2132 = vmatprep.subr.bf16.mxu1 %v2285_v1  ;;  %2117 = vmatpush3.bf16.msra.mxu0 %v2284_v0  ;;  %v2290_v6 = vld [vmem:[%s2748_s2] sm:$0xff]   ;;  %s2425_s29 = scalar_lea.vmem %s2746_s0, %s2416_s24  ;;  %vm2436_vm3 = vmand %vm445_vm1, %vm412_vm2  ;;  %v2294_v16 = vld [vmem:[%s2748_s2 + $0x58] sm:$0xff]   ;;  %vm669_vm4 = vcmask 1047552   ;;  %s2472_s22 = scalar_lea.vmem %s2747_s1, %s2416_s24  ;;  %vm656_vm5 = vsmask.f32 7424  ;;  %vm1783_vm7 = vcmask 519168  }
   0xe   : > { %2133 = vmatpush3.bf16.msra.mxu1 %v2285_v1  ;;  %2118 = vmatprep.subr.bf16.mxu0 %v2286_v2  ;;  %v2291_v7 = vld [vmem:[%s2748_s2 + $0x20] sm:$0xff]   ;;  %v2433_v11 = vld [vmem:[%s2425_s29 + $0x8] sm:$0xff]   ;;  %v2295_v17 = vld [vmem:[%s2749_s3 + $0x18] sm:$0xff]   ;;  %s2725_s11 = scalar_lea.vmem %s2755_s9, %s2416_s24 }
   0xf   : > { %2134 = vmatprep.subr.bf16.mxu1 %v2287_v3  ;;  %v2292_v8 = vld [vmem:[%s2425_s29] sm:$0xff]   ;;  %v421_v14 = vshrl.u32 %v2433_v11, 16  ;;  %v424_v15 = vshll.u32 %v2433_v11, 16  ;;  %v2296_v20 = vld [vmem:[%s2748_s2 + $0x50] sm:$0xff]   ;;  %v2463_v25 = vld [vmem:[%s2425_s29 + $0x18] sm:$0xff]  }
  0x10   : > { %v414_v9 = vshrl.u32 %v2292_v8, 16  ;;  %v417_v10 = vshll.u32 %v2292_v8, 16  ;;  %2140 = vmatprep.mubr.msk.bf16.mxu1 %vm481_vm0, %v2292_v8  ;;  %v2297_v21 = vld [vmem:[%s2749_s3 + $0x10] sm:$0xff]   ;;  %v436_v30 = vshrl.u32 %v2463_v25, 16  ;;  %v439_v31 = vshll.u32 %v2463_v25, 16  ;;  %v2300_v33 = vld [vmem:[%s2748_s2 + $0x48] sm:$0xff]   ;;  %vm2511_vm6 = vmand %vm669_vm4, %vm656_vm5 }
  0x11   : > { %2119 = vmatpush3.bf16.msra.mxu0 %v2286_v2  ;;  %v423_v19 = vrot.slane %v421_v14, 7  ;;  %v2459_v24 = vld [vmem:[%s2425_s29 + $0x10] sm:$0xff]   ;;  %v2301_v34 = vld [vmem:[%s2749_s3 + $0x8] sm:$0xff]   ;;  %v659_v35 = vrot.slane %v424_v15, 1  ;;  %v2488_v37 = vld [vmem:[%s2472_s22] sm:$0xff]  }
  0x12   : > { %2135 = vmatpush3.bf16.msra.mxu1 %v2287_v3  ;;  %2120 = vmatprep.subr.bf16.mxu0 %v2288_v4  ;;  %v416_v12 = vrot.slane %v414_v9, 7  ;;  %v657_v26 = vrot.slane %v417_v10, 1  ;;  %v429_v28 = vshrl.u32 %v2459_v24, 16  ;;  %v432_v29 = vshll.u32 %v2459_v24, 16  ;;  %v2302_v44 = vld [vmem:[%s2748_s2 + $0x40] sm:$0xff]   ;;  %v2500_v45 = vld [vmem:[%s2472_s22 + $0x8] sm:$0xff]  }
  0x13   : > { %2136 = vmatprep.subr.bf16.mxu1 %v2289_v5  ;;  %v426_v23 = vor.u32 %v424_v15, %v423_v19  ;;  %v438_v36 = vrot.slane %v436_v30, 7  ;;  %v821_v41 = vshrl.u32 %v2488_v37, 16  ;;  %v824_v42 = vshll.u32 %v2488_v37, 16  ;;  %v2303_v47 = vld [vmem:[%s2749_s3] sm:$0xff]   ;;  %v2306_v55 = vld [vmem:[%s2749_s3 + $0x38] sm:$0xff]   ;;  %v2532_v60 = vld [vmem:[%s2472_s22 + $0x10] sm:$0xff]  }
  0x14   : > { %v419_v18 = vor.u32 %v417_v10, %v416_v12  ;;  %v431_v32 = vrot.slane %v429_v28, 7  ;;  %v658_v40 = vor.u32 %v657_v26, %v414_v9  ;;  %v662_v49 = vrot.slane %v432_v29, 1  ;;  %v2307_v58 = vld [vmem:[%s2749_s3 + $0x58] sm:$0xff]   ;;  %v2309_v9 = vld [vmem:[%s2749_s3 + $0x50] sm:$0xff]   ;;  %v2331_v50 = vld [vmem:[%s2753_s7] sm:$0xff]  }
  0x15   : > { %2121 = vmatpush3.bf16.msra.mxu0 %v2288_v4  ;;  %v427_v27 = vsel %vm412_vm2, %v416_v12, %v426_v23  ;;  %v441_v39 = vor.u32 %v439_v31, %v438_v36  ;;  %v823_v48 = vrot.slane %v821_v41, 7  ;;  %v828_v51 = vshrl.u32 %v2500_v45, 16  ;;  %v2537_v62 = vld [vmem:[%s2472_s22 + $0x18] sm:$0xff]   ;;  %v2314_v23 = vld [vmem:[%s2749_s3 + $0x20] sm:$0xff]   ;;  %v2317_v36 = vld [vmem:[%s2751_s5 + $0x30] sm:$0xff]  }
  0x16   : > { %2137 = vmatpush3.bf16.msra.mxu1 %v2289_v5  ;;  %2122 = vmatprep.subr.bf16.mxu0 %v2290_v6  ;;  %v447_v22 = vsel %vm2436_vm3, 0, %v419_v18  ;;  %v434_v38 = vor.u32 %v432_v29, %v431_v32  ;;  %v831_v52 = vshll.u32 %v2500_v45, 16  ;;  %v660_v53 = vsel %vm656_vm5, %v658_v40, %v659_v35  ;;  %v2321_v40 = vld [vmem:[%s2751_s5 + $0x20] sm:$0xff]  }
  0x17   : > { %2138 = vmatprep.subr.bf16.mxu1 %v2291_v7  ;;  %2124 = vmatprep.mubr.msk.bf16.mxu0 %vm481_vm0, %v447_v22  ;;  %v442_v46 = vsel %vm412_vm2, %v431_v32, %v441_v39  ;;  %v826_v54 = vor.u32 %v824_v42, %v823_v48  ;;  %v661_v56 = vor.u32 %v659_v35, %v421_v14  ;;  %v830_v57 = vrot.slane %v828_v51, 7  ;;  %v2316_v35 = vld [vmem:[%s2751_s5 + $0x38] sm:$0xff]   ;;  %v2320_v39 = vld [vmem:[%s2751_s5 + $0x10] sm:$0xff]  }
  0x18   : > { %v448_v43 = vsel %vm2436_vm3, 0, %v434_v38  ;;  %v664_v59 = vrot.slane %v439_v31, 1  ;;  %v836_v0 = vshrl.u32 %v2532_v60, 16  ;;  %v839_v1 = vshll.u32 %v2532_v60, 16  ;;  %v2319_v38 = vld [vmem:[%s2751_s5 + $0x28] sm:$0xff]  }
  0x19   : > { %2123 = vmatpush3.bf16.msra.mxu0 %v2290_v6  ;;  %v852_v61 = vsel %vm2436_vm3, 0, %v826_v54  ;;  %v833_v63 = vor.u32 %v831_v52, %v830_v57  ;;  %v663_v2 = vor.u32 %v662_v49, %v429_v28  ;;  %v843_v3 = vshrl.u32 %v2537_v62, 16  ;;  %v2308_v6 = vld [vmem:[%s2749_s3 + $0x30] sm:$0xff]  }
  0x1a   : > { %2139 = vmatpush3.bf16.msra.mxu1 %v2291_v7  ;;  %2148 = vmatprep.subr.bf16.mxu0 %v2294_v16  ;;  %v671_v4 = vsel %vm2511_vm6, %v661_v56, 0  ;;  %v838_v7 = vrot.slane %v836_v0, 7  ;;  %v846_v8 = vshll.u32 %v2537_v62, 16  ;;  %v666_v14 = vor.u32 %v664_v59, %v436_v30 }
  0x1b   : > { %2164 = vmatprep.subr.bf16.mxu1 %v2295_v17  ;;  %v834_v5 = vsel %vm412_vm2, %v823_v48, %v833_v63  ;;  %v845_v10 = vrot.slane %v843_v3, 7  ;;  %v665_v15 = vsel %vm656_vm5, %v663_v2, %v664_v59  ;;  %v1062_v22 = vrot.slane %v831_v52, 1 }
  0x1c   : > { %2125 = vmatmul.mubr.msk.bf16.vlgmr.msra.gmra.mxu0 %vm481_vm0, %v427_v27  ;;  %v841_v12 = vor.u32 %v839_v1, %v838_v7  ;;  %v1067_v26 = vrot.slane %v846_v8, 1 }
  0x1d   : > { %2141 = vmatmul.mubr.msk.bf16.vlgmr.msra.gmra.mxu1 %vm481_vm0, %v2433_v11  ;;  %2149 = vmatpush3.bf16.msra.mxu0 %v2294_v16  ;;  %v1060_v11 = vrot.slane %v824_v42, 1  ;;  %v1065_v16 = vrot.slane %v839_v1, 1  ;;  %v848_v19 = vor.u32 %v846_v8, %v845_v10  ;;  %v1064_v29 = vor.u32 %v1062_v22, %v828_v51  ;;  %v2323_v42 = vld [vmem:[%s2751_s5] sm:$0xff]  }
  0x1e   : > { %2165 = vmatpush3.bf16.msra.mxu1 %v2295_v17  ;;  %2150 = vmatprep.subr.bf16.mxu0 %v2296_v20  ;;  %v2312_v17 = vld [vmem:[%s2749_s3 + $0x28] sm:$0xff]   ;;  %v853_v18 = vsel %vm2436_vm3, 0, %v841_v12 }
  0x1f   : > { %2166 = vmatprep.subr.bf16.mxu1 %v2297_v21  ;;  %2144 = vmatprep.mubr.msk.bf16.mxu1 %vm481_vm0, %v2459_v24  ;;  %v2315_v24 = vld [vmem:[%s2749_s3 + $0x40] sm:$0xff]   ;;  %v849_v27 = vsel %vm412_vm2, %v838_v7, %v848_v19  ;;  %v1066_v30 = vor.u32 %v1065_v16, %v836_v0  ;;  %v1072_v31 = vsel %vm2511_vm6, %v1064_v29, 0 }
  0x20   : > { %2128 = vmatprep.mubr.msk.bf16.mxu0 %vm481_vm0, %v448_v43  ;;  %v2629_v43 = vld [vmem:[%s2751_s5 + $0x58] sm:$0xff]   ;;  %v2645_v29 = vld [vmem:[%s2750_s4] ss:$0 sm:$0xff] }
  0x21   : > { %2151 = vmatpush3.bf16.msra.mxu0 %v2296_v20  ;;  %v2313_v20 = vld [vmem:[%s2749_s3 + $0x48] sm:$0xff]   ;;  %v1068_v32 = vsel %vm656_vm5, %v1066_v30, %v1067_v26 }
  0x22   : > { %2167 = vmatpush3.bf16.msra.mxu1 %v2297_v21  ;;  %2152 = vmatprep.subr.bf16.mxu0 %v2300_v33  ;;  %v672_v21 = vsel %vm2511_vm6, %v666_v14, 0 }
  0x23   : > { %2168 = vmatprep.subr.bf16.mxu1 %v2301_v34 }
  0x24   : > { %2129 = vmatmul.mubr.msk.bf16.gmra.mxu0 %vm481_vm0, %v442_v46 }
  0x25   : > { %2145 = vmatmul.mubr.msk.bf16.gmra.mxu1 %vm481_vm0, %v2463_v25  ;;  %2153 = vmatpush3.bf16.msra.mxu0 %v2300_v33  ;;  %v1061_v25 = vor.u32 %v1060_v11, %v821_v41  ;;  %v1069_v33 = vor.u32 %v1067_v26, %v843_v3  ;;  %v2322_v41 = vld [vmem:[%s2751_s5 + $0x8] sm:$0xff]  }
  0x26   : > { %2169 = vmatpush3.bf16.msra.mxu1 %v2301_v34  ;;  %2154 = vmatprep.subr.bf16.mxu0 %v2302_v44 }
  0x27   : > { %2170 = vmatprep.subr.bf16.mxu1 %v2303_v47  ;;  %2156 = vmatprep.mubr.msk.bf16.mxu0 %vm481_vm0, %v660_v53  ;;  %v1063_v28 = vsel %vm656_vm5, %v1061_v25, %v1062_v22  ;;  %v1073_v34 = vsel %vm2511_vm6, %v1069_v33, 0 }
  0x28   : > { %2172 = vmatprep.mubr.msk.bf16.mxu1 %vm481_vm0, %v852_v61 }
  0x29   : > { %2155 = vmatpush3.bf16.msra.mxu0 %v2302_v44 }
  0x2a   : > { %2171 = vmatpush3.bf16.msra.mxu1 %v2303_v47  ;;  %2180 = vmatprep.subr.bf16.mxu0 %v2306_v55 }
  0x2b   : > { %2196 = vmatprep.subr.bf16.mxu1 %v2307_v58 }
  0x2c   : > { %2157 = vmatmul.mubr.msk.bf16.vlgmr.msra.gmra.mxu0 %vm481_vm0, %v671_v4 }
  0x2d   : > { %2173 = vmatmul.mubr.msk.bf16.vlgmr.msra.gmra.mxu1 %vm481_vm0, %v834_v5  ;;  %2181 = vmatpush3.bf16.msra.mxu0 %v2306_v55 }
  0x2e   : > { %2197 = vmatpush3.bf16.msra.mxu1 %v2307_v58  ;;  %2182 = vmatprep.subr.bf16.mxu0 %v2308_v6 }
  0x2f   : > { %2198 = vmatprep.subr.bf16.mxu1 %v2309_v9  ;;  %2160 = vmatprep.mubr.msk.bf16.mxu0 %vm481_vm0, %v665_v15 }
  0x30   : > { %2176 = vmatprep.mubr.msk.bf16.mxu1 %vm481_vm0, %v853_v18 }
  0x31   : > { %2183 = vmatpush3.bf16.msra.mxu0 %v2308_v6 }
  0x32   : > { %2199 = vmatpush3.bf16.msra.mxu1 %v2309_v9  ;;  %2184 = vmatprep.subr.bf16.mxu0 %v2312_v17 }
  0x33   : > { %2200 = vmatprep.subr.bf16.mxu1 %v2313_v20 }
  0x34   : > { %2161 = vmatmul.mubr.msk.bf16.gmra.mxu0 %vm481_vm0, %v672_v21 }
  0x35   : > { %2177 = vmatmul.mubr.msk.bf16.gmra.mxu1 %vm481_vm0, %v849_v27  ;;  %2185 = vmatpush3.bf16.msra.mxu0 %v2312_v17 }
  0x36   : > { %2201 = vmatpush3.bf16.msra.mxu1 %v2313_v20  ;;  %2186 = vmatprep.subr.bf16.mxu0 %v2314_v23 }
  0x37   : > { %2202 = vmatprep.subr.bf16.mxu1 %v2315_v24  ;;  %2188 = vmatprep.mubr.msk.bf16.mxu0 %vm481_vm0, %v2488_v37  ;;  %v2318_v37 = vld [vmem:[%s2751_s5 + $0x18] sm:$0xff]  }
  0x38   : > { %2204 = vmatprep.mubr.msk.bf16.mxu1 %vm481_vm0, %v1063_v28 }
  0x39   : > { %2187 = vmatpush3.bf16.msra.mxu0 %v2314_v23 }
  0x3a   : > { %2203 = vmatpush3.bf16.msra.mxu1 %v2315_v24  ;;  %2212 = vmatprep.subr.bf16.mxu0 %v2318_v37 }
  0x3b   : > { %2228 = vmatprep.subr.bf16.mxu1 %v2316_v35 }
  0x3c   : > { %2189 = vmatmul.mubr.msk.bf16.vlgmr.msra.gmra.mxu0 %vm481_vm0, %v2500_v45 }
  0x3d   : > { %2205 = vmatmul.mubr.msk.bf16.vlgmr.msra.gmra.mxu1 %vm481_vm0, %v1072_v31  ;;  %2192 = vmatprep.mubr.msk.bf16.mxu0 %vm481_vm0, %v2532_v60 }
  0x3e   : > { %2208 = vmatprep.mubr.msk.bf16.mxu1 %vm481_vm0, %v1068_v32  ;;  %2229 = vmatpush3.bf16.msra.mxu1 %v2316_v35 }
  0x3f   : > { %2230 = vmatprep.subr.bf16.mxu1 %v2317_v36  ;;  %2213 = vmatpush3.bf16.msra.mxu0 %v2318_v37 }
  0x40   : > { %2214 = vmatprep.subr.bf16.mxu0 %v2320_v39 }
  0x42   : > { %2231 = vmatpush3.bf16.msra.mxu1 %v2317_v36 }
  0x43   : > { %2232 = vmatprep.subr.bf16.mxu1 %v2319_v38  ;;  %2215 = vmatpush3.bf16.msra.mxu0 %v2320_v39 }
  0x44   : > { %2193 = vmatmul.mubr.msk.bf16.gmra.mxu0 %vm481_vm0, %v2537_v62  ;;  %2216 = vmatprep.subr.bf16.mxu0 %v2322_v41 }
  0x45   : > { %2209 = vmatmul.mubr.msk.bf16.gmra.mxu1 %vm481_vm0, %v1073_v34 }
  0x46   : > { %2233 = vmatpush3.bf16.msra.mxu1 %v2319_v38 }
  0x47   : > { %2234 = vmatprep.subr.bf16.mxu1 %v2321_v40  ;;  %2217 = vmatpush3.bf16.msra.mxu0 %v2322_v41 }
  0x48   : > { %2218 = vmatprep.subr.bf16.mxu0 %v2323_v42 }
  0x4a   : > { %2235 = vmatpush3.bf16.msra.mxu1 %v2321_v40 }
  0x4b   : > { %2219 = vmatpush3.bf16.msra.mxu0 %v2323_v42 }
  0x4c   : > { %2244 = vmatprep.subr.bf16.mxu0 %v2629_v43 }
  0xdc   : > { %v2126_v44 = vpop.f32.mrf.mxu0 }
  0xdd   : > { %v2142_v45 = vpop.f32.mrf.mxu1 }
  0xde   : > { %v528_v46 = vpop.f32.mrf.mxu0  ;;  %v634_v16 = vadd.f32 %v2142_v45, %v2126_v44 }
  0xdf   : > { %v625_v47 = vpop.f32.mrf.mxu1 }
  0xe0   : > { %v2127_v48 = vpop.f32.mrf.mxu0  ;;  %v626_v20 = vadd.f32 %v625_v47, %v528_v46 }
  0xe1   : > { %v2143_v49 = vpop.f32.mrf.mxu1 }
  0xe2   : > { %v531_v51 = vpop.f32.mrf.mxu0  ;;  %v637_v24 = vadd.f32 %v2143_v49, %v2127_v48 }
  0xe3   : > { %v628_v52 = vpop.f32.mrf.mxu1 }
  0xe4   : > { %v2130_v53 = vpop.f32.mrf.mxu0  ;;  %v629_v32 = vadd.f32 %v628_v52, %v531_v51 }
  0xe5   : > { %v2146_v54 = vpop.f32.mrf.mxu1 }
  0xe6   : > { %v544_v55 = vpop.f32.mrf.mxu0  ;;  %v650_v46 = vadd.f32 %v2146_v54, %v2130_v53 }
  0xe7   : > { %v641_v56 = vpop.f32.mrf.mxu1 }
  0xe8   : > { %v2632_v57 = vpop.f32.mrf.mxu0 }
  0xe9   : > { %v2634_v58 = vpop.f32.mrf.mxu1 }
  0xea   : > { %v2636_v59 = vpop.f32.mrf.mxu0  ;;  %v653_v54 = vadd.f32 %v2634_v58, %v2632_v57 }
  0xeb   : > { %v2638_v60 = vpop.f32.mrf.mxu1 }
  0xec   : > { %v2158_v61 = vpop.f32.mrf.mxu0 }
  0xed   : > { %v2174_v62 = vpop.f32.mrf.mxu1  ;;  %v785_v21 = vadd.f32 %v2158_v61, %v634_v16 }
  0xee   : > { %v752_v63 = vpop.f32.mrf.mxu0 }
  0xef   : > { %v932_v0 = vpop.f32.mrf.mxu1  ;;  %v783_v27 = vadd.f32 %v752_v63, %v626_v20  ;;  %v642_v63 = vadd.f32 %v641_v56, %v544_v55 }
  0xf0   : > { %v2159_v1 = vpop.f32.mrf.mxu0 }
  0xf1   : > { %v2175_v2 = vpop.f32.mrf.mxu1  ;;  %v786_v35 = vadd.f32 %v2159_v1, %v637_v24 }
  0xf2   : > { %v755_v3 = vpop.f32.mrf.mxu0 }
  0xf3   : > { %v935_v4 = vpop.f32.mrf.mxu1  ;;  %v784_v42 = vadd.f32 %v755_v3, %v629_v32 }
  0xf4   : > { %v2162_v5 = vpop.f32.mrf.mxu0 }
  0xf5   : > { %v2178_v6 = vpop.f32.mrf.mxu1 }
  0xf6   : > { %v768_v7 = vpop.f32.mrf.mxu0 }
  0xf7   : > { %v948_v8 = vpop.f32.mrf.mxu1 }
  0xf8   : > { %v2163_v9 = vpop.f32.mrf.mxu0 }
  0xf9   : > { %v2179_v10 = vpop.f32.mrf.mxu1 }
  0xfa   : > { %v2640_v11 = vpop.f32.mrf.mxu0 }
  0xfb   : > { %v951_v12 = vpop.f32.mrf.mxu1 }
  0xfc   : > { %v2190_v14 = vpop.f32.mrf.mxu0 }
  0xfd   : > { %v2206_v15 = vpop.f32.mrf.mxu1  ;;  %v1038_v17 = vadd.f32 %v2190_v14, %v2174_v62 }
  0xfe   : > { %v1029_v18 = vpop.f32.mrf.mxu0 }
  0xff   : > { %v1153_v19 = vpop.f32.mrf.mxu1  ;;  %v1186_v22 = vadd.f32 %v2206_v15, %v1038_v17  ;;  %v1030_v23 = vadd.f32 %v1029_v18, %v932_v0  ;;  %v789_v0 = vadd.f32 %v2162_v5, %v650_v46  ;;  %v645_v5 = vadd.f32 %v2638_v60, %v2636_v59 }
 0x100   : > { %v2191_v25 = vpop.f32.mrf.mxu0 }
 0x101   : > { %v2207_v26 = vpop.f32.mrf.mxu1  ;;  %v1194_v28 = vadd.f32 %v1186_v22, %v785_v21  ;;  %v1184_v30 = vadd.f32 %v1153_v19, %v1030_v23  ;;  %v1041_v31 = vadd.f32 %v2191_v25, %v2175_v2  ;;  %v788_v57 = vadd.f32 %v2640_v11, %v645_v5 }
 0x102   : > { %v1032_v33 = vpop.f32.mrf.mxu0 }
 0x103   : > { %v1156_v34 = vpop.f32.mrf.mxu1  ;;  %v1192_v36 = vadd.f32 %v1184_v30, %v783_v27  ;;  %v1187_v37 = vadd.f32 %v2207_v26, %v1041_v31  ;;  %v1033_v38 = vadd.f32 %v1032_v33, %v935_v4  ;;  %v1209_v39 = vadd.f32 %v2645_v29, %v1194_v28 }
 0x104   : > { %v2194_v40 = vpop.f32.mrf.mxu0 }
 0x105   : > { %v2210_v41 = vpop.f32.mrf.mxu1  ;;  %v1195_v44 = vadd.f32 %v1187_v37, %v786_v35  ;;  %v1185_v45 = vadd.f32 %v1156_v34, %v1033_v38  ;;  %v1054_v47 = vadd.f32 %v2194_v40, %v2178_v6  ;;  %v1207_v61 = vadd.f32 %v2645_v29, %v1192_v36 }
 0x106   : > { %v1045_v48 = vpop.f32.mrf.mxu0  ;;  %v1217_v1 = vmax.f32 %v1209_v39, 0.0  ;;  %v787_v6 = vadd.f32 %v768_v7, %v642_v63  ;;  %v2325_v39 = vld [vmem:[%s2751_s5 + $0x50] sm:$0xff]   ;;  %v2327_v63 = vld [vmem:[%s2751_s5 + $0x40] sm:$0xff]  }
 0x107   : > { %v1169_v49 = vpop.f32.mrf.mxu1  ;;  %v1210_v51 = vadd.f32 %v2645_v29, %v1195_v44  ;;  %v1193_v52 = vadd.f32 %v1185_v45, %v784_v42  ;;  %v1046_v62 = vadd.f32 %v1045_v48, %v948_v8  ;;  %v1190_v2 = vadd.f32 %v2210_v41, %v1054_v47  ;;  %v2326_v47 = vld [vmem:[%s2751_s5 + $0x48] sm:$0xff]  }
 0x108   : > { %v2195_v4 = vpop.f32.mrf.mxu0  ;;  %v1215_v19 = vmax.f32 %v1207_v61, 0.0  ;;  %v790_v8 = vadd.f32 %v2163_v9, %v653_v54  ;;  %v2328_v54 = vld [vmem:[%s2753_s7 + $0x18] sm:$0xff]  }
 0x109   : > { %v1218_v14 = vmax.f32 %v1210_v51, 0.0  ;;  %v1208_v3 = vadd.f32 %v2645_v29, %v1193_v52  ;;  %v1188_v15 = vadd.f32 %v1169_v49, %v1046_v62  ;;  %v1057_v16 = vadd.f32 %v2195_v4, %v2179_v10  ;;  %v2211_v53 = vpop.f32.mrf.mxu1  ;;  %2260 = vmatprep.subr.bf16.mxu1 %v2328_v54 }
 0x10a   : > { %v1198_v17 = vadd.f32 %v1190_v2, %v789_v0  ;;  %v1048_v18 = vpop.f32.mrf.mxu0 }
 0x10b   : > { %v2653_v20 = vpack.c.bf16 %v1218_v14, %v1217_v1  ;;  %v1216_v55 = vmax.f32 %v1208_v3, 0.0  ;;  %v1191_v56 = vadd.f32 %v2211_v53, %v1057_v16  ;;  %v1196_v21 = vadd.f32 %v1188_v15, %v787_v6  ;;  %v1172_v24 = vpop.f32.mrf.mxu1  ;;  %v2329_v6 = vld [vmem:[%s2753_s7 + $0x10] sm:$0xff]  }
 0x10c   : > { %v1049_v22 = vadd.f32 %v1048_v18, %v951_v12  ;;  %v1213_v58 = vadd.f32 %v2645_v29, %v1198_v17  ;;  %v2330_v17 = vld [vmem:[%s2753_s7 + $0x8] sm:$0xff]  }
 0x10d   : > { %v1244_v10 = vshrl.u32 %v2653_v20, 16  ;;  %v1223_v23 = vpack.c.bf16 %v1216_v55, %v1215_v19  ;;  %v1199_v7 = vadd.f32 %v1191_v56, %v790_v8  ;;  %v1247_v28 = vshll.u32 %v2653_v20, 16 }
 0x10e   : > { %v1189_v25 = vadd.f32 %v1172_v24, %v1049_v22  ;;  %v1211_v59 = vadd.f32 %v2645_v29, %v1196_v21  ;;  %v1221_v30 = vmax.f32 %v1213_v58, 0.0 }
 0x10f   : > { %v1246_v26 = vrot.slane %v1244_v10, 7  ;;  %2236 = vmatprep.mubr.msk.bf16.mxu1 %vm481_vm0, %v1223_v23  ;;  %v1237_v27 = vshrl.u32 %v1223_v23, 16  ;;  %v1214_v60 = vadd.f32 %v2645_v29, %v1199_v7  ;;  %v1240_v11 = vshll.u32 %v1223_v23, 16 }
 0x110   : > { %v1197_v9 = vadd.f32 %v1189_v25, %v788_v57  ;;  %2237 = vmatmul.mubr.msk.bf16.vlgmr.msra.gmra.mxu1 %vm481_vm0, %v2653_v20  ;;  %v1219_v35 = vmax.f32 %v1211_v59, 0.0  ;;  %v1478_v62 = vrot.slane %v1247_v28, 1 }
 0x111   : > { %v1239_v12 = vrot.slane %v1237_v27, 7  ;;  %v1222_v31 = vmax.f32 %v1214_v60, 0.0  ;;  %v1249_v33 = vor.u32 %v1247_v28, %v1246_v26  ;;  %2261 = vmatpush3.bf16.msra.mxu1 %v2328_v54 }
 0x112   : > { %v1212_v32 = vadd.f32 %v2645_v29, %v1197_v9  ;;  %v1476_v29 = vrot.slane %v1240_v11, 1  ;;  %v1480_v13 = vor.u32 %v1478_v62, %v1244_v10  ;;  %2262 = vmatprep.subr.bf16.mxu1 %v2329_v6 }
 0x113   : > { %v1242_v34 = vor.u32 %v1240_v11, %v1239_v12  ;;  %v1226_v36 = vpack.c.bf16 %v1222_v31, %v1221_v30  ;;  %v1250_v42 = vsel %vm412_vm2, %v1239_v12, %v1249_v33  ;;  %v2005_v11 = vld [vmem:[%s2752_s6] ss:$0 sm:$0xff] }
 0x114   : > { %v1220_v37 = vmax.f32 %v1212_v32, 0.0  ;;  %v1477_v52 = vor.u32 %v1476_v29, %v1237_v27  ;;  %v1488_v3 = vsel %vm2511_vm6, %v1480_v13, 0 }
 0x115   : > { %v1268_v38 = vsel %vm2436_vm3, 0, %v1242_v34  ;;  %v1259_v40 = vshrl.u32 %v1226_v36, 16  ;;  %v1262_v46 = vshll.u32 %v1226_v36, 16  ;;  %2263 = vmatpush3.bf16.msra.mxu1 %v2329_v6  ;;  %v2006_v6 = vld [vmem:[%s2754_s8] ss:$0 sm:$0xff] }
 0x116   : > { %v1225_v41 = vpack.c.bf16 %v1220_v37, %v1219_v35  ;;  %2220 = vmatprep.mubr.msk.bf16.mxu0 %vm481_vm0, %v1268_v38  ;;  %v1479_v2 = vsel %vm656_vm5, %v1477_v52, %v1478_v62  ;;  %2264 = vmatprep.subr.bf16.mxu1 %v2330_v17 }
 0x117   : > { %2221 = vmatmul.mubr.msk.bf16.vlgmr.msra.gmra.mxu0 %vm481_vm0, %v1250_v42  ;;  %v1261_v45 = vrot.slane %v1259_v40, 7  ;;  %v1483_v14 = vrot.slane %v1262_v46, 1 }
 0x118   : > { %2240 = vmatprep.mubr.msk.bf16.mxu1 %vm481_vm0, %v1225_v41  ;;  %2245 = vmatpush3.bf16.msra.mxu0 %v2629_v43  ;;  %v1252_v44 = vshrl.u32 %v1225_v41, 16  ;;  %v1255_v49 = vshll.u32 %v1225_v41, 16 }
 0x119   : > { %2241 = vmatmul.mubr.msk.bf16.gmra.mxu1 %vm481_vm0, %v1226_v36  ;;  %2246 = vmatprep.subr.bf16.mxu0 %v2325_v39  ;;  %v1264_v61 = vor.u32 %v1262_v46, %v1261_v45  ;;  %v1485_v16 = vor.u32 %v1483_v14, %v1259_v40 }
 0x11a   : > { %v1254_v48 = vrot.slane %v1252_v44, 7  ;;  %v1481_v1 = vrot.slane %v1255_v49, 1  ;;  %2265 = vmatpush3.bf16.msra.mxu1 %v2330_v17 }
 0x11b   : > { %v1489_v53 = vsel %vm2511_vm6, %v1485_v16, 0  ;;  %2266 = vmatprep.subr.bf16.mxu1 %v2331_v50 }
 0x11c   : > { %2247 = vmatpush3.bf16.msra.mxu0 %v2325_v39  ;;  %v1257_v51 = vor.u32 %v1255_v49, %v1254_v48  ;;  %v1265_v0 = vsel %vm412_vm2, %v1254_v48, %v1264_v61  ;;  %v1482_v4 = vor.u32 %v1481_v1, %v1252_v44 }
 0x11d   : > { %2248 = vmatprep.subr.bf16.mxu0 %v2326_v47 }
 0x11e   : > { %v1269_v43 = vsel %vm2436_vm3, 0, %v1257_v51  ;;  %v1484_v15 = vsel %vm656_vm5, %v1482_v4, %v1483_v14  ;;  %2267 = vmatpush3.bf16.msra.mxu1 %v2331_v50 }
 0x11f   : > { %2224 = vmatprep.mubr.msk.bf16.mxu0 %vm481_vm0, %v1269_v43 }
 0x120   : > { %2225 = vmatmul.mubr.msk.bf16.gmra.mxu0 %vm481_vm0, %v1265_v0 }
 0x121   : > { %2249 = vmatpush3.bf16.msra.mxu0 %v2326_v47  ;;  %2252 = vmatprep.mubr.msk.bf16.mxu0 %vm481_vm0, %v1479_v2 }
 0x122   : > { %2250 = vmatprep.subr.bf16.mxu0 %v2327_v63 }
 0x125   : > { %2251 = vmatpush3.bf16.msra.mxu0 %v2327_v63 }
 0x128   : > { %2253 = vmatmul.mubr.msk.bf16.vlgmr.msra.gmra.mxu0 %vm481_vm0, %v1488_v3 }
 0x129   : > { %2256 = vmatprep.mubr.msk.bf16.mxu0 %vm481_vm0, %v1484_v15 }
 0x130   : > { %2257 = vmatmul.mubr.msk.bf16.gmra.mxu0 %vm481_vm0, %v1489_v53 }
 0x1d0   : > { %v2238_v19 = vpop.f32.mrf.mxu1 }
 0x1d2   : > { %v1445_v56 = vpop.f32.mrf.mxu1 }
 0x1d4   : > { %v2239_v8 = vpop.f32.mrf.mxu1 }
 0x1d6   : > { %v1448_v10 = vpop.f32.mrf.mxu1 }
 0x1d7   : > { %v2222_v18 = vpop.f32.mrf.mxu0 }
 0x1d8   : > { %v1454_v25 = vadd.f32 %v2238_v19, %v2222_v18 }
 0x1d9   : > { %v1348_v20 = vpop.f32.mrf.mxu0  ;;  %v2242_v57 = vpop.f32.mrf.mxu1 }
 0x1da   : > { %v1446_v7 = vadd.f32 %v1445_v56, %v1348_v20 }
 0x1db   : > { %v2223_v55 = vpop.f32.mrf.mxu0  ;;  %v1461_v59 = vpop.f32.mrf.mxu1 }
 0x1dc   : > { %v1457_v27 = vadd.f32 %v2239_v8, %v2223_v55 }
 0x1dd   : > { %v1351_v5 = vpop.f32.mrf.mxu0  ;;  %v2243_v35 = vpop.f32.mrf.mxu1 }
 0x1de   : > { %v1449_v12 = vadd.f32 %v1448_v10, %v1351_v5 }
 0x1df   : > { %v1464_v47 = vpop.f32.mrf.mxu1 }
 0x1e0   : > { %v2226_v21 = vpop.f32.mrf.mxu0 }
 0x1e1   : > { %v1470_v40 = vadd.f32 %v2242_v57, %v2226_v21 }
 0x1e2   : > { %v1364_v22 = vpop.f32.mrf.mxu0 }
 0x1e3   : > { %v1462_v38 = vadd.f32 %v1461_v59, %v1364_v22 }
 0x1e4   : > { %v2227_v23 = vpop.f32.mrf.mxu0 }
 0x1e5   : > { %v1473_v29 = vadd.f32 %v2243_v35, %v2227_v23 }
 0x1e6   : > { %v1367_v24 = vpop.f32.mrf.mxu0 }
 0x1e7   : > { %v1465_v51 = vadd.f32 %v1464_v47, %v1367_v24 }
 0x1e8   : > { %v2254_v58 = vpop.f32.mrf.mxu0 }
 0x1e9   : > { %v1602_v60 = vadd.f32 %v2254_v58, %v1454_v25 }
 0x1ea   : > { %v1569_v26 = vpop.f32.mrf.mxu0 }
 0x1eb   : > { %v1600_v28 = vadd.f32 %v1569_v26, %v1446_v7  ;;  %v1617_v36 = vadd.f32 %v2005_v11, %v1602_v60 }
 0x1ec   : > { %v2255_v9 = vpop.f32.mrf.mxu0 }
 0x1ed   : > { %v1603_v30 = vadd.f32 %v2255_v9, %v1457_v27  ;;  %v1615_v32 = vadd.f32 %v2005_v11, %v1600_v28  ;;  %v1625_v48 = vmax.f32 %v1617_v36, 0.0 }
 0x1ee   : > { %v1572_v31 = vpop.f32.mrf.mxu0 }
 0x1ef   : > { %v1618_v33 = vadd.f32 %v2005_v11, %v1603_v30  ;;  %v1601_v34 = vadd.f32 %v1572_v31, %v1449_v12  ;;  %v1623_v44 = vmax.f32 %v1615_v32, 0.0 }
 0x1f0   : > { %v2258_v37 = vpop.f32.mrf.mxu0 }
 0x1f1   : > { %v1616_v39 = vadd.f32 %v2005_v11, %v1601_v34  ;;  %v1626_v41 = vmax.f32 %v1618_v33, 0.0  ;;  %v1606_v49 = vadd.f32 %v2258_v37, %v1470_v40 }
 0x1f2   : > { %v1585_v42 = vpop.f32.mrf.mxu0 }
 0x1f3   : > { %v1624_v45 = vmax.f32 %v1616_v39, 0.0  ;;  %v1604_v46 = vadd.f32 %v1585_v42, %v1462_v38  ;;  %v1632_v62 = vpack.c.bf16 %v1626_v41, %v1625_v48  ;;  %v1621_v13 = vadd.f32 %v2005_v11, %v1606_v49 }
 0x1f4   : > { %v2259_v61 = vpop.f32.mrf.mxu0 }
 0x1f5   : > { %v1631_v52 = vpack.c.bf16 %v1624_v45, %v1623_v44  ;;  %v1607_v43 = vadd.f32 %v2259_v61, %v1473_v29  ;;  %v1619_v0 = vadd.f32 %v2005_v11, %v1604_v46  ;;  %v1629_v16 = vmax.f32 %v1621_v13, 0.0 }
 0x1f6   : > { %v1588_v63 = vpop.f32.mrf.mxu0 }
 0x1f7   : > { %v1622_v1 = vadd.f32 %v2005_v11, %v1607_v43  ;;  %v1605_v2 = vadd.f32 %v1588_v63, %v1465_v51  ;;  %2268 = vmatprep.mubr.msk.bf16.mxu1 %vm481_vm0, %v1631_v52  ;;  %v1627_v3 = vmax.f32 %v1619_v0, 0.0 }
 0x1f8   : > { %2269 = vmatmul.mubr.msk.bf16.vlgmr.msra.gmra.mxu1 %vm481_vm0, %v1632_v62 }
 0x1f9   : > { %v1620_v4 = vadd.f32 %v2005_v11, %v1605_v2  ;;  %v1630_v14 = vmax.f32 %v1622_v1, 0.0 }
 0x1fb   : > { %v1628_v15 = vmax.f32 %v1620_v4, 0.0  ;;  %v1634_v54 = vpack.c.bf16 %v1630_v14, %v1629_v16 }
 0x1fd   : > { %v1633_v53 = vpack.c.bf16 %v1628_v15, %v1627_v3 }
 0x1ff   : > { %2272 = vmatprep.mubr.msk.bf16.mxu1 %vm481_vm0, %v1633_v53 }
 0x200   : > { %2273 = vmatmul.mubr.msk.bf16.gmra.mxu1 %vm481_vm0, %v1634_v54 }
 0x2b8   : > { %v2270_v17 = vpop.f32.mrf.mxu1 }
 0x2b9   : > { %v1729_v50 = vadd.f32 %v2270_v17, %v2006_v6 }
 0x2ba   : > { %v1720_v18 = vpop.f32.mrf.mxu1 }
 0x2bb   : > { %v2030_v19 = vpack.c.bf16 %v1729_v50, %v1729_v50  ;;  %v1721_v20 = vadd.f32 %v2006_v6, %v1720_v18 }
 0x2bc   : > { %v2271_v55 = vpop.f32.mrf.mxu1 }
 0x2bd   : > { %1786 = vst.msk [vmem:[%s2725_s11 + $0x8] sm:$0xf] %vm1783_vm7, %v2030_v19  ;;  %v2028_v56 = vpack.c.bf16 %v1721_v20, %v1721_v20  ;;  %v1732_v5 = vadd.f32 %v2271_v55, %v2006_v6 }
 0x2be   : > { %v1723_v8 = vpop.f32.mrf.mxu1 }
 0x2bf   : > { %1784 = vst.msk [vmem:[%s2725_s11] sm:$0xf] %vm1783_vm7, %v2028_v56  ;;  %v2031_v21 = vpack.c.bf16 %v1732_v5, %v1732_v5  ;;  %v1724_v22 = vadd.f32 %v2006_v6, %v1723_v8 }
 0x2c0   : > { %v2274_v10 = vpop.f32.mrf.mxu1 }
 0x2c1   : > { %1787 = vst.msk [vmem:[%s2725_s11 + $0xc] sm:$0xf] %vm1783_vm7, %v2031_v21  ;;  %v2029_v23 = vpack.c.bf16 %v1724_v22, %v1724_v22  ;;  %v1745_v24 = vadd.f32 %v2274_v10, %v2006_v6 }
 0x2c2   : > { %v1736_v57 = vpop.f32.mrf.mxu1 }
 0x2c3   : > { %1785 = vst.msk [vmem:[%s2725_s11 + $0x4] sm:$0xf] %vm1783_vm7, %v2029_v23  ;;  %v2034_v58 = vpack.c.bf16 %v1745_v24, %v1745_v24  ;;  %v1737_v7 = vadd.f32 %v2006_v6, %v1736_v57 }
 0x2c4   : > { %v2275_v25 = vpop.f32.mrf.mxu1 }
 0x2c5   : > { %1790 = vst.msk [vmem:[%s2725_s11 + $0x18] sm:$0xf] %vm1783_vm7, %v2034_v58  ;;  %v2032_v26 = vpack.c.bf16 %v1737_v7, %v1737_v7  ;;  %v1748_v27 = vadd.f32 %v2275_v25, %v2006_v6 }
 0x2c6   : > { %v1739_v28 = vpop.f32.mrf.mxu1 }
 0x2c7   : > { %1788 = vst.msk [vmem:[%s2725_s11 + $0x10] sm:$0xf] %vm1783_vm7, %v2032_v26  ;;  %v2035_v59 = vpack.c.bf16 %v1748_v27, %v1748_v27  ;;  %v1740_v60 = vadd.f32 %v2006_v6, %v1739_v28 }
 0x2c9   : > { %1791 = vst.msk [vmem:[%s2725_s11 + $0x1c] sm:$0xf] %vm1783_vm7, %v2035_v59  ;;  %v2033_v9 = vpack.c.bf16 %v1740_v60, %v1740_v60 }
 0x2cb   : > { %1789 = vst.msk [vmem:[%s2725_s11 + $0x14] sm:$0xf] %vm1783_vm7, %v2033_v9 }
 0x2cc PF: > { %s19_s30 = sadd.s32 1, %s2338_s30  }
 0x2cd   : > { %p16_p4 = scmp.ge.s32.totalorder %s19_s30, 6  }
 0x2cf   :  { %18 = sbr.rel (!%p16_p4) target bundleno = 1 (0x1), region = 95 }

// kernel: conditional_unet1d.9
= control target key start
LH: loop header
LB: loop body
LE: loop exit
PB: predicated region body
PF: predicated region fallthrough
CT: control target
= control target key end

     0   :  { %s2930_s30 = smov 0   ;;  %s3644_s0 = inlined_call_operand.vmem [shape: bf16[8,64,32], index: 0, kind: input, shape index: {}]   ;;  %s3645_s1 = inlined_call_operand.vmem [shape: bf16[8,64,32], index: 1, kind: input, shape index: {}]   ;;  %s3646_s2 = inlined_call_operand.vmem [shape: bf16[3,32,32], index: 2, kind: input, shape index: {}]   ;;  %s3647_s3 = inlined_call_operand.vmem [shape: bf16[3,32,32], index: 3, kind: input, shape index: {}]   ;;  %s3648_s4 = inlined_call_operand.vmem [shape: f32[1,32], index: 4, kind: input, shape index: {}]   ;;  %s3649_s5 = inlined_call_operand.vmem [shape: bf16[3,32,32], index: 5, kind: input, shape index: {}]   ;;  %s3650_s6 = inlined_call_operand.vmem [shape: f32[1,32], index: 6, kind: input, shape index: {}]   ;;  %s3651_s7 = inlined_call_operand.vmem [shape: bf16[32,3], index: 7, kind: input, shape index: {}]   ;;  %s3652_s8 = inlined_call_operand.vmem [shape: f32[1,3], index: 8, kind: input, shape index: {}]   ;;  %s3653_s9 = inlined_call_operand.vmem [shape: f32[8,64,3], index: 9, kind: output, shape index: {}]  }
   0x1 LB: > { %s2366_s10 = sadd.s32 4294967295, %s2878_s30   ;;  %p2370_p0 = scmp.ge.s32.totalorder %s2878_s30, 1  ;;  %s2878_s30 = sphi %s2930_s30, %s19_s30  }
   0x2   : > { %p301_p1 = scmp.lt.s32.totalorder %s2878_s30, 5 }
   0x4   : > { %p302_p2 = pnand %p2370_p0, %p301_p1 }
   0x6   : > { %305 = sbr.rel (%p302_p2) target bundleno = 776 (0x308), region = 56 }
   0xb   : > { %v2836_v0 = vld [vmem:[%s3646_s2 + $0x18] sm:$0xff]   ;;  %s2371_s13 = sshll.u32 %s2366_s10, 1  ;;  %v2837_v1 = vld [vmem:[%s3646_s2 + $0x8] sm:$0xff]   ;;  %v2838_v2 = vld [vmem:[%s3646_s2 + $0x10] sm:$0xff]   ;;  %vm444_vm0 = vsmask.f32 256 }
   0xc   : > { %p346_p3 = scmp.lt.s32.totalorder %s2371_s13, 7  ;;  %2648 = vmatprep.subr.bf16.mxu1 %v2836_v0  ;;  %2628 = vmatprep.subr.bf16.mxu0 %v2837_v1  ;;  %v2839_v3 = vld [vmem:[%s3646_s2] sm:$0xff]   ;;  %v2842_v4 = vld [vmem:[%s3646_s2 + $0x28] sm:$0xff]   ;;  %vm529_vm1 = vcmask 261120   ;;  %vm509_vm2 = vcmask 1040384   ;;  %v3659_v15 = vmov 0 }
   0xd   : > { %2649 = vmatpush3.bf16.msra.mxu1 %v2836_v0  ;;  %2629 = vmatpush3.bf16.msra.mxu0 %v2837_v1  ;;  %v2843_v5 = vld [vmem:[%s3647_s3 + $0x8] sm:$0xff]   ;;  %vm2989_vm3 = vmand %vm509_vm2, %vm444_vm0  ;;  %v2848_v30 = vld [vmem:[%s3646_s2 + $0x20] sm:$0xff]   ;;  %vm776_vm4 = vsmask.f32 7424  ;;  %vm801_vm5 = vcmask 1047552   ;;  %vm2279_vm7 = vcmask 23552  }
   0xe   : > { %s3682_s13 = smov (!%p346_p3, %s2371_s13), 7  ;;  %2650 = vmatprep.subr.bf16.mxu1 %v2838_v2  ;;  %2630 = vmatprep.subr.bf16.mxu0 %v2839_v3  ;;  %v3660_v15 = vsel %vm2989_vm3, 4294967295, %v3659_v15  ;;  %v2849_v33 = vld [vmem:[%s3647_s3] sm:$0xff]   ;;  %v3072_v49 = vld [vmem:[%s3647_s3 + $0x18] sm:$0xff]   ;;  %v2855_v53 = vld [vmem:[%s3647_s3 + $0x28] sm:$0xff]  }
   0xf   : > { %s2525_s20 = sshll.u32 %s3682_s13, 5  ;;  %3661 = vst [vmem:[#allocation2_spill] sm:$0xff] %v3660_v15  ;;  %vm3205_vm6 = vmand %vm801_vm5, %vm776_vm4  ;;  %v3390_v15 = vld [vmem:[%s3648_s4] ss:$0 sm:$0xff] }
  0x10   : > { %s2961_s25 = scalar_lea.vmem %s3644_s0, %s2525_s20  ;;  %s3034_s15 = scalar_lea.vmem %s3645_s1, %s2525_s20 }
  0x11   : > { %2651 = vmatpush3.bf16.msra.mxu1 %v2838_v2  ;;  %v2967_v6 = vld [vmem:[%s2961_s25] sm:$0xff]   ;;  %2631 = vmatpush3.bf16.msra.mxu0 %v2839_v3  ;;  %v2970_v7 = vld [vmem:[%s2961_s25 + $0x8] sm:$0xff]   ;;  %v2981_v12 = vld [vmem:[%s2961_s25 + $0x10] sm:$0xff]  }
  0x12   : > { %2688 = vmatprep.subr.bf16.mxu1 %v2843_v5  ;;  %2652 = vmatprep.mubr.msk.bf16.mxu1 %vm529_vm1, %v2967_v6  ;;  %v446_v8 = vshrl.u32 %v2967_v6, 16  ;;  %v449_v9 = vshll.u32 %v2967_v6, 16  ;;  %v453_v10 = vshrl.u32 %v2970_v7, 16  ;;  %v456_v11 = vshll.u32 %v2970_v7, 16  ;;  %v2984_v13 = vld [vmem:[%s2961_s25 + $0x18] sm:$0xff]   ;;  %v3003_v21 = vld [vmem:[%s2961_s25 + $0x20] sm:$0xff]  }
  0x13   : > { %2668 = vmatprep.subr.bf16.mxu0 %v2842_v4  ;;  %v461_v17 = vshrl.u32 %v2981_v12, 16  ;;  %v464_v18 = vshll.u32 %v2981_v12, 16  ;;  %v469_v19 = vshrl.u32 %v2984_v13, 16  ;;  %v472_v25 = vshll.u32 %v2984_v13, 16  ;;  %v3013_v26 = vld [vmem:[%s2961_s25 + $0x28] sm:$0xff]   ;;  %v3041_v36 = vld [vmem:[%s2961_s25 + $0x30] sm:$0xff]  }
  0x14   : > { %2653 = vmatmul.mubr.msk.bf16.vlgmr.msra.gmra.mxu1 %vm529_vm1, %v2970_v7  ;;  %v448_v14 = vrot.slane %v446_v8, 7  ;;  %v455_v16 = vrot.slane %v453_v10, 7  ;;  %v477_v28 = vshrl.u32 %v3003_v21, 16  ;;  %v480_v29 = vshll.u32 %v3003_v21, 16  ;;  %v3055_v41 = vld [vmem:[%s3034_s15] sm:$0xff]   ;;  %v3061_v44 = vld [vmem:[%s2961_s25 + $0x38] sm:$0xff]  }
  0x15   : > { %2689 = vmatpush3.bf16.msra.mxu1 %v2843_v5  ;;  %2656 = vmatprep.mubr.msk.bf16.mxu1 %vm529_vm1, %v2981_v12  ;;  %v463_v23 = vrot.slane %v461_v17, 7  ;;  %v471_v24 = vrot.slane %v469_v19, 7  ;;  %v484_v35 = vshrl.u32 %v3013_v26, 16  ;;  %v492_v40 = vshrl.u32 %v3041_v36, 16  ;;  %v3067_v48 = vld [vmem:[%s3034_s15 + $0x8] sm:$0xff]   ;;  %v3087_v55 = vld [vmem:[%s3034_s15 + $0x10] sm:$0xff]  }
  0x16   : > { %v451_v20 = vor.u32 %v449_v9, %v448_v14  ;;  %v458_v22 = vor.u32 %v456_v11, %v455_v16  ;;  %v479_v34 = vrot.slane %v477_v28, 7  ;;  %2690 = vmatprep.subr.bf16.mxu1 %v2849_v33  ;;  %v487_v43 = vshll.u32 %v3013_v26, 16  ;;  %s2527_s25 = sshll.u32 %s3682_s13, 6 }
  0x17   : > { %v466_v32 = vor.u32 %v464_v18, %v463_v23  ;;  %v474_v38 = vor.u32 %v472_v25, %v471_v24  ;;  %v486_v42 = vrot.slane %v484_v35, 7  ;;  %v495_v46 = vshll.u32 %v3041_v36, 16  ;;  %s3607_s10 = scalar_lea.vmem %s3653_s9, %s2527_s25 }
  0x18   : > { %v511_v27 = vsel %vm2989_vm3, 0, %v451_v20  ;;  %v459_v31 = vsel %vm444_vm0, %v448_v14, %v458_v22  ;;  %v482_v39 = vor.u32 %v480_v29, %v479_v34  ;;  %v1005_v47 = vshrl.u32 %v3055_v41, 16  ;;  %v3122_v20 = vld [vmem:[%s3034_s15 + $0x20] sm:$0xff]  }
  0x19   : > { %2632 = vmatprep.mubr.msk.bf16.mxu0 %vm529_vm1, %v511_v27  ;;  %v467_v37 = vsel %vm444_vm0, %v455_v16, %v466_v32  ;;  %2691 = vmatpush3.bf16.msra.mxu1 %v2849_v33  ;;  %v475_v45 = vsel %vm444_vm0, %v463_v23, %v474_v38  ;;  %v494_v51 = vrot.slane %v492_v40, 7  ;;  %v1008_v52 = vshll.u32 %v3055_v41, 16 }
  0x1a   : > { %2633 = vmatmul.mubr.msk.bf16.vlgmr.msra.gmra.mxu0 %vm529_vm1, %v459_v31  ;;  %v512_v50 = vsel %vm2989_vm3, 0, %v482_v39  ;;  %v1007_v54 = vrot.slane %v1005_v47, 7  ;;  %2728 = vmatprep.subr.bf16.mxu1 %v2855_v53  ;;  %v489_v56 = vor.u32 %v487_v43, %v486_v42  ;;  %v500_v57 = vshrl.u32 %v3061_v44, 16  ;;  %v3151_v39 = vld [vmem:[%s3034_s15 + $0x28] sm:$0xff]  }
  0x1b   : > { %2669 = vmatpush3.bf16.msra.mxu0 %v2842_v4  ;;  %2636 = vmatprep.mubr.msk.bf16.mxu0 %vm529_vm1, %v467_v37  ;;  %v497_v58 = vor.u32 %v495_v46, %v494_v51  ;;  %v1012_v60 = vshrl.u32 %v3067_v48, 16  ;;  %v1020_v61 = vshrl.u32 %v3087_v55, 16  ;;  %v777_v62 = vrot.slane %v449_v9, 1  ;;  %v3117_v9 = vld [vmem:[%s3034_s15 + $0x18] sm:$0xff]  }
  0x1c   : > { %2657 = vmatmul.mubr.msk.bf16.gmra.mxu1 %vm529_vm1, %v2984_v13  ;;  %2670 = vmatprep.subr.bf16.mxu0 %v2848_v30  ;;  %v1010_v59 = vor.u32 %v1008_v52, %v1007_v54  ;;  %v490_v63 = vsel %vm444_vm0, %v479_v34, %v489_v56  ;;  %v502_v0 = vrot.slane %v500_v57, 7  ;;  %v503_v1 = vshll.u32 %v3061_v44, 16 }
  0x1d   : > { %2660 = vmatprep.mubr.msk.bf16.mxu1 %vm529_vm1, %v3003_v21  ;;  %v1015_v2 = vshll.u32 %v3067_v48, 16  ;;  %v498_v3 = vsel %vm444_vm0, %v486_v42, %v497_v58  ;;  %v1014_v5 = vrot.slane %v1012_v60, 7  ;;  %v1023_v14 = vshll.u32 %v3087_v55, 16  ;;  %v2861_v42 = vld [vmem:[%s3647_s3 + $0x20] sm:$0xff]  }
  0x1e   : > { %v1068_v4 = vsel %vm2989_vm3, 0, %v1010_v59  ;;  %v1022_v16 = vrot.slane %v1020_v61, 7  ;;  %v505_v22 = vor.u32 %v503_v1, %v502_v0  ;;  %v778_v24 = vor.u32 %v777_v62, %v446_v8 }
  0x1f   : > { %2671 = vmatpush3.bf16.msra.mxu0 %v2848_v30  ;;  %v1017_v23 = vor.u32 %v1015_v2, %v1014_v5  ;;  %v779_v27 = vrot.slane %v456_v11, 1  ;;  %v1028_v30 = vshrl.u32 %v3117_v9, 16  ;;  %v1036_v32 = vshrl.u32 %v3122_v20, 16 }
  0x20   : > { %2708 = vmatprep.subr.bf16.mxu0 %v3072_v49  ;;  %v1025_v31 = vor.u32 %v1023_v14, %v1022_v16  ;;  %v782_v33 = vrot.slane %v464_v18, 1  ;;  %v506_v34 = vsel %vm444_vm0, %v494_v51, %v505_v22  ;;  %v1031_v6 = vshll.u32 %v3117_v9, 16 }
  0x21   : > { %v1018_v8 = vsel %vm444_vm0, %v1007_v54, %v1017_v23  ;;  %v780_v11 = vsel %vm776_vm4, %v778_v24, %v779_v27  ;;  %v1030_v37 = vrot.slane %v1028_v30, 7  ;;  %v1039_v38 = vshll.u32 %v3122_v20, 16 }
  0x22   : > { %2637 = vmatmul.mubr.msk.bf16.gmra.mxu0 %vm529_vm1, %v475_v45  ;;  %v1026_v18 = vsel %vm444_vm0, %v1014_v5, %v1025_v31  ;;  %v1038_v45 = vrot.slane %v1036_v32, 7  ;;  %v781_v51 = vor.u32 %v779_v27, %v453_v10  ;;  %v1043_v56 = vshrl.u32 %v3151_v39, 16 }
  0x23   : > { %2640 = vmatprep.mubr.msk.bf16.mxu0 %vm529_vm1, %v512_v50  ;;  %v3160_v50 = vld [vmem:[%s3034_s15 + $0x30] sm:$0xff]   ;;  %v1033_v54 = vor.u32 %v1031_v6, %v1030_v37  ;;  %v784_v58 = vor.u32 %v782_v33, %v461_v17  ;;  %v785_v59 = vrot.slane %v472_v25, 1  ;;  %v788_v62 = vrot.slane %v480_v29, 1  ;;  %v3186_v25 = vld [vmem:[%s3034_s15 + $0x38] sm:$0xff]  }
  0x24   : > { %2661 = vmatmul.mubr.msk.bf16.gmra.mxu1 %vm529_vm1, %v3013_v26  ;;  %v1041_v7 = vor.u32 %v1039_v38, %v1038_v45  ;;  %v1051_v10 = vshrl.u32 %v3160_v50, 16  ;;  %v1045_v12 = vrot.slane %v1043_v56, 7  ;;  %v1046_v17 = vshll.u32 %v3151_v39, 16 }
  0x25   : > { %2664 = vmatprep.mubr.msk.bf16.mxu1 %vm529_vm1, %v3041_v36  ;;  %v786_v0 = vsel %vm776_vm4, %v784_v58, %v785_v59  ;;  %v1054_v5 = vshll.u32 %v3160_v50, 16  ;;  %v3662_v22 = vmov 0  ;;  %v790_v13 = vrot.slane %v487_v43, 1 }
  0x26   : > { %v1053_v29 = vrot.slane %v1051_v10, 7  ;;  %v3663_v22 = vsel %vm3205_vm6, 4294967295, %v3662_v22  ;;  %v1048_v23 = vor.u32 %v1046_v17, %v1045_v12  ;;  %v1332_v21 = vrot.slane %v1008_v52, 1 }
  0x27   : > { %3664 = vst [vmem:[#allocation3_spill] sm:$0xff] %v3663_v22  ;;  %v793_v43 = vrot.slane %v495_v46, 1  ;;  %v1334_v46 = vrot.slane %v1015_v2, 1  ;;  %v1337_v36 = vrot.slane %v1023_v14, 1  ;;  %v1340_v2 = vrot.slane %v1031_v6, 1 }
  0x28   : > { %v1056_v24 = vor.u32 %v1054_v5, %v1053_v29  ;;  %v1049_v31 = vsel %vm444_vm0, %v1038_v45, %v1048_v23  ;;  %v1345_v6 = vrot.slane %v1046_v17, 1 }
  0x29   : > { %v795_v52 = vor.u32 %v793_v43, %v492_v40 }
  0x2a   : > { %2641 = vmatmul.mubr.msk.bf16.gmra.mxu0 %vm529_vm1, %v490_v63  ;;  %v1034_v63 = vsel %vm444_vm0, %v1022_v16, %v1033_v54  ;;  %v787_v16 = vor.u32 %v785_v59, %v469_v19  ;;  %v1059_v19 = vshrl.u32 %v3186_v25, 16 }
  0x2b   : > { %2644 = vmatprep.mubr.msk.bf16.mxu0 %vm529_vm1, %v498_v3  ;;  %v1069_v3 = vsel %vm2989_vm3, 0, %v1041_v7 }
  0x2c   : > { %2665 = vmatmul.mubr.msk.bf16.gmra.mxu1 %vm529_vm1, %v3061_v44  ;;  %v803_v27 = vsel %vm3205_vm6, %v787_v16, 0  ;;  %v1343_v44 = vrot.slane %v1039_v38, 1 }
  0x2d   : > { %2692 = vmatprep.mubr.msk.bf16.mxu1 %vm529_vm1, %v1068_v4  ;;  %v2860_v4 = vld [vmem:[%s3647_s3 + $0x10] sm:$0xff]  }
  0x32   : > { %2645 = vmatmul.mubr.msk.bf16.gmra.mxu0 %vm529_vm1, %v506_v34  ;;  %v1061_v34 = vrot.slane %v1059_v19, 7 }
  0x33   : > { %2672 = vmatprep.mubr.msk.bf16.mxu0 %vm529_vm1, %v780_v11  ;;  %v792_v11 = vor.u32 %v790_v13, %v484_v35 }
  0x34   : > { %2693 = vmatmul.mubr.msk.bf16.vlgmr.msra.gmra.mxu1 %vm529_vm1, %v1018_v8  ;;  %v1062_v8 = vshll.u32 %v3186_v25, 16 }
  0x35   : > { %2729 = vmatpush3.bf16.msra.mxu1 %v2855_v53  ;;  %2696 = vmatprep.mubr.msk.bf16.mxu1 %vm529_vm1, %v1026_v18  ;;  %v783_v53 = vsel %vm776_vm4, %v781_v51, %v782_v33  ;;  %v1333_v18 = vor.u32 %v1332_v21, %v1005_v47  ;;  %v794_v45 = vsel %vm776_vm4, %v792_v11, %v793_v43 }
  0x36   : > { %2730 = vmatprep.subr.bf16.mxu1 %v2861_v42  ;;  %v1064_v37 = vor.u32 %v1062_v8, %v1061_v34  ;;  %v1336_v47 = vor.u32 %v1334_v46, %v1012_v60  ;;  %v1342_v60 = vor.u32 %v1340_v2, %v1028_v30  ;;  %v1347_v30 = vor.u32 %v1345_v6, %v1043_v56  ;;  %v3321_v56 = vld [vmem:[%s3649_s5 + $0x28] sm:$0xff]  }
  0x37   : > { %v1335_v51 = vsel %vm776_vm4, %v1333_v18, %v1334_v46  ;;  %v1351_v59 = vrot.slane %v1062_v8, 1  ;;  %3665 = vst [vmem:[#allocation4_spill] sm:$0xff] %v3321_v56 }
  0x38   : > { %v1065_v26 = vsel %vm444_vm0, %v1053_v29, %v1064_v37  ;;  %v1338_v54 = vsel %vm776_vm4, %v1336_v47, %v1337_v36  ;;  %v1356_v38 = vsel %vm3205_vm6, %v1342_v60, 0 }
  0x39   : > { %2731 = vmatpush3.bf16.msra.mxu1 %v2861_v42  ;;  %v796_v42 = vrot.slane %v503_v1, 1  ;;  %v1339_v1 = vor.u32 %v1337_v36, %v1020_v61  ;;  %v1344_v61 = vor.u32 %v1343_v44, %v1036_v32 }
  0x3a   : > { %2673 = vmatmul.mubr.msk.bf16.vlgmr.msra.gmra.mxu0 %vm529_vm1, %v783_v53 }
  0x3b   : > { %2709 = vmatpush3.bf16.msra.mxu0 %v3072_v49  ;;  %2676 = vmatprep.mubr.msk.bf16.mxu0 %vm529_vm1, %v786_v0  ;;  %v789_v49 = vor.u32 %v788_v62, %v477_v28  ;;  %v1057_v28 = vsel %vm444_vm0, %v1045_v12, %v1056_v24  ;;  %v797_v35 = vsel %vm776_vm4, %v795_v52, %v796_v42 }
  0x3c   : > { %2697 = vmatmul.mubr.msk.bf16.gmra.mxu1 %vm529_vm1, %v1034_v63  ;;  %2710 = vmatprep.subr.bf16.mxu0 %v2860_v4  ;;  %v798_v40 = vor.u32 %v796_v42, %v500_v57  ;;  %v1341_v57 = vsel %vm776_vm4, %v1339_v1, %v1340_v2  ;;  %v1346_v58 = vsel %vm776_vm4, %v1344_v61, %v1345_v6 }
  0x3d   : > { %2700 = vmatprep.mubr.msk.bf16.mxu1 %vm529_vm1, %v1069_v3  ;;  %v791_v33 = vsel %vm776_vm4, %v789_v49, %v790_v13 }
  0x3e   : > { %v804_v14 = vsel %vm3205_vm6, %v798_v40, 0 }
  0x3f   : > { %2711 = vmatpush3.bf16.msra.mxu0 %v2860_v4 }
  0x42   : > { %2677 = vmatmul.mubr.msk.bf16.gmra.mxu0 %vm529_vm1, %v803_v27 }
  0x43   : > { %2680 = vmatprep.mubr.msk.bf16.mxu0 %vm529_vm1, %v791_v33 }
  0x44   : > { %2701 = vmatmul.mubr.msk.bf16.gmra.mxu1 %vm529_vm1, %v1049_v31 }
  0x45   : > { %2704 = vmatprep.mubr.msk.bf16.mxu1 %vm529_vm1, %v1057_v28 }
  0x4a   : > { %2681 = vmatmul.mubr.msk.bf16.gmra.mxu0 %vm529_vm1, %v794_v45 }
  0x4b   : > { %2684 = vmatprep.mubr.msk.bf16.mxu0 %vm529_vm1, %v797_v35 }
  0x4c   : > { %2705 = vmatmul.mubr.msk.bf16.gmra.mxu1 %vm529_vm1, %v1065_v26 }
  0x4d   : > { %2732 = vmatprep.mubr.msk.bf16.mxu1 %vm529_vm1, %v1335_v51 }
  0x52   : > { %2685 = vmatmul.mubr.msk.bf16.gmra.mxu0 %vm529_vm1, %v804_v14 }
  0x53   : > { %2712 = vmatprep.mubr.msk.bf16.mxu0 %vm529_vm1, %v3055_v41  ;;  %v1348_v41 = vrot.slane %v1054_v5, 1 }
  0x54   : > { %2733 = vmatmul.mubr.msk.bf16.vlgmr.msra.gmra.mxu1 %vm529_vm1, %v1338_v54 }
  0x55   : > { %2736 = vmatprep.mubr.msk.bf16.mxu1 %vm529_vm1, %v1341_v57  ;;  %v1350_v32 = vor.u32 %v1348_v41, %v1051_v10  ;;  %v1349_v7 = vsel %vm776_vm4, %v1347_v30, %v1348_v41 }
  0x57   : > { %v1352_v53 = vsel %vm776_vm4, %v1350_v32, %v1351_v59 }
  0x5a   : > { %2713 = vmatmul.mubr.msk.bf16.vlgmr.msra.gmra.mxu0 %vm529_vm1, %v3067_v48  ;;  %v1353_v48 = vor.u32 %v1351_v59, %v1059_v19 }
  0x5b   : > { %2716 = vmatprep.mubr.msk.bf16.mxu0 %vm529_vm1, %v3087_v55 }
  0x5c   : > { %2737 = vmatmul.mubr.msk.bf16.gmra.mxu1 %vm529_vm1, %v1356_v38  ;;  %v1357_v55 = vsel %vm3205_vm6, %v1353_v48, 0 }
  0x5d   : > { %2740 = vmatprep.mubr.msk.bf16.mxu1 %vm529_vm1, %v1346_v58 }
  0x62   : > { %2717 = vmatmul.mubr.msk.bf16.gmra.mxu0 %vm529_vm1, %v3117_v9  ;;  %v2864_v9 = vld [vmem:[%s3649_s5 + $0x8] sm:$0xff]  }
  0x63   : > { %2720 = vmatprep.mubr.msk.bf16.mxu0 %vm529_vm1, %v3122_v20  ;;  %2748 = vmatprep.subr.bf16.mxu0 %v2864_v9  ;;  %v2866_v20 = vld [vmem:[%s3649_s5 + $0x18] sm:$0xff]  }
  0x64   : > { %2741 = vmatmul.mubr.msk.bf16.gmra.mxu1 %vm529_vm1, %v1349_v7  ;;  %2749 = vmatpush3.bf16.msra.mxu0 %v2864_v9 }
  0x65   : > { %2744 = vmatprep.mubr.msk.bf16.mxu1 %vm529_vm1, %v1352_v53  ;;  %2768 = vmatprep.subr.bf16.mxu1 %v2866_v20 }
  0x66   : > { %2769 = vmatpush3.bf16.msra.mxu1 %v2866_v20 }
  0x6a   : > { %2721 = vmatmul.mubr.msk.bf16.gmra.mxu0 %vm529_vm1, %v3151_v39  ;;  %v2867_v39 = vld [vmem:[%s3649_s5 + $0x10] sm:$0xff]  }
  0x6b   : > { %2724 = vmatprep.mubr.msk.bf16.mxu0 %vm529_vm1, %v3160_v50  ;;  %2770 = vmatprep.subr.bf16.mxu1 %v2867_v39  ;;  %v2865_v50 = vld [vmem:[%s3649_s5] sm:$0xff]  }
  0x6c   : > { %2745 = vmatmul.mubr.msk.bf16.gmra.mxu1 %vm529_vm1, %v1357_v55  ;;  %2750 = vmatprep.subr.bf16.mxu0 %v2865_v50 }
  0x6d   : > { %2771 = vmatpush3.bf16.msra.mxu1 %v2867_v39  ;;  %2751 = vmatpush3.bf16.msra.mxu0 %v2865_v50 }
  0x6e   : > { %2788 = vmatprep.subr.bf16.mxu0 %v3321_v56 }
  0x72   : > { %2725 = vmatmul.mubr.msk.bf16.gmra.mxu0 %vm529_vm1, %v3186_v25 }
  0xd4   : > { %v2654_v10 = vpop.f32.mrf.mxu1 }
  0xd6   : > { %v713_v62 = vpop.f32.mrf.mxu1 }
  0xd8   : > { %v2655_v63 = vpop.f32.mrf.mxu1 }
  0xda   : > { %v3324_v12 = vpop.f32.mrf.mxu1  ;;  %v2634_v17 = vpop.f32.mrf.mxu0 }
  0xdb   : > { %v3326_v25 = vadd.f32 %v2654_v10, %v2634_v17 }
  0xdc   : > { %v2658_v0 = vpop.f32.mrf.mxu1  ;;  %v588_v3 = vpop.f32.mrf.mxu0 }
  0xdd   : > { %v3328_v4 = vadd.f32 %v713_v62, %v588_v3 }
  0xde   : > { %v729_v29 = vpop.f32.mrf.mxu1  ;;  %v2635_v5 = vpop.f32.mrf.mxu0 }
  0xdf   : > { %v3330_v16 = vadd.f32 %v2655_v63, %v2635_v5 }
  0xe0   : > { %v2659_v23 = vpop.f32.mrf.mxu1  ;;  %v3332_v49 = vpop.f32.mrf.mxu0 }
  0xe2   : > { %v3334_v13 = vpop.f32.mrf.mxu1  ;;  %v2638_v19 = vpop.f32.mrf.mxu0 }
  0xe3   : > { %v3336_v24 = vadd.f32 %v2658_v0, %v2638_v19 }
  0xe4   : > { %v2662_v27 = vpop.f32.mrf.mxu1  ;;  %v604_v31 = vpop.f32.mrf.mxu0 }
  0xe5   : > { %v3338_v33 = vadd.f32 %v729_v29, %v604_v31 }
  0xe6   : > { %v745_v34 = vpop.f32.mrf.mxu1  ;;  %v2639_v8 = vpop.f32.mrf.mxu0 }
  0xe7   : > { %v3340_v21 = vadd.f32 %v2659_v23, %v2639_v8 }
  0xe8   : > { %v2663_v28 = vpop.f32.mrf.mxu1  ;;  %v3342_v43 = vpop.f32.mrf.mxu0 }
  0xea   : > { %v3344_v11 = vpop.f32.mrf.mxu1  ;;  %v2642_v37 = vpop.f32.mrf.mxu0 }
  0xeb   : > { %v3346_v52 = vadd.f32 %v2662_v27, %v2642_v37 }
  0xec   : > { %v2666_v42 = vpop.f32.mrf.mxu1  ;;  %v620_v18 = vpop.f32.mrf.mxu0 }
  0xed   : > { %v3348_v46 = vadd.f32 %v745_v34, %v620_v18 }
  0xee   : > { %v761_v45 = vpop.f32.mrf.mxu1  ;;  %v2643_v26 = vpop.f32.mrf.mxu0 }
  0xef   : > { %v3350_v35 = vadd.f32 %v2663_v28, %v2643_v26 }
  0xf0   : > { %v2667_v51 = vpop.f32.mrf.mxu1  ;;  %v623_v36 = vpop.f32.mrf.mxu0 }
  0xf2   : > { %v3352_v40 = vpop.f32.mrf.mxu1  ;;  %v2646_v47 = vpop.f32.mrf.mxu0 }
  0xf3   : > { %v3354_v1 = vadd.f32 %v2666_v42, %v2646_v47 }
  0xf4   : > { %v2694_v2 = vpop.f32.mrf.mxu1  ;;  %v636_v14 = vpop.f32.mrf.mxu0 }
  0xf5   : > { %v3356_v54 = vadd.f32 %v761_v45, %v636_v14 }
  0xf6   : > { %v1144_v44 = vpop.f32.mrf.mxu1  ;;  %v2647_v57 = vpop.f32.mrf.mxu0 }
  0xf7   : > { %v3358_v60 = vadd.f32 %v2667_v51, %v2647_v57 }
  0xf8   : > { %v2695_v61 = vpop.f32.mrf.mxu1  ;;  %v639_v6 = vpop.f32.mrf.mxu0 }
  0xfa   : > { %v1147_v38 = vpop.f32.mrf.mxu1  ;;  %v2674_v58 = vpop.f32.mrf.mxu0 }
  0xfb   : > { %v945_v57 = vadd.f32 %v2674_v58, %v3326_v25  ;;  %v749_v25 = vadd.f32 %v3344_v11, %v623_v36 }
  0xfc   : > { %v3360_v41 = vpop.f32.mrf.mxu1  ;;  %v880_v30 = vpop.f32.mrf.mxu0 }
  0xfe   : > { %v3362_v32 = vpop.f32.mrf.mxu1  ;;  %v2675_v59 = vpop.f32.mrf.mxu0 }
 0x100   : > { %v3364_v7 = vpop.f32.mrf.mxu1  ;;  %v883_v53 = vpop.f32.mrf.mxu0 }
 0x102   : > { %v3366_v48 = vpop.f32.mrf.mxu1  ;;  %v2678_v55 = vpop.f32.mrf.mxu0 }
 0x104   : > { %v3368_v9 = vpop.f32.mrf.mxu1  ;;  %v896_v20 = vpop.f32.mrf.mxu0 }
 0x106   : > { %v3370_v39 = vpop.f32.mrf.mxu1  ;;  %v2679_v50 = vpop.f32.mrf.mxu0 }
 0x108   : > { %v3372_v10 = vpop.f32.mrf.mxu1  ;;  %v899_v62 = vpop.f32.mrf.mxu0 }
 0x109   : > { %3666 = vst [vmem:[#allocation5_spill] sm:$0xff] %v3372_v10 }
 0x10a   : > { %v3374_v63 = vpop.f32.mrf.mxu1  ;;  %v2682_v17 = vpop.f32.mrf.mxu0 }
 0x10b   : > { %3667 = vst [vmem:[#allocation6_spill] sm:$0xff] %v3374_v63 }
 0x10c   : > { %v3376_v0 = vpop.f32.mrf.mxu1  ;;  %v912_v3 = vpop.f32.mrf.mxu0 }
 0x10d   : > { %3668 = vst [vmem:[#allocation7_spill] sm:$0xff] %v3376_v0 }
 0x10e   : > { %v3378_v29 = vpop.f32.mrf.mxu1  ;;  %v2683_v5 = vpop.f32.mrf.mxu0 }
 0x10f   : > { %3669 = vst [vmem:[#allocation8_spill] sm:$0xff] %v3378_v29 }
 0x110   : > { %v3380_v23 = vpop.f32.mrf.mxu1  ;;  %v915_v19 = vpop.f32.mrf.mxu0 }
 0x111   : > { %3670 = vst [vmem:[#allocation9_spill] sm:$0xff] %v3380_v23 }
 0x112   : > { %v3382_v27 = vpop.f32.mrf.mxu1  ;;  %v2686_v31 = vpop.f32.mrf.mxu0 }
 0x113   : > { %3671 = vst [vmem:[#allocation10_spill] sm:$0xff] %v3382_v27 }
 0x114   : > { %v2734_v34 = vpop.f32.mrf.mxu1  ;;  %v928_v8 = vpop.f32.mrf.mxu0 }
 0x116   : > { %v1433_v28 = vpop.f32.mrf.mxu1  ;;  %v2687_v37 = vpop.f32.mrf.mxu0 }
 0x118   : > { %v2735_v42 = vpop.f32.mrf.mxu1  ;;  %v3384_v18 = vpop.f32.mrf.mxu0 }
 0x11a   : > { %v1436_v45 = vpop.f32.mrf.mxu1  ;;  %v2714_v26 = vpop.f32.mrf.mxu0 }
 0x11b   : > { %v1278_v51 = vadd.f32 %v2714_v26, %v2694_v2  ;;  %v717_v2 = vadd.f32 %v3324_v12, %v3332_v49  ;;  %v733_v26 = vadd.f32 %v3334_v13, %v3342_v43  ;;  %v947_v13 = vadd.f32 %v896_v20, %v3338_v33 }
 0x11c   : > { %v2738_v47 = vpop.f32.mrf.mxu1  ;;  %v1269_v14 = vpop.f32.mrf.mxu0  ;;  %v950_v43 = vadd.f32 %v2679_v50, %v3340_v21 }
 0x11d   : > { %v1498_v22 = vadd.f32 %v2734_v34, %v1278_v51  ;;  %v1270_v23 = vadd.f32 %v1269_v14, %v1144_v44  ;;  %v943_v44 = vadd.f32 %v880_v30, %v3328_v4  ;;  %v946_v34 = vadd.f32 %v2675_v59, %v3330_v16 }
 0x11e   : > { %v1449_v56 = vpop.f32.mrf.mxu1  ;;  %v2715_v29 = vpop.f32.mrf.mxu0  ;;  %v953_v16 = vadd.f32 %v2682_v17, %v3346_v52  ;;  %v3410_v30 = vadd.f32 %v2683_v5, %v3350_v35 }
 0x11f   : > { %v1514_v27 = vadd.f32 %v1498_v22, %v945_v57  ;;  %v1496_v0 = vadd.f32 %v1433_v28, %v1270_v23  ;;  %v1281_v63 = vadd.f32 %v2715_v29, %v2695_v61  ;;  %v765_v22 = vadd.f32 %v3352_v40, %v639_v6 }
 0x120   : > { %v2739_v10 = vpop.f32.mrf.mxu1  ;;  %v1272_v58 = vpop.f32.mrf.mxu0  ;;  %v944_v61 = vadd.f32 %v883_v53, %v717_v2  ;;  %v949_v29 = vadd.f32 %v2678_v55, %v3336_v24  ;;  %v948_v40 = vadd.f32 %v899_v62, %v733_v26  ;;  %v3406_v6 = vadd.f32 %v912_v3, %v3348_v46 }
 0x121   : > { %v1499_v51 = vadd.f32 %v2735_v42, %v1281_v63  ;;  %v1273_v14 = vadd.f32 %v1272_v58, %v1147_v38  ;;  %v1537_v12 = vadd.f32 %v3390_v15, %v1514_v27  ;;  %v1512_v49 = vadd.f32 %v1496_v0, %v943_v44 }
 0x122   : > { %v1452_v23 = vpop.f32.mrf.mxu1  ;;  %v2718_v28 = vpop.f32.mrf.mxu0  ;;  %v3414_v55 = vadd.f32 %v915_v19, %v749_v25  ;;  %v3420_v0 = vadd.f32 %v2686_v31, %v3354_v1  ;;  %v3426_v3 = vadd.f32 %v2687_v37, %v3358_v60 }
 0x123   : > { %v1515_v4 = vadd.f32 %v1499_v51, %v946_v34  ;;  %v1497_v11 = vadd.f32 %v1436_v45, %v1273_v14  ;;  %v1294_v38 = vadd.f32 %v2718_v28, %v3360_v41  ;;  %v1553_v20 = vmax.f32 %v1537_v12, 0.0  ;;  %v3672_v28 = vld [vmem:[#allocation5_spill] sm:$0xff] }
 0x124   : > { %v2742_v36 = vpop.f32.mrf.mxu1  ;;  %v1285_v24 = vpop.f32.mrf.mxu0  ;;  %v1535_v52 = vadd.f32 %v3390_v15, %v1512_v49 }
 0x125   : > { %v1538_v59 = vadd.f32 %v3390_v15, %v1515_v4  ;;  %v1513_v33 = vadd.f32 %v1497_v11, %v944_v61  ;;  %v1286_v21 = vadd.f32 %v1285_v24, %v3362_v32  ;;  %v1502_v50 = vadd.f32 %v2738_v47, %v1294_v38 }
 0x126   : > { %v1465_v53 = vpop.f32.mrf.mxu1  ;;  %v2719_v46 = vpop.f32.mrf.mxu0  ;;  %v3423_v32 = vadd.f32 %v928_v8, %v3356_v54 }
 0x127   : > { %v1554_v62 = vmax.f32 %v1538_v59, 0.0  ;;  %v1536_v41 = vadd.f32 %v3390_v15, %v1513_v33  ;;  %v1500_v63 = vadd.f32 %v1449_v56, %v1286_v21  ;;  %v1297_v35 = vadd.f32 %v2719_v46, %v3364_v7  ;;  %v3673_v59 = vld [vmem:[#allocation6_spill] sm:$0xff] }
 0x128   : > { %v2743_v17 = vpop.f32.mrf.mxu1  ;;  %v1518_v5 = vadd.f32 %v1502_v50, %v949_v29  ;;  %v1288_v19 = vpop.f32.mrf.mxu0  ;;  %v3431_v56 = vadd.f32 %v3384_v18, %v765_v22  ;;  %v1551_v7 = vmax.f32 %v1535_v52, 0.0 }
 0x129   : > { %v3428_v27 = vpack.c.bf16 %v1554_v62, %v1553_v20  ;;  %v1552_v42 = vmax.f32 %v1536_v41, 0.0  ;;  %v1516_v45 = vadd.f32 %v1500_v63, %v947_v13  ;;  %v1503_v47 = vadd.f32 %v2739_v10, %v1297_v35  ;;  %v3674_v35 = vld [vmem:[#allocation7_spill] sm:$0xff] }
 0x12a   : > { %v1541_v1 = vadd.f32 %v3390_v15, %v1518_v5  ;;  %v1289_v31 = vadd.f32 %v1288_v19, %v3366_v48  ;;  %v2722_v54 = vpop.f32.mrf.mxu0  ;;  %v1468_v8 = vpop.f32.mrf.mxu1 }
 0x12b   : > { %v1588_v60 = vshrl.u32 %v3428_v27, 16  ;;  %v1591_v37 = vshll.u32 %v3428_v27, 16  ;;  %v1539_v57 = vadd.f32 %v3390_v15, %v1516_v45  ;;  %v1519_v2 = vadd.f32 %v1503_v47, %v950_v43 }
 0x12c   : > { %v1557_v26 = vmax.f32 %v1541_v1, 0.0  ;;  %v1501_v25 = vadd.f32 %v1452_v23, %v1289_v31  ;;  %v1310_v10 = vadd.f32 %v2722_v54, %v3368_v9  ;;  %v1301_v18 = vpop.f32.mrf.mxu0  ;;  %v3439_v44 = vpack.c.bf16 %v1552_v42, %v1551_v7  ;;  %v2746_v61 = vpop.f32.mrf.mxu1  ;;  %v2869_v7 = vld [vmem:[%s3649_s5 + $0x20] sm:$0xff]  }
 0x12d   : > { %v1555_v58 = vmax.f32 %v1539_v57, 0.0  ;;  %v1542_v22 = vadd.f32 %v3390_v15, %v1519_v2  ;;  %v1302_v48 = vadd.f32 %v1301_v18, %v3370_v39  ;;  %v3445_v34 = vrot.slane %v1588_v60, 7  ;;  %v3676_v57 = vld [vmem:[#allocation8_spill] sm:$0xff] }
 0x12e   : > { %v1517_v51 = vadd.f32 %v1501_v25, %v948_v40  ;;  %v1506_v14 = vadd.f32 %v2742_v36, %v1310_v10  ;;  %2772 = vmatprep.mubr.msk.bf16.mxu1 %vm529_vm1, %v3439_v44  ;;  %v2723_v23 = vpop.f32.mrf.mxu0  ;;  %v1581_v9 = vshrl.u32 %v3439_v44, 16  ;;  %v1584_v29 = vshll.u32 %v3439_v44, 16  ;;  %v1481_v52 = vpop.f32.mrf.mxu1 }
 0x12f   : > { %v1558_v12 = vmax.f32 %v1542_v22, 0.0  ;;  %v1504_v49 = vadd.f32 %v1465_v53, %v1302_v48  ;;  %v1313_v13 = vadd.f32 %v2723_v23, %v3672_v28  ;;  %2773 = vmatmul.mubr.msk.bf16.vlgmr.msra.gmra.mxu1 %vm529_vm1, %v3428_v27  ;;  %v1593_v39 = vor.u32 %v1591_v37, %v3445_v34  ;;  %v3677_v48 = vld [vmem:[#allocation4_spill] sm:$0xff] }
 0x130   : > { %v1540_v43 = vadd.f32 %v3390_v15, %v1517_v51  ;;  %v1522_v4 = vadd.f32 %v1506_v14, %v953_v16  ;;  %v1304_v11 = vpop.f32.mrf.mxu0  ;;  %v1583_v36 = vrot.slane %v1581_v9, 7  ;;  %v3460_v40 = vrot.slane %v1584_v29, 1  ;;  %v3678_v51 = vld [vmem:[#allocation9_spill] sm:$0xff] }
 0x131   : > { %v1520_v38 = vadd.f32 %v1504_v49, %v3406_v6  ;;  %v1507_v24 = vadd.f32 %v2743_v17, %v1313_v13  ;;  %v1305_v33 = vadd.f32 %v1304_v11, %v3673_v59  ;;  %v3464_v21 = vpack.c.bf16 %v1558_v12, %v1557_v26 }
 0x132   : > { %v1556_v53 = vmax.f32 %v1540_v43, 0.0  ;;  %v1545_v20 = vadd.f32 %v3390_v15, %v1522_v4  ;;  %v2726_v50 = vpop.f32.mrf.mxu0  ;;  %v1586_v46 = vor.u32 %v1584_v29, %v1583_v36  ;;  %v1594_v16 = vsel %vm444_vm0, %v1583_v36, %v1593_v39  ;;  %v3679_v43 = vld [vmem:[#allocation10_spill] sm:$0xff] }
 0x133   : > { %v1543_v62 = vadd.f32 %v3390_v15, %v1520_v38  ;;  %v1523_v41 = vadd.f32 %v1507_v24, %v3410_v30  ;;  %v1505_v63 = vadd.f32 %v1468_v8, %v1305_v33  ;;  %v1326_v6 = vadd.f32 %v2726_v50, %v3674_v35  ;;  %v2747_v8 = vpop.f32.mrf.mxu1 }
 0x134   : > { %v1561_v17 = vmax.f32 %v1545_v20, 0.0  ;;  %v1317_v5 = vpop.f32.mrf.mxu0  ;;  %v1644_v42 = vsel %vm2989_vm3, 0, %v1586_v46  ;;  %v3473_v45 = vpack.c.bf16 %v1556_v53, %v1555_v58  ;;  %v1604_v47 = vshrl.u32 %v3464_v21, 16 }
 0x135   : > { %v1559_v1 = vmax.f32 %v1543_v62, 0.0  ;;  %v1546_v31 = vadd.f32 %v3390_v15, %v1523_v41  ;;  %v1521_v30 = vadd.f32 %v1505_v63, %v3414_v55  ;;  %v1510_v54 = vadd.f32 %v2746_v61, %v1326_v6  ;;  %2752 = vmatprep.mubr.msk.bf16.mxu0 %vm529_vm1, %v1644_v42  ;;  %v1484_v11 = vpop.f32.mrf.mxu1 }
 0x136   : > { %v1318_v2 = vadd.f32 %v1317_v5, %v3676_v57  ;;  %2753 = vmatmul.mubr.msk.bf16.vlgmr.msra.gmra.mxu0 %vm529_vm1, %v1594_v16  ;;  %2776 = vmatprep.mubr.msk.bf16.mxu1 %vm529_vm1, %v3473_v45  ;;  %v2727_v26 = vpop.f32.mrf.mxu0  ;;  %v1596_v25 = vshrl.u32 %v3473_v45, 16  ;;  %v1599_v10 = vshll.u32 %v3473_v45, 16  ;;  %v1606_v18 = vrot.slane %v1604_v47, 7 }
 0x137   : > { %v1562_v55 = vmax.f32 %v1546_v31, 0.0  ;;  %v1544_v58 = vadd.f32 %v3390_v15, %v1521_v30  ;;  %v1526_v22 = vadd.f32 %v1510_v54, %v3420_v0  ;;  %2789 = vmatpush3.bf16.msra.mxu0 %v3677_v48  ;;  %v1329_v14 = vadd.f32 %v2727_v26, %v3678_v51  ;;  %2777 = vmatmul.mubr.msk.bf16.gmra.mxu1 %vm529_vm1, %v3464_v21 }
 0x138   : > { %v1508_v23 = vadd.f32 %v1481_v52, %v1318_v2  ;;  %v1320_v61 = vpop.f32.mrf.mxu0  ;;  %v1598_v29 = vrot.slane %v1596_v25, 7  ;;  %v1913_v12 = vrot.slane %v1599_v10, 1  ;;  %v1607_v49 = vshll.u32 %v3464_v21, 16  ;;  %2790 = vmatprep.subr.bf16.mxu0 %v2869_v7  ;;  %v2870_v21 = vld [vmem:[%s3651_s7 + $0x8] sm:$0xff]  }
 0x139   : > { %v1560_v28 = vmax.f32 %v1544_v58, 0.0  ;;  %v1549_v13 = vadd.f32 %v3390_v15, %v1526_v22  ;;  %v1511_v39 = vadd.f32 %v2747_v8, %v1329_v14  ;;  %v1321_v0 = vadd.f32 %v1320_v61, %v3679_v43  ;;  %2808 = vmatprep.subr.bf16.mxu1 %v2870_v21 }
 0x13a   : > { %v1524_v4 = vadd.f32 %v1508_v23, %v3423_v32  ;;  %v1601_v36 = vor.u32 %v1599_v10, %v1598_v29  ;;  %v1609_v38 = vor.u32 %v1607_v49, %v1606_v18  ;;  %v1572_v24 = vpack.c.bf16 %v1562_v55, %v1561_v17  ;;  %2809 = vmatpush3.bf16.msra.mxu1 %v2870_v21 }
 0x13b   : > { %v1565_v59 = vmax.f32 %v1549_v13, 0.0  ;;  %v1527_v33 = vadd.f32 %v1511_v39, %v3426_v3  ;;  %v1509_v53 = vadd.f32 %v1484_v11, %v1321_v0  ;;  %v1571_v20 = vpack.c.bf16 %v1560_v28, %v1559_v1  ;;  %2791 = vmatpush3.bf16.msra.mxu0 %v2869_v7 }
 0x13c   : > { %v1547_v52 = vadd.f32 %v3390_v15, %v1524_v4  ;;  %v1602_v50 = vsel %vm444_vm0, %v3445_v34, %v1601_v36  ;;  %v1610_v46 = vsel %vm444_vm0, %v1598_v29, %v1609_v38  ;;  %v1619_v16 = vshrl.u32 %v1572_v24, 16 }
 0x13d   : > { %v1550_v32 = vadd.f32 %v3390_v15, %v1527_v33  ;;  %v1525_v62 = vadd.f32 %v1509_v53, %v3431_v56  ;;  %2756 = vmatprep.mubr.msk.bf16.mxu0 %vm529_vm1, %v1602_v50  ;;  %2780 = vmatprep.mubr.msk.bf16.mxu1 %vm529_vm1, %v1571_v20  ;;  %v1612_v3 = vshrl.u32 %v1571_v20, 16  ;;  %v1615_v41 = vshll.u32 %v1571_v20, 16 }
 0x13e   : > { %v1563_v63 = vmax.f32 %v1547_v52, 0.0  ;;  %2757 = vmatmul.mubr.msk.bf16.gmra.mxu0 %vm529_vm1, %v1610_v46  ;;  %v1621_v35 = vrot.slane %v1619_v16, 7  ;;  %v1622_v6 = vshll.u32 %v1572_v24, 16  ;;  %v1909_v34 = vor.u32 %v3460_v40, %v1581_v9 }
 0x13f   : > { %v1566_v17 = vmax.f32 %v1550_v32, 0.0  ;;  %v1548_v5 = vadd.f32 %v3390_v15, %v1525_v62  ;;  %2781 = vmatmul.mubr.msk.bf16.gmra.mxu1 %vm529_vm1, %v1572_v24  ;;  %v1614_v56 = vrot.slane %v1612_v3, 7  ;;  %v1919_v42 = vrot.slane %v1615_v41, 1 }
 0x140   : > { %v1624_v45 = vor.u32 %v1622_v6, %v1621_v35  ;;  %v1910_v7 = vrot.slane %v1591_v37, 1  ;;  %v1915_v1 = vor.u32 %v1913_v12, %v1596_v25  ;;  %v1916_v31 = vrot.slane %v1607_v49, 1 }
 0x141   : > { %v1564_v30 = vmax.f32 %v1548_v5, 0.0  ;;  %v1617_v54 = vor.u32 %v1615_v41, %v1614_v56  ;;  %v1574_v8 = vpack.c.bf16 %v1566_v17, %v1565_v59  ;;  %v1920_v57 = vor.u32 %v1919_v42, %v1612_v3 }
 0x142   : > { %v1625_v44 = vsel %vm444_vm0, %v1614_v56, %v1624_v45  ;;  %v1911_v9 = vsel %vm776_vm4, %v1909_v34, %v1910_v7  ;;  %v1912_v15 = vor.u32 %v1910_v7, %v1588_v60  ;;  %v1917_v40 = vsel %vm776_vm4, %v1915_v1, %v1916_v31 }
 0x143   : > { %v1645_v2 = vsel %vm2989_vm3, 0, %v1617_v54  ;;  %v1573_v26 = vpack.c.bf16 %v1564_v30, %v1563_v63  ;;  %v1635_v37 = vshrl.u32 %v1574_v8, 16  ;;  %v1638_v25 = vshll.u32 %v1574_v8, 16 }
 0x144   : > { %2760 = vmatprep.mubr.msk.bf16.mxu0 %vm529_vm1, %v1645_v2  ;;  %v1914_v10 = vsel %vm776_vm4, %v1912_v15, %v1913_v12  ;;  %v1921_v18 = vrot.slane %v1622_v6, 1  ;;  %v1918_v13 = vor.u32 %v1916_v31, %v1604_v47  ;;  %v2871_v47 = vld [vmem:[%s3651_s7] sm:$0xff]  }
 0x145   : > { %2784 = vmatprep.mubr.msk.bf16.mxu1 %vm529_vm1, %v1573_v26  ;;  %v1627_v55 = vshrl.u32 %v1573_v26, 16  ;;  %v1630_v58 = vshll.u32 %v1573_v26, 16  ;;  %v1637_v22 = vrot.slane %v1635_v37, 7  ;;  %v1927_v14 = vrot.slane %v1638_v25, 1  ;;  %2810 = vmatprep.subr.bf16.mxu1 %v2871_v47 }
 0x146   : > { %2761 = vmatmul.mubr.msk.bf16.gmra.mxu0 %vm529_vm1, %v1625_v44  ;;  %v1922_v27 = vsel %vm776_vm4, %v1920_v57, %v1921_v18  ;;  %v1923_v48 = vor.u32 %v1921_v18, %v1619_v16  ;;  %v1932_v43 = vsel %vm3205_vm6, %v1918_v13, 0  ;;  %2811 = vmatpush3.bf16.msra.mxu1 %v2871_v47 }
 0x147   : > { %2785 = vmatmul.mubr.msk.bf16.gmra.mxu1 %vm529_vm1, %v1574_v8  ;;  %v1629_v60 = vrot.slane %v1627_v55, 7  ;;  %v1640_v19 = vor.u32 %v1638_v25, %v1637_v22  ;;  %v1924_v51 = vrot.slane %v1630_v58, 1  ;;  %v1929_v0 = vor.u32 %v1927_v14, %v1635_v37 }
 0x149   : > { %v1632_v23 = vor.u32 %v1630_v58, %v1629_v60  ;;  %v1641_v61 = vsel %vm444_vm0, %v1629_v60, %v1640_v19  ;;  %v1925_v29 = vsel %vm776_vm4, %v1923_v48, %v1924_v51  ;;  %v1926_v12 = vor.u32 %v1924_v51, %v1627_v55 }
 0x14a   : > { %v1933_v4 = vsel %vm3205_vm6, %v1929_v0, 0 }
 0x14b   : > { %v1633_v49 = vsel %vm444_vm0, %v1621_v35, %v1632_v23  ;;  %v1928_v28 = vsel %vm776_vm4, %v1926_v12, %v1927_v14 }
 0x14c   : > { %2764 = vmatprep.mubr.msk.bf16.mxu0 %vm529_vm1, %v1633_v49 }
 0x14e   : > { %2765 = vmatmul.mubr.msk.bf16.gmra.mxu0 %vm529_vm1, %v1641_v61 }
 0x14f   : > { %2792 = vmatprep.mubr.msk.bf16.mxu0 %vm529_vm1, %v1911_v9 }
 0x156   : > { %2793 = vmatmul.mubr.msk.bf16.vlgmr.msra.gmra.mxu0 %vm529_vm1, %v1914_v10 }
 0x157   : > { %2796 = vmatprep.mubr.msk.bf16.mxu0 %vm529_vm1, %v1917_v40  ;;  %v3569_v40 = vld [vmem:[%s3650_s6] ss:$0 sm:$0xff] }
 0x15e   : > { %2797 = vmatmul.mubr.msk.bf16.gmra.mxu0 %vm529_vm1, %v1932_v43 }
 0x15f   : > { %2800 = vmatprep.mubr.msk.bf16.mxu0 %vm529_vm1, %v1922_v27 }
 0x166   : > { %2801 = vmatmul.mubr.msk.bf16.gmra.mxu0 %vm529_vm1, %v1925_v29 }
 0x167   : > { %2804 = vmatprep.mubr.msk.bf16.mxu0 %vm529_vm1, %v1928_v28 }
 0x16e   : > { %2805 = vmatmul.mubr.msk.bf16.gmra.mxu0 %vm529_vm1, %v1933_v4 }
 0x1ef   : > { %v2774_v11 = vpop.f32.mrf.mxu1 }
 0x1f1   : > { %v1845_v24 = vpop.f32.mrf.mxu1 }
 0x1f3   : > { %v2775_v53 = vpop.f32.mrf.mxu1 }
 0x1f5   : > { %v1848_v50 = vpop.f32.mrf.mxu1 }
 0x1f6   : > { %v2754_v36 = vpop.f32.mrf.mxu0 }
 0x1f7   : > { %v2778_v32 = vpop.f32.mrf.mxu1  ;;  %v1854_v31 = vadd.f32 %v2774_v11, %v2754_v36 }
 0x1f8   : > { %v1720_v38 = vpop.f32.mrf.mxu0 }
 0x1f9   : > { %v1861_v41 = vpop.f32.mrf.mxu1  ;;  %v1846_v1 = vadd.f32 %v1845_v24, %v1720_v38 }
 0x1fa   : > { %v2755_v59 = vpop.f32.mrf.mxu0 }
 0x1fb   : > { %v2779_v6 = vpop.f32.mrf.mxu1  ;;  %v1857_v54 = vadd.f32 %v2775_v53, %v2755_v59 }
 0x1fc   : > { %v1723_v33 = vpop.f32.mrf.mxu0 }
 0x1fd   : > { %v1864_v5 = vpop.f32.mrf.mxu1  ;;  %v1849_v15 = vadd.f32 %v1848_v50, %v1723_v33 }
 0x1fe   : > { %v2758_v20 = vpop.f32.mrf.mxu0 }
 0x1ff   : > { %v2782_v45 = vpop.f32.mrf.mxu1  ;;  %v1870_v60 = vadd.f32 %v2778_v32, %v2758_v20 }
 0x200   : > { %v1736_v52 = vpop.f32.mrf.mxu0 }
 0x201   : > { %v1877_v57 = vpop.f32.mrf.mxu1  ;;  %v1862_v22 = vadd.f32 %v1861_v41, %v1736_v52 }
 0x202   : > { %v2759_v46 = vpop.f32.mrf.mxu0 }
 0x203   : > { %v2783_v18 = vpop.f32.mrf.mxu1  ;;  %v1873_v51 = vadd.f32 %v2779_v6, %v2759_v46 }
 0x204   : > { %v1739_v16 = vpop.f32.mrf.mxu0 }
 0x205   : > { %v1880_v29 = vpop.f32.mrf.mxu1  ;;  %v1865_v13 = vadd.f32 %v1864_v5, %v1739_v16 }
 0x206   : > { %v2762_v62 = vpop.f32.mrf.mxu0 }
 0x207   : > { %v2786_v36 = vpop.f32.mrf.mxu1  ;;  %v1886_v53 = vadd.f32 %v2782_v45, %v2762_v62 }
 0x208   : > { %v1752_v3 = vpop.f32.mrf.mxu0 }
 0x209   : > { %v1878_v59 = vadd.f32 %v1877_v57, %v1752_v3  ;;  %v1893_v41 = vpop.f32.mrf.mxu1 }
 0x20a   : > { %v2763_v63 = vpop.f32.mrf.mxu0 }
 0x20b   : > { %v1889_v50 = vadd.f32 %v2783_v18, %v2763_v63  ;;  %v2787_v63 = vpop.f32.mrf.mxu1 }
 0x20c   : > { %v3556_v35 = vpop.f32.mrf.mxu0 }
 0x20e   : > { %v3558_v34 = vpop.f32.mrf.mxu0 }
 0x210   : > { %v3560_v17 = vpop.f32.mrf.mxu0 }
 0x212   : > { %v3562_v56 = vpop.f32.mrf.mxu0 }
 0x214   : > { %v3564_v42 = vpop.f32.mrf.mxu0 }
 0x216   : > { %v2794_v7 = vpop.f32.mrf.mxu0 }
 0x217   : > { %v2074_v44 = vadd.f32 %v2794_v7, %v1854_v31 }
 0x218   : > { %v2009_v30 = vpop.f32.mrf.mxu0 }
 0x219   : > { %v2072_v8 = vadd.f32 %v2009_v30, %v1846_v1  ;;  %v2097_v55 = vadd.f32 %v3569_v40, %v2074_v44  ;;  %v1881_v1 = vadd.f32 %v1880_v29, %v3556_v35 }
 0x21a   : > { %v2795_v9 = vpop.f32.mrf.mxu0 }
 0x21b   : > { %v2075_v2 = vadd.f32 %v2795_v9, %v1857_v54  ;;  %v2095_v37 = vadd.f32 %v3569_v40, %v2072_v8  ;;  %v2113_v12 = vmax.f32 %v2097_v55, 0.0  ;;  %v1894_v9 = vadd.f32 %v1893_v41, %v3560_v17  ;;  %v1896_v55 = vpop.f32.mrf.mxu1 }
 0x21c   : > { %v2012_v26 = vpop.f32.mrf.mxu0 }
 0x21d   : > { %v2098_v25 = vadd.f32 %v3569_v40, %v2075_v2  ;;  %v2073_v10 = vadd.f32 %v2012_v26, %v1849_v15  ;;  %v2111_v14 = vmax.f32 %v2095_v37, 0.0  ;;  %v1902_v15 = vadd.f32 %v2786_v36, %v3558_v34 }
 0x21e   : > { %v2798_v58 = vpop.f32.mrf.mxu0  ;;  %v1905_v37 = vadd.f32 %v2787_v63, %v3562_v56 }
 0x21f   : > { %v2096_v27 = vadd.f32 %v3569_v40, %v2073_v10  ;;  %v2114_v19 = vmax.f32 %v2098_v25, 0.0  ;;  %v2078_v49 = vadd.f32 %v2798_v58, %v1870_v60  ;;  %v1897_v60 = vadd.f32 %v1896_v55, %v3564_v42 }
 0x220   : > { %v2025_v48 = vpop.f32.mrf.mxu0 }
 0x221   : > { %v2112_v23 = vmax.f32 %v2096_v27, 0.0  ;;  %v2076_v61 = vadd.f32 %v2025_v48, %v1862_v22  ;;  %v2128_v0 = vpack.c.bf16 %v2114_v19, %v2113_v12  ;;  %v2101_v38 = vadd.f32 %v3569_v40, %v2078_v49 }
 0x222   : > { %v2799_v28 = vpop.f32.mrf.mxu0 }
 0x223   : > { %v2127_v39 = vpack.c.bf16 %v2112_v23, %v2111_v14  ;;  %v2079_v43 = vadd.f32 %v2799_v28, %v1873_v51  ;;  %v2099_v21 = vadd.f32 %v3569_v40, %v2076_v61  ;;  %v2117_v6 = vmax.f32 %v2101_v38, 0.0 }
 0x224   : > { %v2028_v4 = vpop.f32.mrf.mxu0 }
 0x225   : > { %v2102_v47 = vadd.f32 %v3569_v40, %v2079_v43  ;;  %v2077_v11 = vadd.f32 %v2028_v4, %v1865_v13  ;;  %2812 = vmatprep.mubr.msk.bf16.mxu1 %vm529_vm1, %v2127_v39  ;;  %v2115_v46 = vmax.f32 %v2099_v21, 0.0  ;;  %v2512_v39 = vld [vmem:[%s3652_s8] ss:$0 sm:$0xff] }
 0x226   : > { %v2802_v24 = vpop.f32.mrf.mxu0  ;;  %2813 = vmatmul.mubr.msk.bf16.vlgmr.msra.gmra.mxu1 %vm529_vm1, %v2128_v0 }
 0x227   : > { %v2100_v33 = vadd.f32 %v3569_v40, %v2077_v11  ;;  %v2118_v20 = vmax.f32 %v2102_v47, 0.0  ;;  %v2082_v5 = vadd.f32 %v2802_v24, %v1886_v53 }
 0x228   : > { %v2041_v52 = vpop.f32.mrf.mxu0 }
 0x229   : > { %v2116_v16 = vmax.f32 %v2100_v33, 0.0  ;;  %v2080_v32 = vadd.f32 %v2041_v52, %v1878_v59  ;;  %v2130_v54 = vpack.c.bf16 %v2118_v20, %v2117_v6  ;;  %v2105_v57 = vadd.f32 %v3569_v40, %v2082_v5 }
 0x22a   : > { %v2803_v7 = vpop.f32.mrf.mxu0 }
 0x22b   : > { %v2129_v31 = vpack.c.bf16 %v2116_v16, %v2115_v46  ;;  %v2083_v30 = vadd.f32 %v2803_v7, %v1889_v50  ;;  %v2103_v3 = vadd.f32 %v3569_v40, %v2080_v32  ;;  %v2121_v58 = vmax.f32 %v2105_v57, 0.0 }
 0x22c   : > { %v2044_v8 = vpop.f32.mrf.mxu0 }
 0x22d   : > { %v2106_v62 = vadd.f32 %v3569_v40, %v2083_v30  ;;  %v2081_v45 = vadd.f32 %v2044_v8, %v1881_v1  ;;  %2816 = vmatprep.mubr.msk.bf16.mxu1 %vm529_vm1, %v2129_v31  ;;  %v2119_v25 = vmax.f32 %v2103_v3, 0.0 }
 0x22e   : > { %v2806_v44 = vpop.f32.mrf.mxu0  ;;  %2817 = vmatmul.mubr.msk.bf16.gmra.mxu1 %vm529_vm1, %v2130_v54 }
 0x22f   : > { %v2104_v35 = vadd.f32 %v3569_v40, %v2081_v45  ;;  %v2122_v2 = vmax.f32 %v2106_v62, 0.0  ;;  %v2086_v22 = vadd.f32 %v2806_v44, %v1902_v15 }
 0x230   : > { %v2057_v26 = vpop.f32.mrf.mxu0 }
 0x231   : > { %v2120_v10 = vmax.f32 %v2104_v35, 0.0  ;;  %v2084_v18 = vadd.f32 %v2057_v26, %v1894_v9  ;;  %v2132_v17 = vpack.c.bf16 %v2122_v2, %v2121_v58  ;;  %v2109_v56 = vadd.f32 %v3569_v40, %v2086_v22 }
 0x232   : > { %v2807_v27 = vpop.f32.mrf.mxu0 }
 0x233   : > { %v2131_v19 = vpack.c.bf16 %v2120_v10, %v2119_v25  ;;  %v2087_v48 = vadd.f32 %v2807_v27, %v1905_v37  ;;  %v2107_v34 = vadd.f32 %v3569_v40, %v2084_v18  ;;  %v2125_v49 = vmax.f32 %v2109_v56, 0.0 }
 0x234   : > { %v2060_v51 = vpop.f32.mrf.mxu0 }
 0x235   : > { %v2110_v14 = vadd.f32 %v3569_v40, %v2087_v48  ;;  %v2085_v23 = vadd.f32 %v2060_v51, %v1897_v60  ;;  %2820 = vmatprep.mubr.msk.bf16.mxu1 %vm529_vm1, %v2131_v19  ;;  %v2123_v42 = vmax.f32 %v2107_v34, 0.0 }
 0x236   : > { %2821 = vmatmul.mubr.msk.bf16.gmra.mxu1 %vm529_vm1, %v2132_v17 }
 0x237   : > { %v2108_v61 = vadd.f32 %v3569_v40, %v2085_v23  ;;  %v2126_v29 = vmax.f32 %v2110_v14, 0.0 }
 0x239   : > { %v2124_v12 = vmax.f32 %v2108_v61, 0.0  ;;  %v2134_v13 = vpack.c.bf16 %v2126_v29, %v2125_v49 }
 0x23b   : > { %v2133_v28 = vpack.c.bf16 %v2124_v12, %v2123_v42 }
 0x23d   : > { %2824 = vmatprep.mubr.msk.bf16.mxu1 %vm529_vm1, %v2133_v28 }
 0x23e   : > { %2825 = vmatmul.mubr.msk.bf16.gmra.mxu1 %vm529_vm1, %v2134_v13 }
 0x2e6   : > { %v2814_v40 = vpop.f32.mrf.mxu1 }
 0x2e7   : > { %v2225_v43 = vadd.f32 %v2814_v40, %v2512_v39 }
 0x2e8   : > { %v2216_v0 = vpop.f32.mrf.mxu1 }
 0x2e9   : > { %2282 = vst.msk [vmem:[%s3607_s10 + $0x10] sm:$0xff] %vm2279_vm7, %v2225_v43  ;;  %v2217_v4 = vadd.f32 %v2512_v39, %v2216_v0 }
 0x2ea   : > { %v2815_v21 = vpop.f32.mrf.mxu1 }
 0x2eb   : > { %2280 = vst.msk [vmem:[%s3607_s10] sm:$0xff] %vm2279_vm7, %v2217_v4  ;;  %v2228_v47 = vadd.f32 %v2815_v21, %v2512_v39 }
 0x2ec   : > { %v2219_v11 = vpop.f32.mrf.mxu1 }
 0x2ed   : > { %2283 = vst.msk [vmem:[%s3607_s10 + $0x18] sm:$0xff] %vm2279_vm7, %v2228_v47  ;;  %v2220_v36 = vadd.f32 %v2512_v39, %v2219_v11 }
 0x2ee   : > { %v2818_v38 = vpop.f32.mrf.mxu1 }
 0x2ef   : > { %2281 = vst.msk [vmem:[%s3607_s10 + $0x8] sm:$0xff] %vm2279_vm7, %v2220_v36  ;;  %v2241_v24 = vadd.f32 %v2818_v38, %v2512_v39 }
 0x2f0   : > { %v2232_v59 = vpop.f32.mrf.mxu1 }
 0x2f1   : > { %2286 = vst.msk [vmem:[%s3607_s10 + $0x30] sm:$0xff] %vm2279_vm7, %v2241_v24  ;;  %v2233_v33 = vadd.f32 %v2512_v39, %v2232_v59 }
 0x2f2   : > { %v2819_v53 = vpop.f32.mrf.mxu1 }
 0x2f3   : > { %2284 = vst.msk [vmem:[%s3607_s10 + $0x20] sm:$0xff] %vm2279_vm7, %v2233_v33  ;;  %v2244_v20 = vadd.f32 %v2819_v53, %v2512_v39 }
 0x2f4   : > { %v2235_v52 = vpop.f32.mrf.mxu1 }
 0x2f5   : > { %2287 = vst.msk [vmem:[%s3607_s10 + $0x38] sm:$0xff] %vm2279_vm7, %v2244_v20  ;;  %v2236_v50 = vadd.f32 %v2512_v39, %v2235_v52 }
 0x2f6   : > { %v2822_v46 = vpop.f32.mrf.mxu1 }
 0x2f7   : > { %2285 = vst.msk [vmem:[%s3607_s10 + $0x28] sm:$0xff] %vm2279_vm7, %v2236_v50  ;;  %v2257_v16 = vadd.f32 %v2822_v46, %v2512_v39 }
 0x2f8   : > { %v2248_v32 = vpop.f32.mrf.mxu1 }
 0x2f9   : > { %2290 = vst.msk [vmem:[%s3607_s10 + $0x50] sm:$0xff] %vm2279_vm7, %v2257_v16  ;;  %v2249_v41 = vadd.f32 %v2512_v39, %v2248_v32 }
 0x2fa   : > { %v2823_v6 = vpop.f32.mrf.mxu1 }
 0x2fb   : > { %2288 = vst.msk [vmem:[%s3607_s10 + $0x40] sm:$0xff] %vm2279_vm7, %v2249_v41  ;;  %v2260_v5 = vadd.f32 %v2823_v6, %v2512_v39 }
 0x2fc   : > { %v2251_v7 = vpop.f32.mrf.mxu1 }
 0x2fd   : > { %2291 = vst.msk [vmem:[%s3607_s10 + $0x58] sm:$0xff] %vm2279_vm7, %v2260_v5  ;;  %v2252_v1 = vadd.f32 %v2512_v39, %v2251_v7 }
 0x2fe   : > { %v2826_v31 = vpop.f32.mrf.mxu1 }
 0x2ff   : > { %2289 = vst.msk [vmem:[%s3607_s10 + $0x48] sm:$0xff] %vm2279_vm7, %v2252_v1  ;;  %v2273_v30 = vadd.f32 %v2826_v31, %v2512_v39 }
 0x300   : > { %v2264_v54 = vpop.f32.mrf.mxu1 }
 0x301   : > { %2294 = vst.msk [vmem:[%s3607_s10 + $0x70] sm:$0xff] %vm2279_vm7, %v2273_v30  ;;  %v2265_v8 = vadd.f32 %v2512_v39, %v2264_v54 }
 0x302   : > { %v2827_v3 = vpop.f32.mrf.mxu1 }
 0x303   : > { %2292 = vst.msk [vmem:[%s3607_s10 + $0x60] sm:$0xff] %vm2279_vm7, %v2265_v8  ;;  %v2276_v62 = vadd.f32 %v2827_v3, %v2512_v39 }
 0x304   : > { %v2267_v45 = vpop.f32.mrf.mxu1 }
 0x305   : > { %2295 = vst.msk [vmem:[%s3607_s10 + $0x78] sm:$0xff] %vm2279_vm7, %v2276_v62  ;;  %v2268_v63 = vadd.f32 %v2512_v39, %v2267_v45 }
 0x307   : > { %2293 = vst.msk [vmem:[%s3607_s10 + $0x68] sm:$0xff] %vm2279_vm7, %v2268_v63 }
 0x308 PF: > { %s19_s30 = sadd.s32 1, %s2878_s30  }
 0x309   : > { %p16_p4 = scmp.ge.s32.totalorder %s19_s30, 6  }
 0x30b   :  { %18 = sbr.rel (!%p16_p4) target bundleno = 1 (0x1), region = 95 }

</bundles_post_ra>
